<compile_context>
chip_gen: v7x
topology: tpu7x:2x2x1
jax: 0.10.0
libtpu: 0.0.40
codegen_flags: <defaults>
</compile_context>

<pallas_src>
import jax
import jax.numpy as jnp
import numpy as np
from jax.experimental import pallas as pl
from jax.experimental.pallas import tpu as pltpu


N_BATCH = 2
C_IN = 3
C_MID = 8
H0 = W0 = 16
N_CONV = 6
N_BN = 3
EPS = 1e-5

H_OUT = H0 + 2 * N_CONV            # 28: each 1x1 conv (stride 1, padding 1) grows H,W by 2
PAD = (H_OUT - H0) // 2            # 6
P_FRAME = H_OUT * H_OUT            # 784 pixels per (batch, channel) frame
P_TOT = N_BATCH * P_FRAME          # 1568 lanes: index = n*784 + h*28 + w
RING_LANES = 128                   # one vreg; lane k holds the ring born at conv k


def _build_static_tables():
    """Precomputed constants (pure layout / combinatorics, not parameters)."""
    ii, jj = np.meshgrid(np.arange(H_OUT), np.arange(H_OUT), indexing="ij")
    depth = np.minimum(np.minimum(ii, jj), np.minimum(H_OUT - 1 - ii, H_OUT - 1 - jj))

    # masks rows 0..5: pixels belonging to the ring born at conv k
    #       row 6   : interior 16x16 "core" pixels (depth >= 6)
    masks = np.zeros((7, N_BATCH, P_FRAME), np.float32)
    for k in range(N_CONV):
        m = (depth == (N_CONV - 1 - k)).astype(np.float32).reshape(-1)
        masks[k, :, :] = m[None, :]
    masks[6, :, :] = (depth >= N_CONV).astype(np.float32).reshape(-1)[None, :]
    masks = masks.reshape(7, P_TOT)

    # BN ring pixel-count weights: cnt[bi, k] = N_BATCH * (#pixels of ring born
    # at conv k at the time of BatchNorm bi); 0 for rings not yet born.
    cnt = np.zeros((N_BN, RING_LANES), np.float32)
    for bi in range(N_BN):
        L = 2 * bi + 1                  # index of the conv right before this BN
        S = H0 + 2 * (L + 1)            # current spatial size (20 / 24 / 28)
        for k in range(L + 1):
            d = L - k                   # current depth of the ring born at conv k
            cnt[bi, k] = N_BATCH * (4 * (S - 2 * d) - 4)
    return jnp.asarray(masks), jnp.asarray(cnt)


_MASKS, _CNT = _build_static_tables()


def _fused_net_kernel(x_ref, w_ref, b_ref, g_ref, beta_ref, cnt_ref, mask_ref, o_ref):
    """Entire Conv/Conv/BN x3 network, fully VMEM/register resident.

    Channels on sublanes, flattened (batch, 28x28) pixels on lanes.
      x_ref    : (3, 1568)  input placed at the centre of each 28x28 frame
      w_ref    : (8, 48)    conv weights, w_ref[co, li*8 + ci] = W[li][co, ci]
      b_ref    : (8, 6)     conv biases,  b_ref[co, li]
      g_ref    : (8, 3)     BN gamma,     g_ref[c, bi]
      beta_ref : (8, 3)     BN beta
      cnt_ref  : (3, 128)   BN ring pixel-count weights (lane k = conv-k ring)
      mask_ref : (7, 1568)  rows 0..5 ring masks, row 6 core (16x16 interior) mask
      o_ref    : (8, 1568)  final activation frames (lane-dense output slab)
    """
    W = w_ref[...]                                        # (8, 48) hoisted once
    B = b_ref[...]                                        # (8, 6)

    frame = x_ref[...]                                    # (3, P_TOT): layer-0 source
    ring = jnp.zeros((C_MID, RING_LANES), jnp.float32)    # lane k = ring born at conv k
    lane = jax.lax.broadcasted_iota(jnp.int32, (C_MID, RING_LANES), 1)

    # Hoisted sublane-broadcast of the core mask (JAX does not CSE broadcasts).
    core_mask = jnp.broadcast_to(mask_ref[6:7, :], (C_MID, P_TOT))

    def channel_mix(src, li, cin):
        # 1x1 conv channel mix: dst[co, p] = sum_ci W[li][co, ci] * src[ci, p] + b[li][co]
        # as `cin` rank-1 VPU FMAs on the lane-dense slab (no MXU).
        acc = None
        for ci in range(cin):
            idx = li * C_MID + ci
            term = W[:, idx:idx + 1] * src[ci:ci + 1, :]   # (8,1)*(1,P) -> (8,P)
            acc = term if acc is None else acc + term
        return acc + B[:, li:li + 1]

    def batchnorm(frame, ring, bi):
        # Training-mode BatchNorm2d: batch statistics, biased variance,
        # fused single pass (sum & sum-of-squares) + analytic ring corrections.
        L = 2 * bi + 1
        S = H0 + 2 * (L + 1)
        inv_p = 1.0 / float(N_BATCH * S * S)
        cw = cnt_ref[bi:bi + 1, :]                         # (1, 128) ring pixel counts
        fm = frame * core_mask
        s = (jnp.sum(fm, axis=1, keepdims=True)
             + jnp.sum(ring * cw, axis=1, keepdims=True))           # (8, 1)
        ss = (jnp.sum(fm * frame, axis=1, keepdims=True)
              + jnp.sum(ring * ring * cw, axis=1, keepdims=True))   # (8, 1)
        mean = s * inv_p
        var = ss * inv_p - mean * mean
        scale = g_ref[:, bi:bi + 1] * jax.lax.rsqrt(var + EPS)      # (8, 1)
        shift = beta_ref[:, bi:bi + 1] - mean * scale               # (8, 1)
        return frame * scale + shift, ring * scale + shift

    cin = C_IN
    for li in range(N_CONV):
        new_frame = channel_mix(frame, li, cin)
        new_ring = channel_mix(ring, li, cin)
        # Ring born at conv li: a 1x1 conv of the zero padding is exactly the bias.
        new_ring = jnp.where(lane == li, B[:, li:li + 1], new_ring)
        frame, ring = new_frame, new_ring
        cin = C_MID
        if li % 2 == 1:                                   # convs 1, 3, 5 -> BN 0, 1, 2
            frame, ring = batchnorm(frame, ring, li // 2)

    # Assemble the final 28x28 frames: interior from the core trajectory,
    # border rings from the per-channel constants.  One dense, aligned store.
    out = frame * core_mask
    for k in range(N_CONV):
        out = out + ring[:, k:k + 1] * mask_ref[k:k + 1, :]
    o_ref[...] = out


def model_forward(params, x_nchw):
    conv_w, conv_b, bn_g, bn_b = params     # (6,8,8)[li,co,ci], (6,8), (3,8), (3,8)

    # Kernel-friendly layouts: output channel on sublanes.
    wT = conv_w.transpose(1, 0, 2).reshape(C_MID, N_CONV * C_MID)   # (8, 48)
    bT = conv_b.T                                                   # (8, 6)
    gT = bn_g.T                                                     # (8, 3)
    betaT = bn_b.T                                                  # (8, 3)

    # Place the 16x16 input at the centre of the final 28x28 frame (zeros in
    # the 6-pixel border), channels on sublanes, pixels flattened on lanes.
    x = x_nchw.astype(jnp.float32)
    xp = jnp.pad(x, ((0, 0), (0, 0), (PAD, PAD), (PAD, PAD)))       # (N, 3, 28, 28)
    xp = xp.transpose(1, 0, 2, 3).reshape(C_IN, P_TOT)              # (3, 1568)

    out_flat = pl.pallas_call(
        _fused_net_kernel,
        out_shape=jax.ShapeDtypeStruct((C_MID, P_TOT), jnp.float32),
        in_specs=[pl.BlockSpec(memory_space=pltpu.MemorySpace.VMEM)] * 7,
        out_specs=pl.BlockSpec(memory_space=pltpu.MemorySpace.VMEM),
    )(xp, wT, bT, gT, betaT, _CNT, _MASKS)

    # (8, N*784) -> (N, 8, 28, 28): pure layout plumbing in the wrapper.
    return out_flat.reshape(C_MID, N_BATCH, H_OUT, H_OUT).transpose(1, 0, 2, 3)


def init_params(key):
    """Deterministic synthetic parameters (shapes match the PyTorch module)."""
    specs = [(C_IN, C_MID)] + [(C_MID, C_MID)] * (N_CONV - 1)
    conv_w = jnp.zeros((N_CONV, C_MID, C_MID), jnp.float32)   # [li, c_out, c_in]
    conv_b = jnp.zeros((N_CONV, C_MID), jnp.float32)
    keys = jax.random.split(key, 2 * N_CONV)
    for li, (cin, cout) in enumerate(specs):
        bound = 1.0 / float(np.sqrt(cin))
        w = jax.random.uniform(keys[2 * li], (cout, cin), jnp.float32, -bound, bound)
        b = jax.random.uniform(keys[2 * li + 1], (cout,), jnp.float32, -bound, bound)
        conv_w = conv_w.at[li, :, :cin].set(w)
        conv_b = conv_b.at[li].set(b)
    bn_g = jnp.ones((N_BN, C_MID), jnp.float32)    # fresh BatchNorm2d: gamma = 1
    bn_b = jnp.zeros((N_BN, C_MID), jnp.float32)   # beta = 0
    return conv_w, conv_b, bn_g, bn_b


def _reference_forward(params, x_nchw):
    """Pure-JAX reference (pad + einsum + train-mode BN)."""
    conv_w, conv_b, bn_g, bn_b = params
    x = x_nchw.astype(jnp.float32)
    li = 0
    for blk in range(N_BN):
        for _ in range(2):
            cin = x.shape[1]
            xpad = jnp.pad(x, ((0, 0), (0, 0), (1, 1), (1, 1)))
            x = jnp.einsum('nihw,oi->nohw', xpad, conv_w[li, :, :cin]) \
                + conv_b[li][None, :, None, None]
            li += 1
        mean = jnp.mean(x, axis=(0, 2, 3), keepdims=True)
        var = jnp.mean((x - mean) ** 2, axis=(0, 2, 3), keepdims=True)
        x = (x - mean) * jax.lax.rsqrt(var + EPS) \
            * bn_g[blk][None, :, None, None] + bn_b[blk][None, :, None, None]
    return x


if __name__ == "__main__":
    key = jax.random.PRNGKey(0)
    k_params, k_x = jax.random.split(key)
    params = init_params(k_params)

    # Small NCHW input consistent with the module (in-channels must be 3).
    x = jax.random.normal(k_x, (N_BATCH, C_IN, H0, W0), dtype=jnp.float32)

    fwd = jax.jit(model_forward)
    out = jax.block_until_ready(fwd(params, x))

    # Each of the 6 convs (padding=1, kernel=1) grows spatial dims by 2.
    assert out.shape == (N_BATCH, C_MID, H_OUT, H_OUT), out.shape
    assert out.dtype == jnp.float32

    ref = _reference_forward(params, x)
    assert bool(jnp.all(jnp.isfinite(out)))
    assert jnp.allclose(out, ref, atol=1e-4, rtol=1e-4), \
        float(jnp.max(jnp.abs(out - ref)))

    print("KERNEL_OK")
</pallas_src>

<mosaic_0001>
module attributes {stable_mosaic.version = 11 : i64} {
  func.func @_fused_net_kernel(%arg0: memref<3x1568xf32, #tpu.memory_space<vmem>>, %arg1: memref<8x48xf32, #tpu.memory_space<vmem>>, %arg2: memref<8x6xf32, #tpu.memory_space<vmem>>, %arg3: memref<8x3xf32, #tpu.memory_space<vmem>>, %arg4: memref<8x3xf32, #tpu.memory_space<vmem>>, %arg5: memref<3x128xf32, #tpu.memory_space<vmem>>, %arg6: memref<7x1568xf32, #tpu.memory_space<vmem>>, %arg7: memref<8x1568xf32, #tpu.memory_space<vmem>>) attributes {dimension_semantics = [], scalar_prefetch = 0 : i64, scratch_operands = 0 : i64, tpu.core_type = #tpu.core_type<tc>} {
    %c0 = arith.constant 0 : index
    %c0_0 = arith.constant 0 : index
    %0 = vector.load %arg1[%c0, %c0_0] : memref<8x48xf32, #tpu.memory_space<vmem>>, vector<8x48xf32>
    %c0_1 = arith.constant 0 : index
    %c0_2 = arith.constant 0 : index
    %1 = vector.load %arg2[%c0_1, %c0_2] : memref<8x6xf32, #tpu.memory_space<vmem>>, vector<8x6xf32>
    %c0_3 = arith.constant 0 : index
    %c0_4 = arith.constant 0 : index
    %2 = vector.load %arg0[%c0_3, %c0_4] : memref<3x1568xf32, #tpu.memory_space<vmem>>, vector<3x1568xf32>
    %cst = arith.constant 0.000000e+00 : f32
    %3 = vector.broadcast %cst : f32 to vector<8x128xf32>
    %4 = tpu.iota {dimensions = array<i32: 1>} : vector<8x128xi32>
    %c6 = arith.constant 6 : index
    %c0_5 = arith.constant 0 : index
    %5 = vector.load %arg6[%c6, %c0_5] : memref<7x1568xf32, #tpu.memory_space<vmem>>, vector<1x1568xf32>
    %6 = vector.shape_cast %5 : vector<1x1568xf32> to vector<1x1568xf32>
    %7 = vector.broadcast %6 : vector<1x1568xf32> to vector<8x1568xf32>
    %8 = vector.extract_strided_slice %0 {offsets = [0, 0], sizes = [8, 1], strides = [1, 1]} : vector<8x48xf32> to vector<8x1xf32>
    %9 = vector.extract_strided_slice %2 {offsets = [0, 0], sizes = [1, 1568], strides = [1, 1]} : vector<3x1568xf32> to vector<1x1568xf32>
    %10 = vector.broadcast %8 : vector<8x1xf32> to vector<8x1568xf32>
    %11 = vector.broadcast %9 : vector<1x1568xf32> to vector<8x1568xf32>
    %12 = arith.mulf %10, %11 : vector<8x1568xf32>
    %13 = vector.extract_strided_slice %0 {offsets = [0, 1], sizes = [8, 1], strides = [1, 1]} : vector<8x48xf32> to vector<8x1xf32>
    %14 = vector.extract_strided_slice %2 {offsets = [1, 0], sizes = [1, 1568], strides = [1, 1]} : vector<3x1568xf32> to vector<1x1568xf32>
    %15 = vector.broadcast %13 : vector<8x1xf32> to vector<8x1568xf32>
    %16 = vector.broadcast %14 : vector<1x1568xf32> to vector<8x1568xf32>
    %17 = arith.mulf %15, %16 : vector<8x1568xf32>
    %18 = arith.addf %12, %17 : vector<8x1568xf32>
    %19 = vector.extract_strided_slice %0 {offsets = [0, 2], sizes = [8, 1], strides = [1, 1]} : vector<8x48xf32> to vector<8x1xf32>
    %20 = vector.extract_strided_slice %2 {offsets = [2, 0], sizes = [1, 1568], strides = [1, 1]} : vector<3x1568xf32> to vector<1x1568xf32>
    %21 = vector.broadcast %19 : vector<8x1xf32> to vector<8x1568xf32>
    %22 = vector.broadcast %20 : vector<1x1568xf32> to vector<8x1568xf32>
    %23 = arith.mulf %21, %22 : vector<8x1568xf32>
    %24 = arith.addf %18, %23 : vector<8x1568xf32>
    %25 = vector.extract_strided_slice %1 {offsets = [0, 0], sizes = [8, 1], strides = [1, 1]} : vector<8x6xf32> to vector<8x1xf32>
    %26 = vector.broadcast %25 : vector<8x1xf32> to vector<8x1568xf32>
    %27 = arith.addf %24, %26 : vector<8x1568xf32>
    %28 = vector.extract_strided_slice %0 {offsets = [0, 0], sizes = [8, 1], strides = [1, 1]} : vector<8x48xf32> to vector<8x1xf32>
    %29 = vector.extract_strided_slice %3 {offsets = [0, 0], sizes = [1, 128], strides = [1, 1]} : vector<8x128xf32> to vector<1x128xf32>
    %30 = vector.broadcast %28 : vector<8x1xf32> to vector<8x128xf32>
    %31 = vector.broadcast %29 : vector<1x128xf32> to vector<8x128xf32>
    %32 = arith.mulf %30, %31 : vector<8x128xf32>
    %33 = vector.extract_strided_slice %0 {offsets = [0, 1], sizes = [8, 1], strides = [1, 1]} : vector<8x48xf32> to vector<8x1xf32>
    %34 = vector.extract_strided_slice %3 {offsets = [1, 0], sizes = [1, 128], strides = [1, 1]} : vector<8x128xf32> to vector<1x128xf32>
    %35 = vector.broadcast %33 : vector<8x1xf32> to vector<8x128xf32>
    %36 = vector.broadcast %34 : vector<1x128xf32> to vector<8x128xf32>
    %37 = arith.mulf %35, %36 : vector<8x128xf32>
    %38 = arith.addf %32, %37 : vector<8x128xf32>
    %39 = vector.extract_strided_slice %0 {offsets = [0, 2], sizes = [8, 1], strides = [1, 1]} : vector<8x48xf32> to vector<8x1xf32>
    %40 = vector.extract_strided_slice %3 {offsets = [2, 0], sizes = [1, 128], strides = [1, 1]} : vector<8x128xf32> to vector<1x128xf32>
    %41 = vector.broadcast %39 : vector<8x1xf32> to vector<8x128xf32>
    %42 = vector.broadcast %40 : vector<1x128xf32> to vector<8x128xf32>
    %43 = arith.mulf %41, %42 : vector<8x128xf32>
    %44 = arith.addf %38, %43 : vector<8x128xf32>
    %45 = vector.extract_strided_slice %1 {offsets = [0, 0], sizes = [8, 1], strides = [1, 1]} : vector<8x6xf32> to vector<8x1xf32>
    %46 = vector.broadcast %45 : vector<8x1xf32> to vector<8x128xf32>
    %47 = arith.addf %44, %46 : vector<8x128xf32>
    %c0_i32 = arith.constant 0 : i32
    %48 = vector.broadcast %c0_i32 : i32 to vector<8x128xi32>
    %49 = arith.cmpi eq, %4, %48 : vector<8x128xi32>
    %50 = vector.extract_strided_slice %1 {offsets = [0, 0], sizes = [8, 1], strides = [1, 1]} : vector<8x6xf32> to vector<8x1xf32>
    %51 = vector.shape_cast %50 : vector<8x1xf32> to vector<8x1xf32>
    %52 = vector.broadcast %51 : vector<8x1xf32> to vector<8x128xf32>
    %53 = arith.select %49, %52, %47 : vector<8x128xi1>, vector<8x128xf32>
    %54 = vector.extract_strided_slice %0 {offsets = [0, 8], sizes = [8, 1], strides = [1, 1]} : vector<8x48xf32> to vector<8x1xf32>
    %55 = vector.extract_strided_slice %27 {offsets = [0, 0], sizes = [1, 1568], strides = [1, 1]} : vector<8x1568xf32> to vector<1x1568xf32>
    %56 = vector.broadcast %54 : vector<8x1xf32> to vector<8x1568xf32>
    %57 = vector.broadcast %55 : vector<1x1568xf32> to vector<8x1568xf32>
    %58 = arith.mulf %56, %57 : vector<8x1568xf32>
    %59 = vector.extract_strided_slice %0 {offsets = [0, 9], sizes = [8, 1], strides = [1, 1]} : vector<8x48xf32> to vector<8x1xf32>
    %60 = vector.extract_strided_slice %27 {offsets = [1, 0], sizes = [1, 1568], strides = [1, 1]} : vector<8x1568xf32> to vector<1x1568xf32>
    %61 = vector.broadcast %59 : vector<8x1xf32> to vector<8x1568xf32>
    %62 = vector.broadcast %60 : vector<1x1568xf32> to vector<8x1568xf32>
    %63 = arith.mulf %61, %62 : vector<8x1568xf32>
    %64 = arith.addf %58, %63 : vector<8x1568xf32>
    %65 = vector.extract_strided_slice %0 {offsets = [0, 10], sizes = [8, 1], strides = [1, 1]} : vector<8x48xf32> to vector<8x1xf32>
    %66 = vector.extract_strided_slice %27 {offsets = [2, 0], sizes = [1, 1568], strides = [1, 1]} : vector<8x1568xf32> to vector<1x1568xf32>
    %67 = vector.broadcast %65 : vector<8x1xf32> to vector<8x1568xf32>
    %68 = vector.broadcast %66 : vector<1x1568xf32> to vector<8x1568xf32>
    %69 = arith.mulf %67, %68 : vector<8x1568xf32>
    %70 = arith.addf %64, %69 : vector<8x1568xf32>
    %71 = vector.extract_strided_slice %0 {offsets = [0, 11], sizes = [8, 1], strides = [1, 1]} : vector<8x48xf32> to vector<8x1xf32>
    %72 = vector.extract_strided_slice %27 {offsets = [3, 0], sizes = [1, 1568], strides = [1, 1]} : vector<8x1568xf32> to vector<1x1568xf32>
    %73 = vector.broadcast %71 : vector<8x1xf32> to vector<8x1568xf32>
    %74 = vector.broadcast %72 : vector<1x1568xf32> to vector<8x1568xf32>
    %75 = arith.mulf %73, %74 : vector<8x1568xf32>
    %76 = arith.addf %70, %75 : vector<8x1568xf32>
    %77 = vector.extract_strided_slice %0 {offsets = [0, 12], sizes = [8, 1], strides = [1, 1]} : vector<8x48xf32> to vector<8x1xf32>
    %78 = vector.extract_strided_slice %27 {offsets = [4, 0], sizes = [1, 1568], strides = [1, 1]} : vector<8x1568xf32> to vector<1x1568xf32>
    %79 = vector.broadcast %77 : vector<8x1xf32> to vector<8x1568xf32>
    %80 = vector.broadcast %78 : vector<1x1568xf32> to vector<8x1568xf32>
    %81 = arith.mulf %79, %80 : vector<8x1568xf32>
    %82 = arith.addf %76, %81 : vector<8x1568xf32>
    %83 = vector.extract_strided_slice %0 {offsets = [0, 13], sizes = [8, 1], strides = [1, 1]} : vector<8x48xf32> to vector<8x1xf32>
    %84 = vector.extract_strided_slice %27 {offsets = [5, 0], sizes = [1, 1568], strides = [1, 1]} : vector<8x1568xf32> to vector<1x1568xf32>
    %85 = vector.broadcast %83 : vector<8x1xf32> to vector<8x1568xf32>
    %86 = vector.broadcast %84 : vector<1x1568xf32> to vector<8x1568xf32>
    %87 = arith.mulf %85, %86 : vector<8x1568xf32>
    %88 = arith.addf %82, %87 : vector<8x1568xf32>
    %89 = vector.extract_strided_slice %0 {offsets = [0, 14], sizes = [8, 1], strides = [1, 1]} : vector<8x48xf32> to vector<8x1xf32>
    %90 = vector.extract_strided_slice %27 {offsets = [6, 0], sizes = [1, 1568], strides = [1, 1]} : vector<8x1568xf32> to vector<1x1568xf32>
    %91 = vector.broadcast %89 : vector<8x1xf32> to vector<8x1568xf32>
    %92 = vector.broadcast %90 : vector<1x1568xf32> to vector<8x1568xf32>
    %93 = arith.mulf %91, %92 : vector<8x1568xf32>
    %94 = arith.addf %88, %93 : vector<8x1568xf32>
    %95 = vector.extract_strided_slice %0 {offsets = [0, 15], sizes = [8, 1], strides = [1, 1]} : vector<8x48xf32> to vector<8x1xf32>
    %96 = vector.extract_strided_slice %27 {offsets = [7, 0], sizes = [1, 1568], strides = [1, 1]} : vector<8x1568xf32> to vector<1x1568xf32>
    %97 = vector.broadcast %95 : vector<8x1xf32> to vector<8x1568xf32>
    %98 = vector.broadcast %96 : vector<1x1568xf32> to vector<8x1568xf32>
    %99 = arith.mulf %97, %98 : vector<8x1568xf32>
    %100 = arith.addf %94, %99 : vector<8x1568xf32>
    %101 = vector.extract_strided_slice %1 {offsets = [0, 1], sizes = [8, 1], strides = [1, 1]} : vector<8x6xf32> to vector<8x1xf32>
    %102 = vector.broadcast %101 : vector<8x1xf32> to vector<8x1568xf32>
    %103 = arith.addf %100, %102 : vector<8x1568xf32>
    %104 = vector.extract_strided_slice %0 {offsets = [0, 8], sizes = [8, 1], strides = [1, 1]} : vector<8x48xf32> to vector<8x1xf32>
    %105 = vector.extract_strided_slice %53 {offsets = [0, 0], sizes = [1, 128], strides = [1, 1]} : vector<8x128xf32> to vector<1x128xf32>
    %106 = vector.broadcast %104 : vector<8x1xf32> to vector<8x128xf32>
    %107 = vector.broadcast %105 : vector<1x128xf32> to vector<8x128xf32>
    %108 = arith.mulf %106, %107 : vector<8x128xf32>
    %109 = vector.extract_strided_slice %0 {offsets = [0, 9], sizes = [8, 1], strides = [1, 1]} : vector<8x48xf32> to vector<8x1xf32>
    %110 = vector.extract_strided_slice %53 {offsets = [1, 0], sizes = [1, 128], strides = [1, 1]} : vector<8x128xf32> to vector<1x128xf32>
    %111 = vector.broadcast %109 : vector<8x1xf32> to vector<8x128xf32>
    %112 = vector.broadcast %110 : vector<1x128xf32> to vector<8x128xf32>
    %113 = arith.mulf %111, %112 : vector<8x128xf32>
    %114 = arith.addf %108, %113 : vector<8x128xf32>
    %115 = vector.extract_strided_slice %0 {offsets = [0, 10], sizes = [8, 1], strides = [1, 1]} : vector<8x48xf32> to vector<8x1xf32>
    %116 = vector.extract_strided_slice %53 {offsets = [2, 0], sizes = [1, 128], strides = [1, 1]} : vector<8x128xf32> to vector<1x128xf32>
    %117 = vector.broadcast %115 : vector<8x1xf32> to vector<8x128xf32>
    %118 = vector.broadcast %116 : vector<1x128xf32> to vector<8x128xf32>
    %119 = arith.mulf %117, %118 : vector<8x128xf32>
    %120 = arith.addf %114, %119 : vector<8x128xf32>
    %121 = vector.extract_strided_slice %0 {offsets = [0, 11], sizes = [8, 1], strides = [1, 1]} : vector<8x48xf32> to vector<8x1xf32>
    %122 = vector.extract_strided_slice %53 {offsets = [3, 0], sizes = [1, 128], strides = [1, 1]} : vector<8x128xf32> to vector<1x128xf32>
    %123 = vector.broadcast %121 : vector<8x1xf32> to vector<8x128xf32>
    %124 = vector.broadcast %122 : vector<1x128xf32> to vector<8x128xf32>
    %125 = arith.mulf %123, %124 : vector<8x128xf32>
    %126 = arith.addf %120, %125 : vector<8x128xf32>
    %127 = vector.extract_strided_slice %0 {offsets = [0, 12], sizes = [8, 1], strides = [1, 1]} : vector<8x48xf32> to vector<8x1xf32>
    %128 = vector.extract_strided_slice %53 {offsets = [4, 0], sizes = [1, 128], strides = [1, 1]} : vector<8x128xf32> to vector<1x128xf32>
    %129 = vector.broadcast %127 : vector<8x1xf32> to vector<8x128xf32>
    %130 = vector.broadcast %128 : vector<1x128xf32> to vector<8x128xf32>
    %131 = arith.mulf %129, %130 : vector<8x128xf32>
    %132 = arith.addf %126, %131 : vector<8x128xf32>
    %133 = vector.extract_strided_slice %0 {offsets = [0, 13], sizes = [8, 1], strides = [1, 1]} : vector<8x48xf32> to vector<8x1xf32>
    %134 = vector.extract_strided_slice %53 {offsets = [5, 0], sizes = [1, 128], strides = [1, 1]} : vector<8x128xf32> to vector<1x128xf32>
    %135 = vector.broadcast %133 : vector<8x1xf32> to vector<8x128xf32>
    %136 = vector.broadcast %134 : vector<1x128xf32> to vector<8x128xf32>
    %137 = arith.mulf %135, %136 : vector<8x128xf32>
    %138 = arith.addf %132, %137 : vector<8x128xf32>
    %139 = vector.extract_strided_slice %0 {offsets = [0, 14], sizes = [8, 1], strides = [1, 1]} : vector<8x48xf32> to vector<8x1xf32>
    %140 = vector.extract_strided_slice %53 {offsets = [6, 0], sizes = [1, 128], strides = [1, 1]} : vector<8x128xf32> to vector<1x128xf32>
    %141 = vector.broadcast %139 : vector<8x1xf32> to vector<8x128xf32>
    %142 = vector.broadcast %140 : vector<1x128xf32> to vector<8x128xf32>
    %143 = arith.mulf %141, %142 : vector<8x128xf32>
    %144 = arith.addf %138, %143 : vector<8x128xf32>
    %145 = vector.extract_strided_slice %0 {offsets = [0, 15], sizes = [8, 1], strides = [1, 1]} : vector<8x48xf32> to vector<8x1xf32>
    %146 = vector.extract_strided_slice %53 {offsets = [7, 0], sizes = [1, 128], strides = [1, 1]} : vector<8x128xf32> to vector<1x128xf32>
    %147 = vector.broadcast %145 : vector<8x1xf32> to vector<8x128xf32>
    %148 = vector.broadcast %146 : vector<1x128xf32> to vector<8x128xf32>
    %149 = arith.mulf %147, %148 : vector<8x128xf32>
    %150 = arith.addf %144, %149 : vector<8x128xf32>
    %151 = vector.extract_strided_slice %1 {offsets = [0, 1], sizes = [8, 1], strides = [1, 1]} : vector<8x6xf32> to vector<8x1xf32>
    %152 = vector.broadcast %151 : vector<8x1xf32> to vector<8x128xf32>
    %153 = arith.addf %150, %152 : vector<8x128xf32>
    %c1_i32 = arith.constant 1 : i32
    %154 = vector.broadcast %c1_i32 : i32 to vector<8x128xi32>
    %155 = arith.cmpi eq, %4, %154 : vector<8x128xi32>
    %156 = vector.extract_strided_slice %1 {offsets = [0, 1], sizes = [8, 1], strides = [1, 1]} : vector<8x6xf32> to vector<8x1xf32>
    %157 = vector.shape_cast %156 : vector<8x1xf32> to vector<8x1xf32>
    %158 = vector.broadcast %157 : vector<8x1xf32> to vector<8x128xf32>
    %159 = arith.select %155, %158, %153 : vector<8x128xi1>, vector<8x128xf32>
    %c0_6 = arith.constant 0 : index
    %c0_7 = arith.constant 0 : index
    %160 = vector.load %arg5[%c0_6, %c0_7] : memref<3x128xf32, #tpu.memory_space<vmem>>, vector<1x128xf32>
    %161 = arith.mulf %103, %7 : vector<8x1568xf32>
    %cst_8 = arith.constant dense<0.000000e+00> : vector<8xf32>
    %162 = vector.multi_reduction <add>, %161, %cst_8 [1] : vector<8x1568xf32> to vector<8xf32>
    %163 = vector.shape_cast %162 : vector<8xf32> to vector<8x1xf32>
    %164 = vector.broadcast %160 : vector<1x128xf32> to vector<8x128xf32>
    %165 = arith.mulf %159, %164 : vector<8x128xf32>
    %cst_9 = arith.constant dense<0.000000e+00> : vector<8xf32>
    %166 = vector.multi_reduction <add>, %165, %cst_9 [1] : vector<8x128xf32> to vector<8xf32>
    %167 = vector.shape_cast %166 : vector<8xf32> to vector<8x1xf32>
    %168 = arith.addf %163, %167 : vector<8x1xf32>
    %169 = arith.mulf %161, %103 : vector<8x1568xf32>
    %cst_10 = arith.constant dense<0.000000e+00> : vector<8xf32>
    %170 = vector.multi_reduction <add>, %169, %cst_10 [1] : vector<8x1568xf32> to vector<8xf32>
    %171 = vector.shape_cast %170 : vector<8xf32> to vector<8x1xf32>
    %172 = arith.mulf %159, %159 : vector<8x128xf32>
    %173 = vector.broadcast %160 : vector<1x128xf32> to vector<8x128xf32>
    %174 = arith.mulf %172, %173 : vector<8x128xf32>
    %cst_11 = arith.constant dense<0.000000e+00> : vector<8xf32>
    %175 = vector.multi_reduction <add>, %174, %cst_11 [1] : vector<8x128xf32> to vector<8xf32>
    %176 = vector.shape_cast %175 : vector<8xf32> to vector<8x1xf32>
    %177 = arith.addf %171, %176 : vector<8x1xf32>
    %cst_12 = arith.constant 1.250000e-03 : f32
    %178 = vector.broadcast %cst_12 : f32 to vector<8x1xf32>
    %179 = arith.mulf %168, %178 : vector<8x1xf32>
    %cst_13 = arith.constant 1.250000e-03 : f32
    %180 = vector.broadcast %cst_13 : f32 to vector<8x1xf32>
    %181 = arith.mulf %177, %180 : vector<8x1xf32>
    %182 = arith.mulf %179, %179 : vector<8x1xf32>
    %183 = arith.subf %181, %182 : vector<8x1xf32>
    %c0_14 = arith.constant 0 : index
    %c0_15 = arith.constant 0 : index
    %184 = vector.load %arg3[%c0_14, %c0_15] : memref<8x3xf32, #tpu.memory_space<vmem>>, vector<8x1xf32>
    %cst_16 = arith.constant 9.99999974E-6 : f32
    %185 = vector.broadcast %cst_16 : f32 to vector<8x1xf32>
    %186 = arith.addf %183, %185 : vector<8x1xf32>
    %187 = math.rsqrt %186 : vector<8x1xf32>
    %188 = arith.mulf %184, %187 : vector<8x1xf32>
    %c0_17 = arith.constant 0 : index
    %c0_18 = arith.constant 0 : index
    %189 = vector.load %arg4[%c0_17, %c0_18] : memref<8x3xf32, #tpu.memory_space<vmem>>, vector<8x1xf32>
    %190 = arith.mulf %179, %188 : vector<8x1xf32>
    %191 = arith.subf %189, %190 : vector<8x1xf32>
    %192 = vector.broadcast %188 : vector<8x1xf32> to vector<8x1568xf32>
    %193 = arith.mulf %103, %192 : vector<8x1568xf32>
    %194 = vector.broadcast %191 : vector<8x1xf32> to vector<8x1568xf32>
    %195 = arith.addf %193, %194 : vector<8x1568xf32>
    %196 = vector.broadcast %188 : vector<8x1xf32> to vector<8x128xf32>
    %197 = arith.mulf %159, %196 : vector<8x128xf32>
    %198 = vector.broadcast %191 : vector<8x1xf32> to vector<8x128xf32>
    %199 = arith.addf %197, %198 : vector<8x128xf32>
    %200 = vector.extract_strided_slice %0 {offsets = [0, 16], sizes = [8, 1], strides = [1, 1]} : vector<8x48xf32> to vector<8x1xf32>
    %201 = vector.extract_strided_slice %195 {offsets = [0, 0], sizes = [1, 1568], strides = [1, 1]} : vector<8x1568xf32> to vector<1x1568xf32>
    %202 = vector.broadcast %200 : vector<8x1xf32> to vector<8x1568xf32>
    %203 = vector.broadcast %201 : vector<1x1568xf32> to vector<8x1568xf32>
    %204 = arith.mulf %202, %203 : vector<8x1568xf32>
    %205 = vector.extract_strided_slice %0 {offsets = [0, 17], sizes = [8, 1], strides = [1, 1]} : vector<8x48xf32> to vector<8x1xf32>
    %206 = vector.extract_strided_slice %195 {offsets = [1, 0], sizes = [1, 1568], strides = [1, 1]} : vector<8x1568xf32> to vector<1x1568xf32>
    %207 = vector.broadcast %205 : vector<8x1xf32> to vector<8x1568xf32>
    %208 = vector.broadcast %206 : vector<1x1568xf32> to vector<8x1568xf32>
    %209 = arith.mulf %207, %208 : vector<8x1568xf32>
    %210 = arith.addf %204, %209 : vector<8x1568xf32>
    %211 = vector.extract_strided_slice %0 {offsets = [0, 18], sizes = [8, 1], strides = [1, 1]} : vector<8x48xf32> to vector<8x1xf32>
    %212 = vector.extract_strided_slice %195 {offsets = [2, 0], sizes = [1, 1568], strides = [1, 1]} : vector<8x1568xf32> to vector<1x1568xf32>
    %213 = vector.broadcast %211 : vector<8x1xf32> to vector<8x1568xf32>
    %214 = vector.broadcast %212 : vector<1x1568xf32> to vector<8x1568xf32>
    %215 = arith.mulf %213, %214 : vector<8x1568xf32>
    %216 = arith.addf %210, %215 : vector<8x1568xf32>
    %217 = vector.extract_strided_slice %0 {offsets = [0, 19], sizes = [8, 1], strides = [1, 1]} : vector<8x48xf32> to vector<8x1xf32>
    %218 = vector.extract_strided_slice %195 {offsets = [3, 0], sizes = [1, 1568], strides = [1, 1]} : vector<8x1568xf32> to vector<1x1568xf32>
    %219 = vector.broadcast %217 : vector<8x1xf32> to vector<8x1568xf32>
    %220 = vector.broadcast %218 : vector<1x1568xf32> to vector<8x1568xf32>
    %221 = arith.mulf %219, %220 : vector<8x1568xf32>
    %222 = arith.addf %216, %221 : vector<8x1568xf32>
    %223 = vector.extract_strided_slice %0 {offsets = [0, 20], sizes = [8, 1], strides = [1, 1]} : vector<8x48xf32> to vector<8x1xf32>
    %224 = vector.extract_strided_slice %195 {offsets = [4, 0], sizes = [1, 1568], strides = [1, 1]} : vector<8x1568xf32> to vector<1x1568xf32>
    %225 = vector.broadcast %223 : vector<8x1xf32> to vector<8x1568xf32>
    %226 = vector.broadcast %224 : vector<1x1568xf32> to vector<8x1568xf32>
    %227 = arith.mulf %225, %226 : vector<8x1568xf32>
    %228 = arith.addf %222, %227 : vector<8x1568xf32>
    %229 = vector.extract_strided_slice %0 {offsets = [0, 21], sizes = [8, 1], strides = [1, 1]} : vector<8x48xf32> to vector<8x1xf32>
    %230 = vector.extract_strided_slice %195 {offsets = [5, 0], sizes = [1, 1568], strides = [1, 1]} : vector<8x1568xf32> to vector<1x1568xf32>
    %231 = vector.broadcast %229 : vector<8x1xf32> to vector<8x1568xf32>
    %232 = vector.broadcast %230 : vector<1x1568xf32> to vector<8x1568xf32>
    %233 = arith.mulf %231, %232 : vector<8x1568xf32>
    %234 = arith.addf %228, %233 : vector<8x1568xf32>
    %235 = vector.extract_strided_slice %0 {offsets = [0, 22], sizes = [8, 1], strides = [1, 1]} : vector<8x48xf32> to vector<8x1xf32>
    %236 = vector.extract_strided_slice %195 {offsets = [6, 0], sizes = [1, 1568], strides = [1, 1]} : vector<8x1568xf32> to vector<1x1568xf32>
    %237 = vector.broadcast %235 : vector<8x1xf32> to vector<8x1568xf32>
    %238 = vector.broadcast %236 : vector<1x1568xf32> to vector<8x1568xf32>
    %239 = arith.mulf %237, %238 : vector<8x1568xf32>
    %240 = arith.addf %234, %239 : vector<8x1568xf32>
    %241 = vector.extract_strided_slice %0 {offsets = [0, 23], sizes = [8, 1], strides = [1, 1]} : vector<8x48xf32> to vector<8x1xf32>
    %242 = vector.extract_strided_slice %195 {offsets = [7, 0], sizes = [1, 1568], strides = [1, 1]} : vector<8x1568xf32> to vector<1x1568xf32>
    %243 = vector.broadcast %241 : vector<8x1xf32> to vector<8x1568xf32>
    %244 = vector.broadcast %242 : vector<1x1568xf32> to vector<8x1568xf32>
    %245 = arith.mulf %243, %244 : vector<8x1568xf32>
    %246 = arith.addf %240, %245 : vector<8x1568xf32>
    %247 = vector.extract_strided_slice %1 {offsets = [0, 2], sizes = [8, 1], strides = [1, 1]} : vector<8x6xf32> to vector<8x1xf32>
    %248 = vector.broadcast %247 : vector<8x1xf32> to vector<8x1568xf32>
    %249 = arith.addf %246, %248 : vector<8x1568xf32>
    %250 = vector.extract_strided_slice %0 {offsets = [0, 16], sizes = [8, 1], strides = [1, 1]} : vector<8x48xf32> to vector<8x1xf32>
    %251 = vector.extract_strided_slice %199 {offsets = [0, 0], sizes = [1, 128], strides = [1, 1]} : vector<8x128xf32> to vector<1x128xf32>
    %252 = vector.broadcast %250 : vector<8x1xf32> to vector<8x128xf32>
    %253 = vector.broadcast %251 : vector<1x128xf32> to vector<8x128xf32>
    %254 = arith.mulf %252, %253 : vector<8x128xf32>
    %255 = vector.extract_strided_slice %0 {offsets = [0, 17], sizes = [8, 1], strides = [1, 1]} : vector<8x48xf32> to vector<8x1xf32>
    %256 = vector.extract_strided_slice %199 {offsets = [1, 0], sizes = [1, 128], strides = [1, 1]} : vector<8x128xf32> to vector<1x128xf32>
    %257 = vector.broadcast %255 : vector<8x1xf32> to vector<8x128xf32>
    %258 = vector.broadcast %256 : vector<1x128xf32> to vector<8x128xf32>
    %259 = arith.mulf %257, %258 : vector<8x128xf32>
    %260 = arith.addf %254, %259 : vector<8x128xf32>
    %261 = vector.extract_strided_slice %0 {offsets = [0, 18], sizes = [8, 1], strides = [1, 1]} : vector<8x48xf32> to vector<8x1xf32>
    %262 = vector.extract_strided_slice %199 {offsets = [2, 0], sizes = [1, 128], strides = [1, 1]} : vector<8x128xf32> to vector<1x128xf32>
    %263 = vector.broadcast %261 : vector<8x1xf32> to vector<8x128xf32>
    %264 = vector.broadcast %262 : vector<1x128xf32> to vector<8x128xf32>
    %265 = arith.mulf %263, %264 : vector<8x128xf32>
    %266 = arith.addf %260, %265 : vector<8x128xf32>
    %267 = vector.extract_strided_slice %0 {offsets = [0, 19], sizes = [8, 1], strides = [1, 1]} : vector<8x48xf32> to vector<8x1xf32>
    %268 = vector.extract_strided_slice %199 {offsets = [3, 0], sizes = [1, 128], strides = [1, 1]} : vector<8x128xf32> to vector<1x128xf32>
    %269 = vector.broadcast %267 : vector<8x1xf32> to vector<8x128xf32>
    %270 = vector.broadcast %268 : vector<1x128xf32> to vector<8x128xf32>
    %271 = arith.mulf %269, %270 : vector<8x128xf32>
    %272 = arith.addf %266, %271 : vector<8x128xf32>
    %273 = vector.extract_strided_slice %0 {offsets = [0, 20], sizes = [8, 1], strides = [1, 1]} : vector<8x48xf32> to vector<8x1xf32>
    %274 = vector.extract_strided_slice %199 {offsets = [4, 0], sizes = [1, 128], strides = [1, 1]} : vector<8x128xf32> to vector<1x128xf32>
    %275 = vector.broadcast %273 : vector<8x1xf32> to vector<8x128xf32>
    %276 = vector.broadcast %274 : vector<1x128xf32> to vector<8x128xf32>
    %277 = arith.mulf %275, %276 : vector<8x128xf32>
    %278 = arith.addf %272, %277 : vector<8x128xf32>
    %279 = vector.extract_strided_slice %0 {offsets = [0, 21], sizes = [8, 1], strides = [1, 1]} : vector<8x48xf32> to vector<8x1xf32>
    %280 = vector.extract_strided_slice %199 {offsets = [5, 0], sizes = [1, 128], strides = [1, 1]} : vector<8x128xf32> to vector<1x128xf32>
    %281 = vector.broadcast %279 : vector<8x1xf32> to vector<8x128xf32>
    %282 = vector.broadcast %280 : vector<1x128xf32> to vector<8x128xf32>
    %283 = arith.mulf %281, %282 : vector<8x128xf32>
    %284 = arith.addf %278, %283 : vector<8x128xf32>
    %285 = vector.extract_strided_slice %0 {offsets = [0, 22], sizes = [8, 1], strides = [1, 1]} : vector<8x48xf32> to vector<8x1xf32>
    %286 = vector.extract_strided_slice %199 {offsets = [6, 0], sizes = [1, 128], strides = [1, 1]} : vector<8x128xf32> to vector<1x128xf32>
    %287 = vector.broadcast %285 : vector<8x1xf32> to vector<8x128xf32>
    %288 = vector.broadcast %286 : vector<1x128xf32> to vector<8x128xf32>
    %289 = arith.mulf %287, %288 : vector<8x128xf32>
    %290 = arith.addf %284, %289 : vector<8x128xf32>
    %291 = vector.extract_strided_slice %0 {offsets = [0, 23], sizes = [8, 1], strides = [1, 1]} : vector<8x48xf32> to vector<8x1xf32>
    %292 = vector.extract_strided_slice %199 {offsets = [7, 0], sizes = [1, 128], strides = [1, 1]} : vector<8x128xf32> to vector<1x128xf32>
    %293 = vector.broadcast %291 : vector<8x1xf32> to vector<8x128xf32>
    %294 = vector.broadcast %292 : vector<1x128xf32> to vector<8x128xf32>
    %295 = arith.mulf %293, %294 : vector<8x128xf32>
    %296 = arith.addf %290, %295 : vector<8x128xf32>
    %297 = vector.extract_strided_slice %1 {offsets = [0, 2], sizes = [8, 1], strides = [1, 1]} : vector<8x6xf32> to vector<8x1xf32>
    %298 = vector.broadcast %297 : vector<8x1xf32> to vector<8x128xf32>
    %299 = arith.addf %296, %298 : vector<8x128xf32>
    %c2_i32 = arith.constant 2 : i32
    %300 = vector.broadcast %c2_i32 : i32 to vector<8x128xi32>
    %301 = arith.cmpi eq, %4, %300 : vector<8x128xi32>
    %302 = vector.extract_strided_slice %1 {offsets = [0, 2], sizes = [8, 1], strides = [1, 1]} : vector<8x6xf32> to vector<8x1xf32>
    %303 = vector.shape_cast %302 : vector<8x1xf32> to vector<8x1xf32>
    %304 = vector.broadcast %303 : vector<8x1xf32> to vector<8x128xf32>
    %305 = arith.select %301, %304, %299 : vector<8x128xi1>, vector<8x128xf32>
    %306 = vector.extract_strided_slice %0 {offsets = [0, 24], sizes = [8, 1], strides = [1, 1]} : vector<8x48xf32> to vector<8x1xf32>
    %307 = vector.extract_strided_slice %249 {offsets = [0, 0], sizes = [1, 1568], strides = [1, 1]} : vector<8x1568xf32> to vector<1x1568xf32>
    %308 = vector.broadcast %306 : vector<8x1xf32> to vector<8x1568xf32>
    %309 = vector.broadcast %307 : vector<1x1568xf32> to vector<8x1568xf32>
    %310 = arith.mulf %308, %309 : vector<8x1568xf32>
    %311 = vector.extract_strided_slice %0 {offsets = [0, 25], sizes = [8, 1], strides = [1, 1]} : vector<8x48xf32> to vector<8x1xf32>
    %312 = vector.extract_strided_slice %249 {offsets = [1, 0], sizes = [1, 1568], strides = [1, 1]} : vector<8x1568xf32> to vector<1x1568xf32>
    %313 = vector.broadcast %311 : vector<8x1xf32> to vector<8x1568xf32>
    %314 = vector.broadcast %312 : vector<1x1568xf32> to vector<8x1568xf32>
    %315 = arith.mulf %313, %314 : vector<8x1568xf32>
    %316 = arith.addf %310, %315 : vector<8x1568xf32>
    %317 = vector.extract_strided_slice %0 {offsets = [0, 26], sizes = [8, 1], strides = [1, 1]} : vector<8x48xf32> to vector<8x1xf32>
    %318 = vector.extract_strided_slice %249 {offsets = [2, 0], sizes = [1, 1568], strides = [1, 1]} : vector<8x1568xf32> to vector<1x1568xf32>
    %319 = vector.broadcast %317 : vector<8x1xf32> to vector<8x1568xf32>
    %320 = vector.broadcast %318 : vector<1x1568xf32> to vector<8x1568xf32>
    %321 = arith.mulf %319, %320 : vector<8x1568xf32>
    %322 = arith.addf %316, %321 : vector<8x1568xf32>
    %323 = vector.extract_strided_slice %0 {offsets = [0, 27], sizes = [8, 1], strides = [1, 1]} : vector<8x48xf32> to vector<8x1xf32>
    %324 = vector.extract_strided_slice %249 {offsets = [3, 0], sizes = [1, 1568], strides = [1, 1]} : vector<8x1568xf32> to vector<1x1568xf32>
    %325 = vector.broadcast %323 : vector<8x1xf32> to vector<8x1568xf32>
    %326 = vector.broadcast %324 : vector<1x1568xf32> to vector<8x1568xf32>
    %327 = arith.mulf %325, %326 : vector<8x1568xf32>
    %328 = arith.addf %322, %327 : vector<8x1568xf32>
    %329 = vector.extract_strided_slice %0 {offsets = [0, 28], sizes = [8, 1], strides = [1, 1]} : vector<8x48xf32> to vector<8x1xf32>
    %330 = vector.extract_strided_slice %249 {offsets = [4, 0], sizes = [1, 1568], strides = [1, 1]} : vector<8x1568xf32> to vector<1x1568xf32>
    %331 = vector.broadcast %329 : vector<8x1xf32> to vector<8x1568xf32>
    %332 = vector.broadcast %330 : vector<1x1568xf32> to vector<8x1568xf32>
    %333 = arith.mulf %331, %332 : vector<8x1568xf32>
    %334 = arith.addf %328, %333 : vector<8x1568xf32>
    %335 = vector.extract_strided_slice %0 {offsets = [0, 29], sizes = [8, 1], strides = [1, 1]} : vector<8x48xf32> to vector<8x1xf32>
    %336 = vector.extract_strided_slice %249 {offsets = [5, 0], sizes = [1, 1568], strides = [1, 1]} : vector<8x1568xf32> to vector<1x1568xf32>
    %337 = vector.broadcast %335 : vector<8x1xf32> to vector<8x1568xf32>
    %338 = vector.broadcast %336 : vector<1x1568xf32> to vector<8x1568xf32>
    %339 = arith.mulf %337, %338 : vector<8x1568xf32>
    %340 = arith.addf %334, %339 : vector<8x1568xf32>
    %341 = vector.extract_strided_slice %0 {offsets = [0, 30], sizes = [8, 1], strides = [1, 1]} : vector<8x48xf32> to vector<8x1xf32>
    %342 = vector.extract_strided_slice %249 {offsets = [6, 0], sizes = [1, 1568], strides = [1, 1]} : vector<8x1568xf32> to vector<1x1568xf32>
    %343 = vector.broadcast %341 : vector<8x1xf32> to vector<8x1568xf32>
    %344 = vector.broadcast %342 : vector<1x1568xf32> to vector<8x1568xf32>
    %345 = arith.mulf %343, %344 : vector<8x1568xf32>
    %346 = arith.addf %340, %345 : vector<8x1568xf32>
    %347 = vector.extract_strided_slice %0 {offsets = [0, 31], sizes = [8, 1], strides = [1, 1]} : vector<8x48xf32> to vector<8x1xf32>
    %348 = vector.extract_strided_slice %249 {offsets = [7, 0], sizes = [1, 1568], strides = [1, 1]} : vector<8x1568xf32> to vector<1x1568xf32>
    %349 = vector.broadcast %347 : vector<8x1xf32> to vector<8x1568xf32>
    %350 = vector.broadcast %348 : vector<1x1568xf32> to vector<8x1568xf32>
    %351 = arith.mulf %349, %350 : vector<8x1568xf32>
    %352 = arith.addf %346, %351 : vector<8x1568xf32>
    %353 = vector.extract_strided_slice %1 {offsets = [0, 3], sizes = [8, 1], strides = [1, 1]} : vector<8x6xf32> to vector<8x1xf32>
    %354 = vector.broadcast %353 : vector<8x1xf32> to vector<8x1568xf32>
    %355 = arith.addf %352, %354 : vector<8x1568xf32>
    %356 = vector.extract_strided_slice %0 {offsets = [0, 24], sizes = [8, 1], strides = [1, 1]} : vector<8x48xf32> to vector<8x1xf32>
    %357 = vector.extract_strided_slice %305 {offsets = [0, 0], sizes = [1, 128], strides = [1, 1]} : vector<8x128xf32> to vector<1x128xf32>
    %358 = vector.broadcast %356 : vector<8x1xf32> to vector<8x128xf32>
    %359 = vector.broadcast %357 : vector<1x128xf32> to vector<8x128xf32>
    %360 = arith.mulf %358, %359 : vector<8x128xf32>
    %361 = vector.extract_strided_slice %0 {offsets = [0, 25], sizes = [8, 1], strides = [1, 1]} : vector<8x48xf32> to vector<8x1xf32>
    %362 = vector.extract_strided_slice %305 {offsets = [1, 0], sizes = [1, 128], strides = [1, 1]} : vector<8x128xf32> to vector<1x128xf32>
    %363 = vector.broadcast %361 : vector<8x1xf32> to vector<8x128xf32>
    %364 = vector.broadcast %362 : vector<1x128xf32> to vector<8x128xf32>
    %365 = arith.mulf %363, %364 : vector<8x128xf32>
    %366 = arith.addf %360, %365 : vector<8x128xf32>
    %367 = vector.extract_strided_slice %0 {offsets = [0, 26], sizes = [8, 1], strides = [1, 1]} : vector<8x48xf32> to vector<8x1xf32>
    %368 = vector.extract_strided_slice %305 {offsets = [2, 0], sizes = [1, 128], strides = [1, 1]} : vector<8x128xf32> to vector<1x128xf32>
    %369 = vector.broadcast %367 : vector<8x1xf32> to vector<8x128xf32>
    %370 = vector.broadcast %368 : vector<1x128xf32> to vector<8x128xf32>
    %371 = arith.mulf %369, %370 : vector<8x128xf32>
    %372 = arith.addf %366, %371 : vector<8x128xf32>
    %373 = vector.extract_strided_slice %0 {offsets = [0, 27], sizes = [8, 1], strides = [1, 1]} : vector<8x48xf32> to vector<8x1xf32>
    %374 = vector.extract_strided_slice %305 {offsets = [3, 0], sizes = [1, 128], strides = [1, 1]} : vector<8x128xf32> to vector<1x128xf32>
    %375 = vector.broadcast %373 : vector<8x1xf32> to vector<8x128xf32>
    %376 = vector.broadcast %374 : vector<1x128xf32> to vector<8x128xf32>
    %377 = arith.mulf %375, %376 : vector<8x128xf32>
    %378 = arith.addf %372, %377 : vector<8x128xf32>
    %379 = vector.extract_strided_slice %0 {offsets = [0, 28], sizes = [8, 1], strides = [1, 1]} : vector<8x48xf32> to vector<8x1xf32>
    %380 = vector.extract_strided_slice %305 {offsets = [4, 0], sizes = [1, 128], strides = [1, 1]} : vector<8x128xf32> to vector<1x128xf32>
    %381 = vector.broadcast %379 : vector<8x1xf32> to vector<8x128xf32>
    %382 = vector.broadcast %380 : vector<1x128xf32> to vector<8x128xf32>
    %383 = arith.mulf %381, %382 : vector<8x128xf32>
    %384 = arith.addf %378, %383 : vector<8x128xf32>
    %385 = vector.extract_strided_slice %0 {offsets = [0, 29], sizes = [8, 1], strides = [1, 1]} : vector<8x48xf32> to vector<8x1xf32>
    %386 = vector.extract_strided_slice %305 {offsets = [5, 0], sizes = [1, 128], strides = [1, 1]} : vector<8x128xf32> to vector<1x128xf32>
    %387 = vector.broadcast %385 : vector<8x1xf32> to vector<8x128xf32>
    %388 = vector.broadcast %386 : vector<1x128xf32> to vector<8x128xf32>
    %389 = arith.mulf %387, %388 : vector<8x128xf32>
    %390 = arith.addf %384, %389 : vector<8x128xf32>
    %391 = vector.extract_strided_slice %0 {offsets = [0, 30], sizes = [8, 1], strides = [1, 1]} : vector<8x48xf32> to vector<8x1xf32>
    %392 = vector.extract_strided_slice %305 {offsets = [6, 0], sizes = [1, 128], strides = [1, 1]} : vector<8x128xf32> to vector<1x128xf32>
    %393 = vector.broadcast %391 : vector<8x1xf32> to vector<8x128xf32>
    %394 = vector.broadcast %392 : vector<1x128xf32> to vector<8x128xf32>
    %395 = arith.mulf %393, %394 : vector<8x128xf32>
    %396 = arith.addf %390, %395 : vector<8x128xf32>
    %397 = vector.extract_strided_slice %0 {offsets = [0, 31], sizes = [8, 1], strides = [1, 1]} : vector<8x48xf32> to vector<8x1xf32>
    %398 = vector.extract_strided_slice %305 {offsets = [7, 0], sizes = [1, 128], strides = [1, 1]} : vector<8x128xf32> to vector<1x128xf32>
    %399 = vector.broadcast %397 : vector<8x1xf32> to vector<8x128xf32>
    %400 = vector.broadcast %398 : vector<1x128xf32> to vector<8x128xf32>
    %401 = arith.mulf %399, %400 : vector<8x128xf32>
    %402 = arith.addf %396, %401 : vector<8x128xf32>
    %403 = vector.extract_strided_slice %1 {offsets = [0, 3], sizes = [8, 1], strides = [1, 1]} : vector<8x6xf32> to vector<8x1xf32>
    %404 = vector.broadcast %403 : vector<8x1xf32> to vector<8x128xf32>
    %405 = arith.addf %402, %404 : vector<8x128xf32>
    %c3_i32 = arith.constant 3 : i32
    %406 = vector.broadcast %c3_i32 : i32 to vector<8x128xi32>
    %407 = arith.cmpi eq, %4, %406 : vector<8x128xi32>
    %408 = vector.extract_strided_slice %1 {offsets = [0, 3], sizes = [8, 1], strides = [1, 1]} : vector<8x6xf32> to vector<8x1xf32>
    %409 = vector.shape_cast %408 : vector<8x1xf32> to vector<8x1xf32>
    %410 = vector.broadcast %409 : vector<8x1xf32> to vector<8x128xf32>
    %411 = arith.select %407, %410, %405 : vector<8x128xi1>, vector<8x128xf32>
    %c1 = arith.constant 1 : index
    %c0_19 = arith.constant 0 : index
    %412 = vector.load %arg5[%c1, %c0_19] : memref<3x128xf32, #tpu.memory_space<vmem>>, vector<1x128xf32>
    %413 = arith.mulf %355, %7 : vector<8x1568xf32>
    %cst_20 = arith.constant dense<0.000000e+00> : vector<8xf32>
    %414 = vector.multi_reduction <add>, %413, %cst_20 [1] : vector<8x1568xf32> to vector<8xf32>
    %415 = vector.shape_cast %414 : vector<8xf32> to vector<8x1xf32>
    %416 = vector.broadcast %412 : vector<1x128xf32> to vector<8x128xf32>
    %417 = arith.mulf %411, %416 : vector<8x128xf32>
    %cst_21 = arith.constant dense<0.000000e+00> : vector<8xf32>
    %418 = vector.multi_reduction <add>, %417, %cst_21 [1] : vector<8x128xf32> to vector<8xf32>
    %419 = vector.shape_cast %418 : vector<8xf32> to vector<8x1xf32>
    %420 = arith.addf %415, %419 : vector<8x1xf32>
    %421 = arith.mulf %413, %355 : vector<8x1568xf32>
    %cst_22 = arith.constant dense<0.000000e+00> : vector<8xf32>
    %422 = vector.multi_reduction <add>, %421, %cst_22 [1] : vector<8x1568xf32> to vector<8xf32>
    %423 = vector.shape_cast %422 : vector<8xf32> to vector<8x1xf32>
    %424 = arith.mulf %411, %411 : vector<8x128xf32>
    %425 = vector.broadcast %412 : vector<1x128xf32> to vector<8x128xf32>
    %426 = arith.mulf %424, %425 : vector<8x128xf32>
    %cst_23 = arith.constant dense<0.000000e+00> : vector<8xf32>
    %427 = vector.multi_reduction <add>, %426, %cst_23 [1] : vector<8x128xf32> to vector<8xf32>
    %428 = vector.shape_cast %427 : vector<8xf32> to vector<8x1xf32>
    %429 = arith.addf %423, %428 : vector<8x1xf32>
    %cst_24 = arith.constant 8.68055562E-4 : f32
    %430 = vector.broadcast %cst_24 : f32 to vector<8x1xf32>
    %431 = arith.mulf %420, %430 : vector<8x1xf32>
    %cst_25 = arith.constant 8.68055562E-4 : f32
    %432 = vector.broadcast %cst_25 : f32 to vector<8x1xf32>
    %433 = arith.mulf %429, %432 : vector<8x1xf32>
    %434 = arith.mulf %431, %431 : vector<8x1xf32>
    %435 = arith.subf %433, %434 : vector<8x1xf32>
    %c0_26 = arith.constant 0 : index
    %c1_27 = arith.constant 1 : index
    %436 = vector.load %arg3[%c0_26, %c1_27] : memref<8x3xf32, #tpu.memory_space<vmem>>, vector<8x1xf32>
    %cst_28 = arith.constant 9.99999974E-6 : f32
    %437 = vector.broadcast %cst_28 : f32 to vector<8x1xf32>
    %438 = arith.addf %435, %437 : vector<8x1xf32>
    %439 = math.rsqrt %438 : vector<8x1xf32>
    %440 = arith.mulf %436, %439 : vector<8x1xf32>
    %c0_29 = arith.constant 0 : index
    %c1_30 = arith.constant 1 : index
    %441 = vector.load %arg4[%c0_29, %c1_30] : memref<8x3xf32, #tpu.memory_space<vmem>>, vector<8x1xf32>
    %442 = arith.mulf %431, %440 : vector<8x1xf32>
    %443 = arith.subf %441, %442 : vector<8x1xf32>
    %444 = vector.broadcast %440 : vector<8x1xf32> to vector<8x1568xf32>
    %445 = arith.mulf %355, %444 : vector<8x1568xf32>
    %446 = vector.broadcast %443 : vector<8x1xf32> to vector<8x1568xf32>
    %447 = arith.addf %445, %446 : vector<8x1568xf32>
    %448 = vector.broadcast %440 : vector<8x1xf32> to vector<8x128xf32>
    %449 = arith.mulf %411, %448 : vector<8x128xf32>
    %450 = vector.broadcast %443 : vector<8x1xf32> to vector<8x128xf32>
    %451 = arith.addf %449, %450 : vector<8x128xf32>
    %452 = vector.extract_strided_slice %0 {offsets = [0, 32], sizes = [8, 1], strides = [1, 1]} : vector<8x48xf32> to vector<8x1xf32>
    %453 = vector.extract_strided_slice %447 {offsets = [0, 0], sizes = [1, 1568], strides = [1, 1]} : vector<8x1568xf32> to vector<1x1568xf32>
    %454 = vector.broadcast %452 : vector<8x1xf32> to vector<8x1568xf32>
    %455 = vector.broadcast %453 : vector<1x1568xf32> to vector<8x1568xf32>
    %456 = arith.mulf %454, %455 : vector<8x1568xf32>
    %457 = vector.extract_strided_slice %0 {offsets = [0, 33], sizes = [8, 1], strides = [1, 1]} : vector<8x48xf32> to vector<8x1xf32>
    %458 = vector.extract_strided_slice %447 {offsets = [1, 0], sizes = [1, 1568], strides = [1, 1]} : vector<8x1568xf32> to vector<1x1568xf32>
    %459 = vector.broadcast %457 : vector<8x1xf32> to vector<8x1568xf32>
    %460 = vector.broadcast %458 : vector<1x1568xf32> to vector<8x1568xf32>
    %461 = arith.mulf %459, %460 : vector<8x1568xf32>
    %462 = arith.addf %456, %461 : vector<8x1568xf32>
    %463 = vector.extract_strided_slice %0 {offsets = [0, 34], sizes = [8, 1], strides = [1, 1]} : vector<8x48xf32> to vector<8x1xf32>
    %464 = vector.extract_strided_slice %447 {offsets = [2, 0], sizes = [1, 1568], strides = [1, 1]} : vector<8x1568xf32> to vector<1x1568xf32>
    %465 = vector.broadcast %463 : vector<8x1xf32> to vector<8x1568xf32>
    %466 = vector.broadcast %464 : vector<1x1568xf32> to vector<8x1568xf32>
    %467 = arith.mulf %465, %466 : vector<8x1568xf32>
    %468 = arith.addf %462, %467 : vector<8x1568xf32>
    %469 = vector.extract_strided_slice %0 {offsets = [0, 35], sizes = [8, 1], strides = [1, 1]} : vector<8x48xf32> to vector<8x1xf32>
    %470 = vector.extract_strided_slice %447 {offsets = [3, 0], sizes = [1, 1568], strides = [1, 1]} : vector<8x1568xf32> to vector<1x1568xf32>
    %471 = vector.broadcast %469 : vector<8x1xf32> to vector<8x1568xf32>
    %472 = vector.broadcast %470 : vector<1x1568xf32> to vector<8x1568xf32>
    %473 = arith.mulf %471, %472 : vector<8x1568xf32>
    %474 = arith.addf %468, %473 : vector<8x1568xf32>
    %475 = vector.extract_strided_slice %0 {offsets = [0, 36], sizes = [8, 1], strides = [1, 1]} : vector<8x48xf32> to vector<8x1xf32>
    %476 = vector.extract_strided_slice %447 {offsets = [4, 0], sizes = [1, 1568], strides = [1, 1]} : vector<8x1568xf32> to vector<1x1568xf32>
    %477 = vector.broadcast %475 : vector<8x1xf32> to vector<8x1568xf32>
    %478 = vector.broadcast %476 : vector<1x1568xf32> to vector<8x1568xf32>
    %479 = arith.mulf %477, %478 : vector<8x1568xf32>
    %480 = arith.addf %474, %479 : vector<8x1568xf32>
    %481 = vector.extract_strided_slice %0 {offsets = [0, 37], sizes = [8, 1], strides = [1, 1]} : vector<8x48xf32> to vector<8x1xf32>
    %482 = vector.extract_strided_slice %447 {offsets = [5, 0], sizes = [1, 1568], strides = [1, 1]} : vector<8x1568xf32> to vector<1x1568xf32>
    %483 = vector.broadcast %481 : vector<8x1xf32> to vector<8x1568xf32>
    %484 = vector.broadcast %482 : vector<1x1568xf32> to vector<8x1568xf32>
    %485 = arith.mulf %483, %484 : vector<8x1568xf32>
    %486 = arith.addf %480, %485 : vector<8x1568xf32>
    %487 = vector.extract_strided_slice %0 {offsets = [0, 38], sizes = [8, 1], strides = [1, 1]} : vector<8x48xf32> to vector<8x1xf32>
    %488 = vector.extract_strided_slice %447 {offsets = [6, 0], sizes = [1, 1568], strides = [1, 1]} : vector<8x1568xf32> to vector<1x1568xf32>
    %489 = vector.broadcast %487 : vector<8x1xf32> to vector<8x1568xf32>
    %490 = vector.broadcast %488 : vector<1x1568xf32> to vector<8x1568xf32>
    %491 = arith.mulf %489, %490 : vector<8x1568xf32>
    %492 = arith.addf %486, %491 : vector<8x1568xf32>
    %493 = vector.extract_strided_slice %0 {offsets = [0, 39], sizes = [8, 1], strides = [1, 1]} : vector<8x48xf32> to vector<8x1xf32>
    %494 = vector.extract_strided_slice %447 {offsets = [7, 0], sizes = [1, 1568], strides = [1, 1]} : vector<8x1568xf32> to vector<1x1568xf32>
    %495 = vector.broadcast %493 : vector<8x1xf32> to vector<8x1568xf32>
    %496 = vector.broadcast %494 : vector<1x1568xf32> to vector<8x1568xf32>
    %497 = arith.mulf %495, %496 : vector<8x1568xf32>
    %498 = arith.addf %492, %497 : vector<8x1568xf32>
    %499 = vector.extract_strided_slice %1 {offsets = [0, 4], sizes = [8, 1], strides = [1, 1]} : vector<8x6xf32> to vector<8x1xf32>
    %500 = vector.broadcast %499 : vector<8x1xf32> to vector<8x1568xf32>
    %501 = arith.addf %498, %500 : vector<8x1568xf32>
    %502 = vector.extract_strided_slice %0 {offsets = [0, 32], sizes = [8, 1], strides = [1, 1]} : vector<8x48xf32> to vector<8x1xf32>
    %503 = vector.extract_strided_slice %451 {offsets = [0, 0], sizes = [1, 128], strides = [1, 1]} : vector<8x128xf32> to vector<1x128xf32>
    %504 = vector.broadcast %502 : vector<8x1xf32> to vector<8x128xf32>
    %505 = vector.broadcast %503 : vector<1x128xf32> to vector<8x128xf32>
    %506 = arith.mulf %504, %505 : vector<8x128xf32>
    %507 = vector.extract_strided_slice %0 {offsets = [0, 33], sizes = [8, 1], strides = [1, 1]} : vector<8x48xf32> to vector<8x1xf32>
    %508 = vector.extract_strided_slice %451 {offsets = [1, 0], sizes = [1, 128], strides = [1, 1]} : vector<8x128xf32> to vector<1x128xf32>
    %509 = vector.broadcast %507 : vector<8x1xf32> to vector<8x128xf32>
    %510 = vector.broadcast %508 : vector<1x128xf32> to vector<8x128xf32>
    %511 = arith.mulf %509, %510 : vector<8x128xf32>
    %512 = arith.addf %506, %511 : vector<8x128xf32>
    %513 = vector.extract_strided_slice %0 {offsets = [0, 34], sizes = [8, 1], strides = [1, 1]} : vector<8x48xf32> to vector<8x1xf32>
    %514 = vector.extract_strided_slice %451 {offsets = [2, 0], sizes = [1, 128], strides = [1, 1]} : vector<8x128xf32> to vector<1x128xf32>
    %515 = vector.broadcast %513 : vector<8x1xf32> to vector<8x128xf32>
    %516 = vector.broadcast %514 : vector<1x128xf32> to vector<8x128xf32>
    %517 = arith.mulf %515, %516 : vector<8x128xf32>
    %518 = arith.addf %512, %517 : vector<8x128xf32>
    %519 = vector.extract_strided_slice %0 {offsets = [0, 35], sizes = [8, 1], strides = [1, 1]} : vector<8x48xf32> to vector<8x1xf32>
    %520 = vector.extract_strided_slice %451 {offsets = [3, 0], sizes = [1, 128], strides = [1, 1]} : vector<8x128xf32> to vector<1x128xf32>
    %521 = vector.broadcast %519 : vector<8x1xf32> to vector<8x128xf32>
    %522 = vector.broadcast %520 : vector<1x128xf32> to vector<8x128xf32>
    %523 = arith.mulf %521, %522 : vector<8x128xf32>
    %524 = arith.addf %518, %523 : vector<8x128xf32>
    %525 = vector.extract_strided_slice %0 {offsets = [0, 36], sizes = [8, 1], strides = [1, 1]} : vector<8x48xf32> to vector<8x1xf32>
    %526 = vector.extract_strided_slice %451 {offsets = [4, 0], sizes = [1, 128], strides = [1, 1]} : vector<8x128xf32> to vector<1x128xf32>
    %527 = vector.broadcast %525 : vector<8x1xf32> to vector<8x128xf32>
    %528 = vector.broadcast %526 : vector<1x128xf32> to vector<8x128xf32>
    %529 = arith.mulf %527, %528 : vector<8x128xf32>
    %530 = arith.addf %524, %529 : vector<8x128xf32>
    %531 = vector.extract_strided_slice %0 {offsets = [0, 37], sizes = [8, 1], strides = [1, 1]} : vector<8x48xf32> to vector<8x1xf32>
    %532 = vector.extract_strided_slice %451 {offsets = [5, 0], sizes = [1, 128], strides = [1, 1]} : vector<8x128xf32> to vector<1x128xf32>
    %533 = vector.broadcast %531 : vector<8x1xf32> to vector<8x128xf32>
    %534 = vector.broadcast %532 : vector<1x128xf32> to vector<8x128xf32>
    %535 = arith.mulf %533, %534 : vector<8x128xf32>
    %536 = arith.addf %530, %535 : vector<8x128xf32>
    %537 = vector.extract_strided_slice %0 {offsets = [0, 38], sizes = [8, 1], strides = [1, 1]} : vector<8x48xf32> to vector<8x1xf32>
    %538 = vector.extract_strided_slice %451 {offsets = [6, 0], sizes = [1, 128], strides = [1, 1]} : vector<8x128xf32> to vector<1x128xf32>
    %539 = vector.broadcast %537 : vector<8x1xf32> to vector<8x128xf32>
    %540 = vector.broadcast %538 : vector<1x128xf32> to vector<8x128xf32>
    %541 = arith.mulf %539, %540 : vector<8x128xf32>
    %542 = arith.addf %536, %541 : vector<8x128xf32>
    %543 = vector.extract_strided_slice %0 {offsets = [0, 39], sizes = [8, 1], strides = [1, 1]} : vector<8x48xf32> to vector<8x1xf32>
    %544 = vector.extract_strided_slice %451 {offsets = [7, 0], sizes = [1, 128], strides = [1, 1]} : vector<8x128xf32> to vector<1x128xf32>
    %545 = vector.broadcast %543 : vector<8x1xf32> to vector<8x128xf32>
    %546 = vector.broadcast %544 : vector<1x128xf32> to vector<8x128xf32>
    %547 = arith.mulf %545, %546 : vector<8x128xf32>
    %548 = arith.addf %542, %547 : vector<8x128xf32>
    %549 = vector.extract_strided_slice %1 {offsets = [0, 4], sizes = [8, 1], strides = [1, 1]} : vector<8x6xf32> to vector<8x1xf32>
    %550 = vector.broadcast %549 : vector<8x1xf32> to vector<8x128xf32>
    %551 = arith.addf %548, %550 : vector<8x128xf32>
    %c4_i32 = arith.constant 4 : i32
    %552 = vector.broadcast %c4_i32 : i32 to vector<8x128xi32>
    %553 = arith.cmpi eq, %4, %552 : vector<8x128xi32>
    %554 = vector.extract_strided_slice %1 {offsets = [0, 4], sizes = [8, 1], strides = [1, 1]} : vector<8x6xf32> to vector<8x1xf32>
    %555 = vector.shape_cast %554 : vector<8x1xf32> to vector<8x1xf32>
    %556 = vector.broadcast %555 : vector<8x1xf32> to vector<8x128xf32>
    %557 = arith.select %553, %556, %551 : vector<8x128xi1>, vector<8x128xf32>
    %558 = vector.extract_strided_slice %0 {offsets = [0, 40], sizes = [8, 1], strides = [1, 1]} : vector<8x48xf32> to vector<8x1xf32>
    %559 = vector.extract_strided_slice %501 {offsets = [0, 0], sizes = [1, 1568], strides = [1, 1]} : vector<8x1568xf32> to vector<1x1568xf32>
    %560 = vector.broadcast %558 : vector<8x1xf32> to vector<8x1568xf32>
    %561 = vector.broadcast %559 : vector<1x1568xf32> to vector<8x1568xf32>
    %562 = arith.mulf %560, %561 : vector<8x1568xf32>
    %563 = vector.extract_strided_slice %0 {offsets = [0, 41], sizes = [8, 1], strides = [1, 1]} : vector<8x48xf32> to vector<8x1xf32>
    %564 = vector.extract_strided_slice %501 {offsets = [1, 0], sizes = [1, 1568], strides = [1, 1]} : vector<8x1568xf32> to vector<1x1568xf32>
    %565 = vector.broadcast %563 : vector<8x1xf32> to vector<8x1568xf32>
    %566 = vector.broadcast %564 : vector<1x1568xf32> to vector<8x1568xf32>
    %567 = arith.mulf %565, %566 : vector<8x1568xf32>
    %568 = arith.addf %562, %567 : vector<8x1568xf32>
    %569 = vector.extract_strided_slice %0 {offsets = [0, 42], sizes = [8, 1], strides = [1, 1]} : vector<8x48xf32> to vector<8x1xf32>
    %570 = vector.extract_strided_slice %501 {offsets = [2, 0], sizes = [1, 1568], strides = [1, 1]} : vector<8x1568xf32> to vector<1x1568xf32>
    %571 = vector.broadcast %569 : vector<8x1xf32> to vector<8x1568xf32>
    %572 = vector.broadcast %570 : vector<1x1568xf32> to vector<8x1568xf32>
    %573 = arith.mulf %571, %572 : vector<8x1568xf32>
    %574 = arith.addf %568, %573 : vector<8x1568xf32>
    %575 = vector.extract_strided_slice %0 {offsets = [0, 43], sizes = [8, 1], strides = [1, 1]} : vector<8x48xf32> to vector<8x1xf32>
    %576 = vector.extract_strided_slice %501 {offsets = [3, 0], sizes = [1, 1568], strides = [1, 1]} : vector<8x1568xf32> to vector<1x1568xf32>
    %577 = vector.broadcast %575 : vector<8x1xf32> to vector<8x1568xf32>
    %578 = vector.broadcast %576 : vector<1x1568xf32> to vector<8x1568xf32>
    %579 = arith.mulf %577, %578 : vector<8x1568xf32>
    %580 = arith.addf %574, %579 : vector<8x1568xf32>
    %581 = vector.extract_strided_slice %0 {offsets = [0, 44], sizes = [8, 1], strides = [1, 1]} : vector<8x48xf32> to vector<8x1xf32>
    %582 = vector.extract_strided_slice %501 {offsets = [4, 0], sizes = [1, 1568], strides = [1, 1]} : vector<8x1568xf32> to vector<1x1568xf32>
    %583 = vector.broadcast %581 : vector<8x1xf32> to vector<8x1568xf32>
    %584 = vector.broadcast %582 : vector<1x1568xf32> to vector<8x1568xf32>
    %585 = arith.mulf %583, %584 : vector<8x1568xf32>
    %586 = arith.addf %580, %585 : vector<8x1568xf32>
    %587 = vector.extract_strided_slice %0 {offsets = [0, 45], sizes = [8, 1], strides = [1, 1]} : vector<8x48xf32> to vector<8x1xf32>
    %588 = vector.extract_strided_slice %501 {offsets = [5, 0], sizes = [1, 1568], strides = [1, 1]} : vector<8x1568xf32> to vector<1x1568xf32>
    %589 = vector.broadcast %587 : vector<8x1xf32> to vector<8x1568xf32>
    %590 = vector.broadcast %588 : vector<1x1568xf32> to vector<8x1568xf32>
    %591 = arith.mulf %589, %590 : vector<8x1568xf32>
    %592 = arith.addf %586, %591 : vector<8x1568xf32>
    %593 = vector.extract_strided_slice %0 {offsets = [0, 46], sizes = [8, 1], strides = [1, 1]} : vector<8x48xf32> to vector<8x1xf32>
    %594 = vector.extract_strided_slice %501 {offsets = [6, 0], sizes = [1, 1568], strides = [1, 1]} : vector<8x1568xf32> to vector<1x1568xf32>
    %595 = vector.broadcast %593 : vector<8x1xf32> to vector<8x1568xf32>
    %596 = vector.broadcast %594 : vector<1x1568xf32> to vector<8x1568xf32>
    %597 = arith.mulf %595, %596 : vector<8x1568xf32>
    %598 = arith.addf %592, %597 : vector<8x1568xf32>
    %599 = vector.extract_strided_slice %0 {offsets = [0, 47], sizes = [8, 1], strides = [1, 1]} : vector<8x48xf32> to vector<8x1xf32>
    %600 = vector.extract_strided_slice %501 {offsets = [7, 0], sizes = [1, 1568], strides = [1, 1]} : vector<8x1568xf32> to vector<1x1568xf32>
    %601 = vector.broadcast %599 : vector<8x1xf32> to vector<8x1568xf32>
    %602 = vector.broadcast %600 : vector<1x1568xf32> to vector<8x1568xf32>
    %603 = arith.mulf %601, %602 : vector<8x1568xf32>
    %604 = arith.addf %598, %603 : vector<8x1568xf32>
    %605 = vector.extract_strided_slice %1 {offsets = [0, 5], sizes = [8, 1], strides = [1, 1]} : vector<8x6xf32> to vector<8x1xf32>
    %606 = vector.broadcast %605 : vector<8x1xf32> to vector<8x1568xf32>
    %607 = arith.addf %604, %606 : vector<8x1568xf32>
    %608 = vector.extract_strided_slice %0 {offsets = [0, 40], sizes = [8, 1], strides = [1, 1]} : vector<8x48xf32> to vector<8x1xf32>
    %609 = vector.extract_strided_slice %557 {offsets = [0, 0], sizes = [1, 128], strides = [1, 1]} : vector<8x128xf32> to vector<1x128xf32>
    %610 = vector.broadcast %608 : vector<8x1xf32> to vector<8x128xf32>
    %611 = vector.broadcast %609 : vector<1x128xf32> to vector<8x128xf32>
    %612 = arith.mulf %610, %611 : vector<8x128xf32>
    %613 = vector.extract_strided_slice %0 {offsets = [0, 41], sizes = [8, 1], strides = [1, 1]} : vector<8x48xf32> to vector<8x1xf32>
    %614 = vector.extract_strided_slice %557 {offsets = [1, 0], sizes = [1, 128], strides = [1, 1]} : vector<8x128xf32> to vector<1x128xf32>
    %615 = vector.broadcast %613 : vector<8x1xf32> to vector<8x128xf32>
    %616 = vector.broadcast %614 : vector<1x128xf32> to vector<8x128xf32>
    %617 = arith.mulf %615, %616 : vector<8x128xf32>
    %618 = arith.addf %612, %617 : vector<8x128xf32>
    %619 = vector.extract_strided_slice %0 {offsets = [0, 42], sizes = [8, 1], strides = [1, 1]} : vector<8x48xf32> to vector<8x1xf32>
    %620 = vector.extract_strided_slice %557 {offsets = [2, 0], sizes = [1, 128], strides = [1, 1]} : vector<8x128xf32> to vector<1x128xf32>
    %621 = vector.broadcast %619 : vector<8x1xf32> to vector<8x128xf32>
    %622 = vector.broadcast %620 : vector<1x128xf32> to vector<8x128xf32>
    %623 = arith.mulf %621, %622 : vector<8x128xf32>
    %624 = arith.addf %618, %623 : vector<8x128xf32>
    %625 = vector.extract_strided_slice %0 {offsets = [0, 43], sizes = [8, 1], strides = [1, 1]} : vector<8x48xf32> to vector<8x1xf32>
    %626 = vector.extract_strided_slice %557 {offsets = [3, 0], sizes = [1, 128], strides = [1, 1]} : vector<8x128xf32> to vector<1x128xf32>
    %627 = vector.broadcast %625 : vector<8x1xf32> to vector<8x128xf32>
    %628 = vector.broadcast %626 : vector<1x128xf32> to vector<8x128xf32>
    %629 = arith.mulf %627, %628 : vector<8x128xf32>
    %630 = arith.addf %624, %629 : vector<8x128xf32>
    %631 = vector.extract_strided_slice %0 {offsets = [0, 44], sizes = [8, 1], strides = [1, 1]} : vector<8x48xf32> to vector<8x1xf32>
    %632 = vector.extract_strided_slice %557 {offsets = [4, 0], sizes = [1, 128], strides = [1, 1]} : vector<8x128xf32> to vector<1x128xf32>
    %633 = vector.broadcast %631 : vector<8x1xf32> to vector<8x128xf32>
    %634 = vector.broadcast %632 : vector<1x128xf32> to vector<8x128xf32>
    %635 = arith.mulf %633, %634 : vector<8x128xf32>
    %636 = arith.addf %630, %635 : vector<8x128xf32>
    %637 = vector.extract_strided_slice %0 {offsets = [0, 45], sizes = [8, 1], strides = [1, 1]} : vector<8x48xf32> to vector<8x1xf32>
    %638 = vector.extract_strided_slice %557 {offsets = [5, 0], sizes = [1, 128], strides = [1, 1]} : vector<8x128xf32> to vector<1x128xf32>
    %639 = vector.broadcast %637 : vector<8x1xf32> to vector<8x128xf32>
    %640 = vector.broadcast %638 : vector<1x128xf32> to vector<8x128xf32>
    %641 = arith.mulf %639, %640 : vector<8x128xf32>
    %642 = arith.addf %636, %641 : vector<8x128xf32>
    %643 = vector.extract_strided_slice %0 {offsets = [0, 46], sizes = [8, 1], strides = [1, 1]} : vector<8x48xf32> to vector<8x1xf32>
    %644 = vector.extract_strided_slice %557 {offsets = [6, 0], sizes = [1, 128], strides = [1, 1]} : vector<8x128xf32> to vector<1x128xf32>
    %645 = vector.broadcast %643 : vector<8x1xf32> to vector<8x128xf32>
    %646 = vector.broadcast %644 : vector<1x128xf32> to vector<8x128xf32>
    %647 = arith.mulf %645, %646 : vector<8x128xf32>
    %648 = arith.addf %642, %647 : vector<8x128xf32>
    %649 = vector.extract_strided_slice %0 {offsets = [0, 47], sizes = [8, 1], strides = [1, 1]} : vector<8x48xf32> to vector<8x1xf32>
    %650 = vector.extract_strided_slice %557 {offsets = [7, 0], sizes = [1, 128], strides = [1, 1]} : vector<8x128xf32> to vector<1x128xf32>
    %651 = vector.broadcast %649 : vector<8x1xf32> to vector<8x128xf32>
    %652 = vector.broadcast %650 : vector<1x128xf32> to vector<8x128xf32>
    %653 = arith.mulf %651, %652 : vector<8x128xf32>
    %654 = arith.addf %648, %653 : vector<8x128xf32>
    %655 = vector.extract_strided_slice %1 {offsets = [0, 5], sizes = [8, 1], strides = [1, 1]} : vector<8x6xf32> to vector<8x1xf32>
    %656 = vector.broadcast %655 : vector<8x1xf32> to vector<8x128xf32>
    %657 = arith.addf %654, %656 : vector<8x128xf32>
    %c5_i32 = arith.constant 5 : i32
    %658 = vector.broadcast %c5_i32 : i32 to vector<8x128xi32>
    %659 = arith.cmpi eq, %4, %658 : vector<8x128xi32>
    %660 = vector.extract_strided_slice %1 {offsets = [0, 5], sizes = [8, 1], strides = [1, 1]} : vector<8x6xf32> to vector<8x1xf32>
    %661 = vector.shape_cast %660 : vector<8x1xf32> to vector<8x1xf32>
    %662 = vector.broadcast %661 : vector<8x1xf32> to vector<8x128xf32>
    %663 = arith.select %659, %662, %657 : vector<8x128xi1>, vector<8x128xf32>
    %c2 = arith.constant 2 : index
    %c0_31 = arith.constant 0 : index
    %664 = vector.load %arg5[%c2, %c0_31] : memref<3x128xf32, #tpu.memory_space<vmem>>, vector<1x128xf32>
    %665 = arith.mulf %607, %7 : vector<8x1568xf32>
    %cst_32 = arith.constant dense<0.000000e+00> : vector<8xf32>
    %666 = vector.multi_reduction <add>, %665, %cst_32 [1] : vector<8x1568xf32> to vector<8xf32>
    %667 = vector.shape_cast %666 : vector<8xf32> to vector<8x1xf32>
    %668 = vector.broadcast %664 : vector<1x128xf32> to vector<8x128xf32>
    %669 = arith.mulf %663, %668 : vector<8x128xf32>
    %cst_33 = arith.constant dense<0.000000e+00> : vector<8xf32>
    %670 = vector.multi_reduction <add>, %669, %cst_33 [1] : vector<8x128xf32> to vector<8xf32>
    %671 = vector.shape_cast %670 : vector<8xf32> to vector<8x1xf32>
    %672 = arith.addf %667, %671 : vector<8x1xf32>
    %673 = arith.mulf %665, %607 : vector<8x1568xf32>
    %cst_34 = arith.constant dense<0.000000e+00> : vector<8xf32>
    %674 = vector.multi_reduction <add>, %673, %cst_34 [1] : vector<8x1568xf32> to vector<8xf32>
    %675 = vector.shape_cast %674 : vector<8xf32> to vector<8x1xf32>
    %676 = arith.mulf %663, %663 : vector<8x128xf32>
    %677 = vector.broadcast %664 : vector<1x128xf32> to vector<8x128xf32>
    %678 = arith.mulf %676, %677 : vector<8x128xf32>
    %cst_35 = arith.constant dense<0.000000e+00> : vector<8xf32>
    %679 = vector.multi_reduction <add>, %678, %cst_35 [1] : vector<8x128xf32> to vector<8xf32>
    %680 = vector.shape_cast %679 : vector<8xf32> to vector<8x1xf32>
    %681 = arith.addf %675, %680 : vector<8x1xf32>
    %cst_36 = arith.constant 6.37755089E-4 : f32
    %682 = vector.broadcast %cst_36 : f32 to vector<8x1xf32>
    %683 = arith.mulf %672, %682 : vector<8x1xf32>
    %cst_37 = arith.constant 6.37755089E-4 : f32
    %684 = vector.broadcast %cst_37 : f32 to vector<8x1xf32>
    %685 = arith.mulf %681, %684 : vector<8x1xf32>
    %686 = arith.mulf %683, %683 : vector<8x1xf32>
    %687 = arith.subf %685, %686 : vector<8x1xf32>
    %c0_38 = arith.constant 0 : index
    %c2_39 = arith.constant 2 : index
    %688 = vector.load %arg3[%c0_38, %c2_39] : memref<8x3xf32, #tpu.memory_space<vmem>>, vector<8x1xf32>
    %cst_40 = arith.constant 9.99999974E-6 : f32
    %689 = vector.broadcast %cst_40 : f32 to vector<8x1xf32>
    %690 = arith.addf %687, %689 : vector<8x1xf32>
    %691 = math.rsqrt %690 : vector<8x1xf32>
    %692 = arith.mulf %688, %691 : vector<8x1xf32>
    %c0_41 = arith.constant 0 : index
    %c2_42 = arith.constant 2 : index
    %693 = vector.load %arg4[%c0_41, %c2_42] : memref<8x3xf32, #tpu.memory_space<vmem>>, vector<8x1xf32>
    %694 = arith.mulf %683, %692 : vector<8x1xf32>
    %695 = arith.subf %693, %694 : vector<8x1xf32>
    %696 = vector.broadcast %692 : vector<8x1xf32> to vector<8x1568xf32>
    %697 = arith.mulf %607, %696 : vector<8x1568xf32>
    %698 = vector.broadcast %695 : vector<8x1xf32> to vector<8x1568xf32>
    %699 = arith.addf %697, %698 : vector<8x1568xf32>
    %700 = vector.broadcast %692 : vector<8x1xf32> to vector<8x128xf32>
    %701 = arith.mulf %663, %700 : vector<8x128xf32>
    %702 = vector.broadcast %695 : vector<8x1xf32> to vector<8x128xf32>
    %703 = arith.addf %701, %702 : vector<8x128xf32>
    %704 = arith.mulf %699, %7 : vector<8x1568xf32>
    %705 = vector.extract_strided_slice %703 {offsets = [0, 0], sizes = [8, 1], strides = [1, 1]} : vector<8x128xf32> to vector<8x1xf32>
    %c0_43 = arith.constant 0 : index
    %c0_44 = arith.constant 0 : index
    %706 = vector.load %arg6[%c0_43, %c0_44] : memref<7x1568xf32, #tpu.memory_space<vmem>>, vector<1x1568xf32>
    %707 = vector.broadcast %705 : vector<8x1xf32> to vector<8x1568xf32>
    %708 = vector.broadcast %706 : vector<1x1568xf32> to vector<8x1568xf32>
    %709 = arith.mulf %707, %708 : vector<8x1568xf32>
    %710 = arith.addf %704, %709 : vector<8x1568xf32>
    %711 = vector.extract_strided_slice %703 {offsets = [0, 1], sizes = [8, 1], strides = [1, 1]} : vector<8x128xf32> to vector<8x1xf32>
    %c1_45 = arith.constant 1 : index
    %c0_46 = arith.constant 0 : index
    %712 = vector.load %arg6[%c1_45, %c0_46] : memref<7x1568xf32, #tpu.memory_space<vmem>>, vector<1x1568xf32>
    %713 = vector.broadcast %711 : vector<8x1xf32> to vector<8x1568xf32>
    %714 = vector.broadcast %712 : vector<1x1568xf32> to vector<8x1568xf32>
    %715 = arith.mulf %713, %714 : vector<8x1568xf32>
    %716 = arith.addf %710, %715 : vector<8x1568xf32>
    %717 = vector.extract_strided_slice %703 {offsets = [0, 2], sizes = [8, 1], strides = [1, 1]} : vector<8x128xf32> to vector<8x1xf32>
    %c2_47 = arith.constant 2 : index
    %c0_48 = arith.constant 0 : index
    %718 = vector.load %arg6[%c2_47, %c0_48] : memref<7x1568xf32, #tpu.memory_space<vmem>>, vector<1x1568xf32>
    %719 = vector.broadcast %717 : vector<8x1xf32> to vector<8x1568xf32>
    %720 = vector.broadcast %718 : vector<1x1568xf32> to vector<8x1568xf32>
    %721 = arith.mulf %719, %720 : vector<8x1568xf32>
    %722 = arith.addf %716, %721 : vector<8x1568xf32>
    %723 = vector.extract_strided_slice %703 {offsets = [0, 3], sizes = [8, 1], strides = [1, 1]} : vector<8x128xf32> to vector<8x1xf32>
    %c3 = arith.constant 3 : index
    %c0_49 = arith.constant 0 : index
    %724 = vector.load %arg6[%c3, %c0_49] : memref<7x1568xf32, #tpu.memory_space<vmem>>, vector<1x1568xf32>
    %725 = vector.broadcast %723 : vector<8x1xf32> to vector<8x1568xf32>
    %726 = vector.broadcast %724 : vector<1x1568xf32> to vector<8x1568xf32>
    %727 = arith.mulf %725, %726 : vector<8x1568xf32>
    %728 = arith.addf %722, %727 : vector<8x1568xf32>
    %729 = vector.extract_strided_slice %703 {offsets = [0, 4], sizes = [8, 1], strides = [1, 1]} : vector<8x128xf32> to vector<8x1xf32>
    %c4 = arith.constant 4 : index
    %c0_50 = arith.constant 0 : index
    %730 = vector.load %arg6[%c4, %c0_50] : memref<7x1568xf32, #tpu.memory_space<vmem>>, vector<1x1568xf32>
    %731 = vector.broadcast %729 : vector<8x1xf32> to vector<8x1568xf32>
    %732 = vector.broadcast %730 : vector<1x1568xf32> to vector<8x1568xf32>
    %733 = arith.mulf %731, %732 : vector<8x1568xf32>
    %734 = arith.addf %728, %733 : vector<8x1568xf32>
    %735 = vector.extract_strided_slice %703 {offsets = [0, 5], sizes = [8, 1], strides = [1, 1]} : vector<8x128xf32> to vector<8x1xf32>
    %c5 = arith.constant 5 : index
    %c0_51 = arith.constant 0 : index
    %736 = vector.load %arg6[%c5, %c0_51] : memref<7x1568xf32, #tpu.memory_space<vmem>>, vector<1x1568xf32>
    %737 = vector.broadcast %735 : vector<8x1xf32> to vector<8x1568xf32>
    %738 = vector.broadcast %736 : vector<1x1568xf32> to vector<8x1568xf32>
    %739 = arith.mulf %737, %738 : vector<8x1568xf32>
    %740 = arith.addf %734, %739 : vector<8x1568xf32>
    %c0_52 = arith.constant 0 : index
    %c0_53 = arith.constant 0 : index
    %741 = vector.load %arg7[%c0_52, %c0_53] : memref<8x1568xf32, #tpu.memory_space<vmem>>, vector<8x1568xf32>
    tpu.vector_store %arg7[%c0_52, %c0_53], %740 {strides = array<i32>} : memref<8x1568xf32, #tpu.memory_space<vmem>>, vector<8x1568xf32>,
    return
  }
}

</mosaic_0001>

<bundles_post_ra>
// kernel: model_forward.1
= control target key start
LH: loop header
LB: loop body
LE: loop exit
PB: predicated region body
PF: predicated region fallthrough
CT: control target
= control target key end

     0   :  { %v8869_v0 = vmov 2   ;;  %v8871_v1 = vmov 0   ;;  %v8867_v4 = vmov 1   ;;  %v5292_v5 = vmov 8   ;;  %s8859_s1 = inlined_call_operand.vmem [shape: f32[8,48], index: 1, kind: input, shape index: {}]   ;;  %s8860_s2 = inlined_call_operand.vmem [shape: f32[8,6], index: 2, kind: input, shape index: {}]   ;;  %s8861_s0 = inlined_call_operand.vmem [shape: f32[3,1568], index: 0, kind: input, shape index: {}]   ;;  %s8862_s6 = inlined_call_operand.vmem [shape: f32[7,1568], index: 6, kind: input, shape index: {}]   ;;  %s8863_s5 = inlined_call_operand.vmem [shape: f32[3,128], index: 5, kind: input, shape index: {}]   ;;  %s8864_s3 = inlined_call_operand.vmem [shape: f32[8,3], index: 3, kind: input, shape index: {}]   ;;  %s8865_s4 = inlined_call_operand.vmem [shape: f32[8,3], index: 4, kind: input, shape index: {}]   ;;  %s8866_s7 = inlined_call_operand.vmem [shape: f32[8,1568], index: 7, kind: output, shape index: {}]  }
   0x1   :  { %5215 = vset.pattern.permute.xlu1 %v8869_v0  ;;  %5213 = vset.pattern.permute.xlu0 %v8871_v1  ;;  %v26_v2 = vld [vmem:[%s8859_s1] sm:$0xff]  ;;  %v5293_v6 = vmov 9   ;;  %v5294_v7 = vmov 10   ;;  %v5295_v8 = vmov 12   ;;  %v5296_v9 = vmov 11  }
   0x2   :  { %402 = vperm.xlu1 %5215, %v26_v2   ;;  %114 = vperm.xlu0 %5213, %v26_v2   ;;  %v27_v3 = vld [vmem:[%s8860_s2] sm:$0xff]  ;;  %v5297_v10 = vmov 15   ;;  %v5298_v11 = vmov 13   ;;  %v5299_v12 = vmov 14   ;;  %v35_v13 = vlaneseq  ;;  %v5403_v18 = vld [vmem:[%s8861_s0 + $0x8] sm:$0x77] }
   0x3   :  { %v5398_v17 = vld [vmem:[%s8861_s0] sm:$0x77]  ;;  %v5408_v19 = vld [vmem:[%s8861_s0 + $0x10] sm:$0x77]  ;;  %v5415_v21 = vld [vmem:[%s8861_s0 + $0x18] sm:$0x77] }
   0x4   :  { %v5387_v14 = vshrl.u32 %v35_v13, 7  ;;  %v5428_v26 = vld [vmem:[%s8861_s0 + $0x20] sm:$0x77]  ;;  %v5443_v31 = vld [vmem:[%s8861_s0 + $0x28] sm:$0x77]  ;;  %v5520_v62 = vand.u32 127, %v35_v13 }
   0x5   :  { %vm1309_vm2 = vcmask 261120  }
   0x6   :  { %5216 = vset.pattern.permute.xlu1 %v8871_v1  ;;  %5214 = vset.pattern.permute.xlu0 %v8867_v4  ;;  %v5390_v15 = vsub.s32 0, %v5387_v14  ;;  %v5393_v16 = vsub.s32 4, %v5387_v14  ;;  %v5435_v29 = vsub.s32 1, %v5387_v14  ;;  %v5438_v30 = vsub.s32 5, %v5387_v14  ;;  %9002 = vst [vmem:[#allocation8_spill] sm:$0xff] %v5520_v62 }
   0x7   :  { %550 = vperm.xlu1 %5216, %v27_v3   ;;  %255 = vperm.xlu0 %5214, %v26_v2   ;;  %v5457_v37 = vsub.s32 2, %v5387_v14  ;;  %v5460_v38 = vsub.s32 6, %v5387_v14  ;;  %vm572_vm0 = vcmp.eq.s32.totalorder %v5520_v62, 0  ;;  %vm1282_vm1 = vcmp.eq.s32.totalorder %v5520_v62, 1 }
   0x8   :  { %8996 = vst [vmem:[#allocation2_spill] sm:$0xff] %v5390_v15  ;;  %8997 = vst [vmem:[#allocation3_spill] sm:$0xff] %v5393_v16  ;;  %v127_v20 = vrot.slane %v5398_v17, %v5390_v15  ;;  %v131_v22 = vrot.slane %v5398_v17, %v5393_v16  ;;  %v135_v23 = vrot.slane %v5403_v18, %v5390_v15 }
   0x9   :  { %v139_v24 = vrot.slane %v5403_v18, %v5393_v16  ;;  %v143_v25 = vrot.slane %v5408_v19, %v5390_v15  ;;  %v147_v27 = vrot.slane %v5408_v19, %v5393_v16  ;;  %v151_v28 = vrot.slane %v5415_v21, %v5390_v15  ;;  %8998 = vst [vmem:[#allocation4_spill] sm:$0xff] %v5435_v29 }
   0xa   :  { %8999 = vst [vmem:[#allocation5_spill] sm:$0xff] %v5438_v30  ;;  %v155_v32 = vrot.slane %v5415_v21, %v5393_v16  ;;  %v159_v33 = vrot.slane %v5428_v26, %v5390_v15  ;;  %v163_v34 = vrot.slane %v5428_v26, %v5393_v16  ;;  %v167_v35 = vrot.slane %v5443_v31, %v5390_v15 }
   0xb   :  { %5217 = vset.pattern.permute.xlu1 %v5292_v5  ;;  %5218 = vset.pattern.permute.xlu0 %v5293_v6  ;;  %v5454_v36 = vrot.slane %v127_v20, %v5390_v15  ;;  %9000 = vst [vmem:[#allocation6_spill] sm:$0xff] %v5457_v37  ;;  %9001 = vst [vmem:[#allocation7_spill] sm:$0xff] %v5460_v38  ;;  %v5463_v39 = vrot.slane %v131_v22, %v5390_v15  ;;  %v5530_v5 = vsub.s32 3, %v5387_v14 }
   0xc   :  { %575 = vperm.xlu1 %5217, %v26_v2   ;;  %644 = vperm.xlu0 %5218, %v26_v2   ;;  %v5466_v40 = vrot.slane %v135_v23, %v5390_v15  ;;  %v5469_v41 = vrot.slane %v139_v24, %v5390_v15  ;;  %v5472_v42 = vrot.slane %v143_v25, %v5390_v15  ;;  %v5563_v23 = vsub.s32 7, %v5387_v14  ;;  %v34_v24 = vld [vmem:[%s8861_s0 + $0x30] sm:$0x7]  ;;  %v5139_v14 = vld [vmem:[%s8862_s6 + $0x6] ss:$8 sm:$0xf0] }
   0xd   :  { %v5475_v43 = vrot.slane %v147_v27, %v5390_v15  ;;  %v5478_v44 = vrot.slane %v151_v28, %v5390_v15  ;;  %v261_v45 = vrot.slane %v5398_v17, %v5435_v29  ;;  %v265_v46 = vrot.slane %v5398_v17, %v5438_v30  ;;  %9003 = vst [vmem:[#allocation9_spill] sm:$0xff] %v5530_v5 }
   0xe   :  { %v5485_v47 = vrot.slane %v155_v32, %v5390_v15  ;;  %v5488_v48 = vrot.slane %v159_v33, %v5390_v15  ;;  %v5491_v49 = vrot.slane %v163_v34, %v5390_v15  ;;  %v269_v50 = vrot.slane %v5403_v18, %v5435_v29  ;;  %9004 = vst [vmem:[#allocation10_spill] sm:$0xff] %v5563_v23  ;;  %v5138_v32 = vld [vmem:[%s8862_s6 + $0x6] ss:$8 sm:$0xf] }
   0xf   :  { %v273_v51 = vrot.slane %v5403_v18, %v5438_v30  ;;  %v277_v52 = vrot.slane %v5408_v19, %v5435_v29  ;;  %v281_v53 = vrot.slane %v5408_v19, %v5438_v30  ;;  %v285_v54 = vrot.slane %v5415_v21, %v5435_v29 }
  0x10   :  { %5219 = vset.pattern.permute.xlu1 %v5294_v7  ;;  %5221 = vset.pattern.permute.xlu0 %v5295_v8  ;;  %v289_v55 = vrot.slane %v5415_v21, %v5438_v30  ;;  %v293_v56 = vrot.slane %v5428_v26, %v5435_v29  ;;  %v297_v57 = vrot.slane %v5428_v26, %v5438_v30 }
  0x11   :  { %726 = vperm.xlu1 %5219, %v26_v2   ;;  %890 = vperm.xlu0 %5221, %v26_v2   ;;  %v301_v58 = vrot.slane %v5443_v31, %v5435_v29  ;;  %v5512_v59 = vrot.slane %v167_v35, %v5390_v15  ;;  %v5515_v60 = vrot.slane %v261_v45, %v5435_v29 }
  0x12   :  { %v5518_v61 = vrot.slane %v265_v46, %v5435_v29  ;;  %v5523_v63 = vrot.slane %v269_v50, %v5435_v29  ;;  %v5533_v6 = vrot.slane %v273_v51, %v5435_v29  ;;  %v5536_v7 = vrot.slane %v277_v52, %v5435_v29 }
  0x13   :  { %v5539_v8 = vrot.slane %v281_v53, %v5435_v29  ;;  %v5554_v13 = vrot.slane %v301_v58, %v5435_v29  ;;  %v420_v20 = vrot.slane %v5403_v18, %v5460_v38  ;;  %v424_v22 = vrot.slane %v5408_v19, %v5457_v37 }
  0x14   :  { %v428_v25 = vrot.slane %v5408_v19, %v5460_v38  ;;  %v432_v27 = vrot.slane %v5415_v21, %v5457_v37  ;;  %v171_v33 = vrot.slane %v5443_v31, %v5393_v16  ;;  %v175_v19 = vrot.slane %v34_v24, %v5390_v15 }
  0x15   :  { %5220 = vset.pattern.permute.xlu1 %v5296_v9  ;;  %5224 = vset.pattern.permute.xlu0 %v5297_v10  ;;  %v5542_v9 = vrot.slane %v285_v54, %v5435_v29  ;;  %v5545_v10 = vrot.slane %v289_v55, %v5435_v29  ;;  %v305_v34 = vrot.slane %v5443_v31, %v5438_v30 }
  0x16   :  { %808 = vperm.xlu1 %5220, %v26_v2   ;;  %1136 = vperm.xlu0 %5224, %v26_v2   ;;  %v309_v35 = vrot.slane %v34_v24, %v5435_v29  ;;  %v436_v45 = vrot.slane %v5415_v21, %v5460_v38  ;;  %v440_v46 = vrot.slane %v5428_v26, %v5457_v37 }
  0x17   :  { %v444_v50 = vrot.slane %v5428_v26, %v5460_v38  ;;  %v448_v51 = vrot.slane %v5443_v31, %v5457_v37  ;;  %v5595_v53 = vor.u32 %v5139_v14, %v5138_v32  ;;  %v452_v54 = vrot.slane %v5443_v31, %v5460_v38 }
  0x18   :  { %v456_v55 = vrot.slane %v34_v24, %v5457_v37  ;;  %v485_v21 = vrot.slane %v420_v20, %v5457_v37  ;;  %v497_v26 = vrot.slane %v432_v27, %v5457_v37  ;;  %v5605_v58 = vrot.slane %v171_v33, %v5390_v15 }
  0x19   :  { %9005 = vst [vmem:[#allocation11_spill] sm:$0xff] %v5595_v53  ;;  %v5614_v31 = vrot.slane %v309_v35, %v5435_v29  ;;  %v5620_v20 = vrot.slane %v440_v46, %v5457_v37  ;;  %v5626_v24 = vrot.slane %v448_v51, %v5457_v37  ;;  %v5634_v32 = vrot.slane %v5595_v53, %v5390_v15 }
  0x1a   :  { %5222 = vset.pattern.permute.xlu1 %v5298_v11  ;;  %5226 = vset.pattern.permute.xlu0 %v8871_v1  ;;  %v5548_v11 = vrot.slane %v293_v56, %v5435_v29  ;;  %v489_v56 = vrot.slane %v424_v22, %v5457_v37  ;;  %v5623_v22 = vrot.slane %v444_v50, %v5457_v37 }
  0x1b   :  { %972 = vperm.xlu1 %5222, %v26_v2   ;;  %9006 = vst [vmem:[#allocation12_spill] sm:$0xff] %v5634_v32  ;;  %v5638_v14 = vrot.slane %v5595_v53, %v5435_v29  ;;  %v5641_v33 = vrot.slane %v452_v54, %v5457_v37 }
  0x1d   :  { %9007 = vst [vmem:[#allocation13_spill] sm:$0xff] %v5638_v14 }
  0x1f   :  { %5223 = vset.pattern.permute.xlu1 %v5299_v12  ;;  %v5551_v12 = vrot.slane %v297_v57, %v5435_v29  ;;  %v493_v57 = vrot.slane %v428_v25, %v5457_v37 }
  0x20   :  { %1054 = vperm.xlu1 %5223, %v26_v2   ;;  %v408_v2 = vrot.slane %v5398_v17, %v5457_v37 }
  0x22   :  { %v473_v28 = vrot.slane %v408_v2, %v5457_v37  ;;  %v5608_v2 = vrot.slane %v175_v19, %v5390_v15  ;;  %v5644_v19 = vrot.slane %v456_v55, %v5457_v37 }
  0x24   :  { %5225 = vset.pattern.permute.xlu1 %v8867_v4 }
  0x25   :  { %1218 = vperm.xlu1 %5225, %v27_v3   ;;  %v412_v3 = vrot.slane %v5398_v17, %v5460_v38  ;;  %v416_v17 = vrot.slane %v5403_v18, %v5457_v37 }
  0x27   :  { %v477_v18 = vrot.slane %v412_v3, %v5457_v37  ;;  %v481_v52 = vrot.slane %v416_v17, %v5457_v37  ;;  %v5611_v3 = vrot.slane %v305_v34, %v5435_v29  ;;  %v5617_v17 = vrot.slane %v436_v45, %v5457_v37 }
  0x81   :  { %v5628_v25 = vpop.permute.xlu1 %402  ;;  %v5630_v27 = vpop.permute.xlu0 %114 }
  0x82   :  { %v241_v34 = vmul.f32 %v5454_v36, %v5630_v27  ;;  %v242_v35 = vmul.f32 %v5463_v39, %v5630_v27  ;;  %v243_v45 = vmul.f32 %v5466_v40, %v5630_v27  ;;  %v244_v46 = vmul.f32 %v5469_v41, %v5630_v27 }
  0x83   :  { %v245_v50 = vmul.f32 %v5472_v42, %v5630_v27  ;;  %v246_v51 = vmul.f32 %v5475_v43, %v5630_v27  ;;  %v247_v54 = vmul.f32 %v5478_v44, %v5630_v27  ;;  %v248_v36 = vmul.f32 %v5485_v47, %v5630_v27 }
  0x84   :  { %v249_v39 = vmul.f32 %v5488_v48, %v5630_v27  ;;  %v250_v40 = vmul.f32 %v5491_v49, %v5630_v27  ;;  %v251_v41 = vmul.f32 %v5512_v59, %v5630_v27  ;;  %v522_v42 = vmul.f32 %v473_v28, %v5628_v25 }
  0x85   :  { %v523_v55 = vmul.f32 %v477_v18, %v5628_v25  ;;  %v524_v43 = vmul.f32 %v481_v52, %v5628_v25  ;;  %v525_v44 = vmul.f32 %v485_v21, %v5628_v25  ;;  %v526_v4 = vmul.f32 %v489_v56, %v5628_v25 }
  0x86   :  { %v5673_v47 = vpop.permute.xlu1 %550  ;;  %v256_v0 = vpop.permute.xlu0 %255  ;;  %v527_v48 = vmul.f32 %v493_v57, %v5628_v25  ;;  %v528_v49 = vmul.f32 %v497_v26, %v5628_v25  ;;  %v566_v1 = vmul.f32 0.0, %v5630_v27  ;;  %v569_v59 = vmul.f32 0.0, %v5628_v25 }
  0x87   :  { %v375_v28 = vmul.f32 %v5515_v60, %v256_v0  ;;  %v376_v18 = vmul.f32 %v5518_v61, %v256_v0  ;;  %v377_v52 = vmul.f32 %v5523_v63, %v256_v0  ;;  %v378_v21 = vmul.f32 %v5533_v6, %v256_v0 }
  0x88   :  { %v379_v56 = vmul.f32 %v5536_v7, %v256_v0  ;;  %v380_v14 = vmul.f32 %v5539_v8, %v256_v0  ;;  %v381_v57 = vmul.f32 %v5542_v9, %v256_v0  ;;  %v382_v26 = vmul.f32 %v5545_v10, %v256_v0 }
  0x89   :  { %v383_v32 = vmul.f32 %v5548_v11, %v256_v0  ;;  %v384_v53 = vmul.f32 %v5551_v12, %v256_v0  ;;  %v385_v60 = vmul.f32 %v5554_v13, %v256_v0  ;;  %v388_v23 = vadd.f32 %v375_v28, %v241_v34 }
  0x8a   :  { %v389_v61 = vadd.f32 %v376_v18, %v242_v35  ;;  %v390_v38 = vadd.f32 %v377_v52, %v243_v45  ;;  %v391_v63 = vadd.f32 %v378_v21, %v244_v46  ;;  %v392_v30 = vadd.f32 %v379_v56, %v245_v50  ;;  %v9010_v18 = vld [vmem:[#allocation9_spill] sm:$0xff]  ;;  %v9011_v21 = vld [vmem:[#allocation3_spill] sm:$0xff] }
  0x8b   :  { %v393_v6 = vadd.f32 %v380_v14, %v246_v51  ;;  %v394_v7 = vadd.f32 %v381_v57, %v247_v54  ;;  %v395_v8 = vadd.f32 %v382_v26, %v248_v36  ;;  %v396_v16 = vadd.f32 %v383_v32, %v249_v39  ;;  %v5691_v9 = vpop.permute.xlu1 %575  ;;  %v5693_v10 = vpop.permute.xlu0 %644  ;;  %v9012_v57 = vld [vmem:[#allocation5_spill] sm:$0xff] }
  0x8c   :  { %v535_v11 = vadd.f32 %v522_v42, %v388_v23  ;;  %v536_v5 = vadd.f32 %v523_v55, %v389_v61  ;;  %v537_v12 = vadd.f32 %v524_v43, %v390_v38  ;;  %v538_v37 = vadd.f32 %v525_v44, %v391_v63  ;;  %v9014_v63 = vld [vmem:[#allocation10_spill] sm:$0xff] }
  0x8d   :  { %v539_v13 = vadd.f32 %v526_v4, %v392_v30  ;;  %v540_v34 = vadd.f32 %v527_v48, %v393_v6  ;;  %v541_v35 = vadd.f32 %v528_v49, %v394_v7  ;;  %v567_v45 = vmul.f32 0.0, %v256_v0 }
  0x8e   :  { %v5696_v46 = vadd.f32 %v5673_v47, %v535_v11  ;;  %v5699_v14 = vadd.f32 %v5673_v47, %v536_v5  ;;  %v5702_v32 = vadd.f32 %v5673_v47, %v537_v12  ;;  %v5705_v50 = vadd.f32 %v5673_v47, %v538_v37 }
  0x8f   :  { %v5708_v23 = vadd.f32 %v5673_v47, %v539_v13  ;;  %v568_v38 = vadd.f32 %v567_v45, %v566_v1  ;;  %v252_v4 = vmul.f32 %v5605_v58, %v5630_v27  ;;  %v253_v30 = vmul.f32 %v5608_v2, %v5630_v27 }
  0x90   :  { %v5714_v51 = vpop.permute.xlu1 %726  ;;  %v5716_v5 = vpop.permute.xlu0 %890  ;;  %v386_v54 = vmul.f32 %v5611_v3, %v256_v0  ;;  %v387_v36 = vmul.f32 %v5614_v31, %v256_v0  ;;  %v397_v37 = vadd.f32 %v384_v53, %v250_v40  ;;  %v398_v39 = vadd.f32 %v385_v60, %v251_v41  ;;  %v9013_v60 = vld [vmem:[#allocation7_spill] sm:$0xff] }
  0x91   :  { %v570_v42 = vadd.f32 %v569_v59, %v568_v38  ;;  %v529_v1 = vmul.f32 %v5617_v17, %v5628_v25  ;;  %v530_v58 = vmul.f32 %v5620_v20, %v5628_v25  ;;  %v531_v2 = vmul.f32 %v5623_v22, %v5628_v25  ;;  %v9009_v59 = vld [vmem:[#allocation6_spill] sm:$0xff] }
  0x92   :  { %v399_v27 = vadd.f32 %v386_v54, %v252_v4  ;;  %v400_v55 = vadd.f32 %v387_v36, %v253_v30  ;;  %v532_v43 = vmul.f32 %v5626_v24, %v5628_v25  ;;  %v533_v0 = vmul.f32 %v5641_v33, %v5628_v25 }
  0x93   :  { %v571_v53 = vadd.f32 %v570_v42, %v5673_v47  ;;  %v534_v3 = vmul.f32 %v5644_v19, %v5628_v25  ;;  %v542_v31 = vadd.f32 %v529_v1, %v395_v8  ;;  %v543_v17 = vadd.f32 %v530_v58, %v396_v16 }
  0x94   :  { %v544_v40 = vadd.f32 %v531_v2, %v397_v37  ;;  %v545_v20 = vadd.f32 %v532_v43, %v398_v39  ;;  %v546_v41 = vadd.f32 %v533_v0, %v399_v27  ;;  %v5734_v22 = vadd.f32 %v5673_v47, %v540_v34 }
  0x95   :  { %v5736_v44 = vpop.permute.xlu1 %808  ;;  %v573_v24 = vsel %vm572_vm0, %v5673_v47, %v571_v53  ;;  %v547_v33 = vadd.f32 %v534_v3, %v400_v55  ;;  %v5742_v48 = vadd.f32 %v5673_v47, %v541_v35  ;;  %v5745_v25 = vadd.f32 %v5673_v47, %v542_v31  ;;  %v5747_v16 = vpop.permute.xlu0 %1136 }
  0x96   :  { %9008 = vst [vmem:[#allocation14_spill] sm:$0xff] %v5747_v16  ;;  %v1237_v19 = vrot.slane %v573_v24, %v5390_v15  ;;  %v1242_v49 = vrot.slane %v573_v24, %v5435_v29  ;;  %v1248_v28 = vrot.slane %v573_v24, %v9009_v59  ;;  %v1254_v52 = vrot.slane %v573_v24, %v9010_v18 }
  0x97   :  { %v1260_v56 = vrot.slane %v573_v24, %v9011_v21  ;;  %v1266_v26 = vrot.slane %v573_v24, %v9012_v57  ;;  %v1272_v61 = vrot.slane %v573_v24, %v9013_v60  ;;  %v1278_v6 = vrot.slane %v573_v24, %v9014_v63 }
  0x98   :  { %v1238_v7 = vmul.f32 %v1237_v19, %v5691_v9  ;;  %v1243_v8 = vmul.f32 %v1242_v49, %v5693_v10  ;;  %v1249_v11 = vmul.f32 %v1248_v28, %v5714_v51  ;;  %v1255_v12 = vmul.f32 %v1254_v52, %v5736_v44 }
  0x99   :  { %v1261_v13 = vmul.f32 %v1260_v56, %v5716_v5  ;;  %v1279_v34 = vmul.f32 %v1278_v6, %v5747_v16  ;;  %v5764_v35 = vadd.f32 %v5673_v47, %v543_v17  ;;  %v5767_v45 = vadd.f32 %v5673_v47, %v544_v40 }
  0x9a   :  { %v5769_v38 = vpop.permute.xlu1 %972  ;;  %v1244_v4 = vadd.f32 %v1243_v8, %v1238_v7  ;;  %v5772_v30 = vadd.f32 %v5673_v47, %v545_v20  ;;  %v5775_v54 = vadd.f32 %v5673_v47, %v546_v41  ;;  %v5778_v36 = vadd.f32 %v5673_v47, %v547_v33 }
  0x9b   :  { %9015 = vst [vmem:[#allocation3_spill] sm:$0xff] %v5769_v38  ;;  %v1267_v37 = vmul.f32 %v1266_v26, %v5769_v38  ;;  %v581_v39 = vrot.slane %v5696_v46, %v5390_v15  ;;  %v585_v42 = vrot.slane %v5699_v14, %v5390_v15  ;;  %v589_v1 = vrot.slane %v5702_v32, %v5390_v15 }
  0x9c   :  { %v1250_v58 = vadd.f32 %v1249_v11, %v1244_v4  ;;  %v593_v2 = vrot.slane %v5705_v50, %v5390_v15  ;;  %v597_v27 = vrot.slane %v5708_v23, %v5390_v15  ;;  %v601_v47 = vrot.slane %v5734_v22, %v5390_v15 }
  0x9d   :  { %v605_v55 = vrot.slane %v5742_v48, %v5390_v15  ;;  %v609_v43 = vrot.slane %v5745_v25, %v5390_v15  ;;  %v613_v0 = vrot.slane %v5764_v35, %v5390_v15  ;;  %v617_v53 = vrot.slane %v5767_v45, %v5390_v15 }
  0x9e   :  { %v1256_v3 = vadd.f32 %v1255_v12, %v1250_v58  ;;  %v621_v31 = vrot.slane %v5772_v30, %v5390_v15  ;;  %v625_v17 = vrot.slane %v5775_v54, %v5390_v15  ;;  %v629_v40 = vrot.slane %v5778_v36, %v5390_v15 }
  0x9f   :  { %v5807_v20 = vpop.permute.xlu1 %1054  ;;  %v630_v41 = vmul.f32 %v581_v39, %v5691_v9  ;;  %v631_v24 = vmul.f32 %v585_v42, %v5691_v9  ;;  %v632_v33 = vmul.f32 %v589_v1, %v5691_v9  ;;  %v633_v19 = vmul.f32 %v593_v2, %v5691_v9 }
  0xa0   :  { %9016 = vst [vmem:[#allocation15_spill] sm:$0xff] %v5807_v20  ;;  %v1262_v49 = vadd.f32 %v1261_v13, %v1256_v3  ;;  %v1273_v28 = vmul.f32 %v1272_v61, %v5807_v20  ;;  %v634_v52 = vmul.f32 %v597_v27, %v5691_v9  ;;  %v635_v56 = vmul.f32 %v601_v47, %v5691_v9 }
  0xa1   :  { %v636_v26 = vmul.f32 %v605_v55, %v5691_v9  ;;  %v637_v6 = vmul.f32 %v609_v43, %v5691_v9  ;;  %v638_v7 = vmul.f32 %v613_v0, %v5691_v9  ;;  %v639_v8 = vmul.f32 %v617_v53, %v5691_v9 }
  0xa2   :  { %v1268_v11 = vadd.f32 %v1267_v37, %v1262_v49  ;;  %v640_v12 = vmul.f32 %v621_v31, %v5691_v9  ;;  %v641_v4 = vmul.f32 %v625_v17, %v5691_v9  ;;  %v642_v13 = vmul.f32 %v629_v40, %v5691_v9 }
  0xa3   :  { %v650_v61 = vrot.slane %v5696_v46, %v5435_v29  ;;  %v654_v39 = vrot.slane %v5699_v14, %v5435_v29  ;;  %v658_v42 = vrot.slane %v5702_v32, %v5435_v29  ;;  %v662_v1 = vrot.slane %v5705_v50, %v5435_v29 }
  0xa4   :  { %v1274_v58 = vadd.f32 %v1273_v28, %v1268_v11  ;;  %v666_v37 = vrot.slane %v5708_v23, %v5435_v29  ;;  %v670_v2 = vrot.slane %v5734_v22, %v5435_v29  ;;  %v674_v9 = vrot.slane %v5742_v48, %v5435_v29  ;;  %v5838_v27 = vpop.permute.xlu1 %1218 }
  0xa5   :  { %v678_v47 = vrot.slane %v5745_v25, %v5435_v29  ;;  %v682_v55 = vrot.slane %v5764_v35, %v5435_v29  ;;  %v686_v43 = vrot.slane %v5767_v45, %v5435_v29  ;;  %v690_v0 = vrot.slane %v5772_v30, %v5435_v29 }
  0xa6   :  { %v1280_v53 = vadd.f32 %v1279_v34, %v1274_v58  ;;  %v694_v3 = vrot.slane %v5775_v54, %v5435_v29  ;;  %v698_v31 = vrot.slane %v5778_v36, %v5435_v29  ;;  %v699_v17 = vmul.f32 %v650_v61, %v5693_v10  ;;  %v5861_v34 = vld [vmem:[%s8863_s5] ss:$0 sm:$0xff] }
  0xa7   :  { %v700_v40 = vmul.f32 %v654_v39, %v5693_v10  ;;  %v701_v49 = vmul.f32 %v658_v42, %v5693_v10  ;;  %v702_v28 = vmul.f32 %v662_v1, %v5693_v10  ;;  %v703_v11 = vmul.f32 %v666_v37, %v5693_v10  ;;  %9017 = vst [vmem:[#allocation16_spill] sm:$0xff] %v5861_v34 }
  0xa8   :  { %v1281_v15 = vadd.f32 %v1280_v53, %v5838_v27  ;;  %v704_v58 = vmul.f32 %v670_v2, %v5693_v10  ;;  %v705_v29 = vmul.f32 %v674_v9, %v5693_v10  ;;  %v706_v61 = vmul.f32 %v678_v47, %v5693_v10 }
  0xa9   :  { %v707_v39 = vmul.f32 %v682_v55, %v5693_v10  ;;  %v708_v42 = vmul.f32 %v686_v43, %v5693_v10  ;;  %v709_v1 = vmul.f32 %v690_v0, %v5693_v10  ;;  %v710_v37 = vmul.f32 %v694_v3, %v5693_v10 }
  0xaa   :  { %v5873_v53 = vsel %vm1282_vm1, %v5838_v27, %v1281_v15  ;;  %v711_v16 = vmul.f32 %v698_v31, %v5693_v10  ;;  %v712_v2 = vadd.f32 %v699_v17, %v630_v41  ;;  %v713_v63 = vadd.f32 %v700_v40, %v631_v24 }
  0xab   :  { %v1318_v9 = vmul.f32 %v5861_v34, %v5873_v53  ;;  %v714_v47 = vadd.f32 %v701_v49, %v632_v33  ;;  %v715_v55 = vadd.f32 %v702_v28, %v633_v19  ;;  %v716_v20 = vadd.f32 %v703_v11, %v634_v52 }
  0xac   :  { %v717_v43 = vadd.f32 %v704_v58, %v635_v56  ;;  %v718_v60 = vadd.f32 %v705_v29, %v636_v26  ;;  %v719_v0 = vadd.f32 %v706_v61, %v637_v6  ;;  %v720_v38 = vadd.f32 %v707_v39, %v638_v7 }
  0xad   :  { %1319 = vadd.xlane.f32.xlu0 %v1318_v9  ;;  %v721_v3 = vadd.f32 %v708_v42, %v639_v8  ;;  %v722_v57 = vadd.f32 %v709_v1, %v640_v12  ;;  %v723_v62 = vadd.f32 %v710_v37, %v641_v4  ;;  %v724_v15 = vadd.f32 %v711_v16, %v642_v13 }
  0xae   :  { %v732_v10 = vrot.slane %v5696_v46, %v9009_v59  ;;  %v736_v41 = vrot.slane %v5699_v14, %v9009_v59  ;;  %v740_v24 = vrot.slane %v5702_v32, %v9009_v59  ;;  %v744_v33 = vrot.slane %v5705_v50, %v9009_v59 }
  0xaf   :  { %v748_v29 = vrot.slane %v5708_v23, %v9009_v59  ;;  %v752_v19 = vrot.slane %v5734_v22, %v9009_v59  ;;  %v756_v16 = vrot.slane %v5742_v48, %v9009_v59  ;;  %v760_v52 = vrot.slane %v5745_v25, %v9009_v59 }
  0xb0   :  { %v764_v56 = vrot.slane %v5764_v35, %v9009_v59  ;;  %v768_v26 = vrot.slane %v5767_v45, %v9009_v59  ;;  %v772_v6 = vrot.slane %v5772_v30, %v9009_v59  ;;  %v776_v7 = vrot.slane %v5775_v54, %v9009_v59 }
  0xb1   :  { %v780_v8 = vrot.slane %v5778_v36, %v9009_v59  ;;  %v781_v12 = vmul.f32 %v732_v10, %v5714_v51  ;;  %v782_v4 = vmul.f32 %v736_v41, %v5714_v51  ;;  %v783_v13 = vmul.f32 %v740_v24, %v5714_v51 }
  0xb2   :  { %v784_v31 = vmul.f32 %v744_v33, %v5714_v51  ;;  %v785_v17 = vmul.f32 %v748_v29, %v5714_v51  ;;  %v786_v40 = vmul.f32 %v752_v19, %v5714_v51  ;;  %v787_v49 = vmul.f32 %v756_v16, %v5714_v51 }
  0xb3   :  { %v788_v28 = vmul.f32 %v760_v52, %v5714_v51  ;;  %v789_v11 = vmul.f32 %v764_v56, %v5714_v51  ;;  %v790_v58 = vmul.f32 %v768_v26, %v5714_v51  ;;  %v791_v61 = vmul.f32 %v772_v6, %v5714_v51 }
  0xb4   :  { %v792_v39 = vmul.f32 %v776_v7, %v5714_v51  ;;  %v793_v42 = vmul.f32 %v780_v8, %v5714_v51  ;;  %v794_v1 = vadd.f32 %v781_v12, %v712_v2  ;;  %v795_v37 = vadd.f32 %v782_v4, %v713_v63 }
  0xb5   :  { %v796_v9 = vadd.f32 %v783_v13, %v714_v47  ;;  %v797_v10 = vadd.f32 %v784_v31, %v715_v55  ;;  %v798_v41 = vadd.f32 %v785_v17, %v716_v20  ;;  %v799_v24 = vadd.f32 %v786_v40, %v717_v43 }
  0xb6   :  { %v800_v33 = vadd.f32 %v787_v49, %v718_v60  ;;  %v801_v29 = vadd.f32 %v788_v28, %v719_v0  ;;  %v802_v19 = vadd.f32 %v789_v11, %v720_v38  ;;  %v803_v16 = vadd.f32 %v790_v58, %v721_v3 }
  0xb7   :  { %v804_v52 = vadd.f32 %v791_v61, %v722_v57  ;;  %v805_v56 = vadd.f32 %v792_v39, %v723_v62  ;;  %v806_v34 = vadd.f32 %v793_v42, %v724_v15  ;;  %v814_v26 = vrot.slane %v5696_v46, %v9010_v18 }
  0xb8   :  { %v818_v6 = vrot.slane %v5699_v14, %v9010_v18  ;;  %v822_v51 = vrot.slane %v5702_v32, %v9010_v18  ;;  %v826_v63 = vrot.slane %v5705_v50, %v9010_v18  ;;  %v830_v60 = vrot.slane %v5708_v23, %v9010_v18 }
  0xb9   :  { %v834_v57 = vrot.slane %v5734_v22, %v9010_v18  ;;  %v838_v62 = vrot.slane %v5742_v48, %v9010_v18  ;;  %v842_v38 = vrot.slane %v5745_v25, %v9010_v18  ;;  %v846_v20 = vrot.slane %v5764_v35, %v9010_v18 }
  0xba   :  { %v850_v2 = vrot.slane %v5767_v45, %v9010_v18  ;;  %v854_v47 = vrot.slane %v5772_v30, %v9010_v18  ;;  %v858_v55 = vrot.slane %v5775_v54, %v9010_v18  ;;  %v862_v43 = vrot.slane %v5778_v36, %v9010_v18 }
  0xbb   :  { %v863_v0 = vmul.f32 %v814_v26, %v5736_v44  ;;  %v864_v3 = vmul.f32 %v818_v6, %v5736_v44  ;;  %v865_v15 = vmul.f32 %v822_v51, %v5736_v44  ;;  %v866_v7 = vmul.f32 %v826_v63, %v5736_v44 }
  0xbc   :  { %v867_v8 = vmul.f32 %v830_v60, %v5736_v44  ;;  %v868_v12 = vmul.f32 %v834_v57, %v5736_v44  ;;  %v869_v4 = vmul.f32 %v838_v62, %v5736_v44  ;;  %v870_v13 = vmul.f32 %v842_v38, %v5736_v44 }
  0xbd   :  { %v871_v31 = vmul.f32 %v846_v20, %v5736_v44  ;;  %v872_v17 = vmul.f32 %v850_v2, %v5736_v44  ;;  %v873_v40 = vmul.f32 %v854_v47, %v5736_v44  ;;  %v874_v49 = vmul.f32 %v858_v55, %v5736_v44 }
  0xbe   :  { %v875_v28 = vmul.f32 %v862_v43, %v5736_v44  ;;  %v876_v11 = vadd.f32 %v863_v0, %v794_v1  ;;  %v877_v58 = vadd.f32 %v864_v3, %v795_v37  ;;  %v878_v61 = vadd.f32 %v865_v15, %v796_v9 }
  0xbf   :  { %v879_v39 = vadd.f32 %v866_v7, %v797_v10  ;;  %v880_v42 = vadd.f32 %v867_v8, %v798_v41  ;;  %v881_v26 = vadd.f32 %v868_v12, %v799_v24  ;;  %v882_v6 = vadd.f32 %v869_v4, %v800_v33 }
  0xc0   :  { %v883_v51 = vadd.f32 %v870_v13, %v801_v29  ;;  %v884_v63 = vadd.f32 %v871_v31, %v802_v19  ;;  %v885_v60 = vadd.f32 %v872_v17, %v803_v16  ;;  %v886_v57 = vadd.f32 %v873_v40, %v804_v52 }
  0xc1   :  { %v887_v62 = vadd.f32 %v874_v49, %v805_v56  ;;  %v888_v38 = vadd.f32 %v875_v28, %v806_v34  ;;  %v896_v20 = vrot.slane %v5696_v46, %v9011_v21  ;;  %v900_v2 = vrot.slane %v5699_v14, %v9011_v21 }
  0xc2   :  { %v904_v44 = vrot.slane %v5702_v32, %v9011_v21  ;;  %v908_v1 = vrot.slane %v5705_v50, %v9011_v21  ;;  %v912_v37 = vrot.slane %v5708_v23, %v9011_v21  ;;  %v916_v9 = vrot.slane %v5734_v22, %v9011_v21 }
  0xc3   :  { %v920_v34 = vrot.slane %v5742_v48, %v9011_v21  ;;  %v924_v10 = vrot.slane %v5745_v25, %v9011_v21  ;;  %v928_v41 = vrot.slane %v5764_v35, %v9011_v21  ;;  %v932_v24 = vrot.slane %v5767_v45, %v9011_v21 }
  0xc4   :  { %v936_v33 = vrot.slane %v5772_v30, %v9011_v21  ;;  %v940_v29 = vrot.slane %v5775_v54, %v9011_v21  ;;  %v944_v19 = vrot.slane %v5778_v36, %v9011_v21  ;;  %v945_v16 = vmul.f32 %v896_v20, %v5716_v5 }
  0xc5   :  { %v946_v52 = vmul.f32 %v900_v2, %v5716_v5  ;;  %v947_v56 = vmul.f32 %v904_v44, %v5716_v5  ;;  %v948_v47 = vmul.f32 %v908_v1, %v5716_v5  ;;  %v949_v55 = vmul.f32 %v912_v37, %v5716_v5 }
  0xc6   :  { %v950_v43 = vmul.f32 %v916_v9, %v5716_v5  ;;  %v951_v0 = vmul.f32 %v920_v34, %v5716_v5  ;;  %v952_v3 = vmul.f32 %v924_v10, %v5716_v5  ;;  %v953_v15 = vmul.f32 %v928_v41, %v5716_v5  ;;  %v9018_v10 = vld [vmem:[#allocation5_spill] sm:$0xff] }
  0xc7   :  { %v954_v7 = vmul.f32 %v932_v24, %v5716_v5  ;;  %v955_v8 = vmul.f32 %v936_v33, %v5716_v5  ;;  %v956_v12 = vmul.f32 %v940_v29, %v5716_v5  ;;  %v957_v4 = vmul.f32 %v944_v19, %v5716_v5 }
  0xc8   :  { %v958_v13 = vadd.f32 %v945_v16, %v876_v11  ;;  %v959_v31 = vadd.f32 %v946_v52, %v877_v58  ;;  %v960_v17 = vadd.f32 %v947_v56, %v878_v61  ;;  %v961_v40 = vadd.f32 %v948_v47, %v879_v39 }
  0xc9   :  { %v962_v49 = vadd.f32 %v949_v55, %v880_v42  ;;  %v963_v28 = vadd.f32 %v950_v43, %v881_v26  ;;  %v964_v20 = vadd.f32 %v951_v0, %v882_v6  ;;  %v965_v2 = vadd.f32 %v952_v3, %v883_v51 }
  0xca   :  { %v966_v44 = vadd.f32 %v953_v15, %v884_v63  ;;  %v967_v1 = vadd.f32 %v954_v7, %v885_v60  ;;  %v968_v37 = vadd.f32 %v955_v8, %v886_v57  ;;  %v969_v9 = vadd.f32 %v956_v12, %v887_v62  ;;  %v9019_v57 = vld [vmem:[#allocation3_spill] sm:$0xff] }
  0xcb   :  { %v970_v34 = vadd.f32 %v957_v4, %v888_v38  ;;  %v978_v41 = vrot.slane %v5696_v46, %v9018_v10  ;;  %v982_v24 = vrot.slane %v5699_v14, %v9018_v10  ;;  %v986_v5 = vrot.slane %v5702_v32, %v9018_v10 }
  0xcc   :  { %v990_v11 = vrot.slane %v5705_v50, %v9018_v10  ;;  %v994_v58 = vrot.slane %v5708_v23, %v9018_v10  ;;  %v998_v61 = vrot.slane %v5734_v22, %v9018_v10  ;;  %v1002_v39 = vrot.slane %v5742_v48, %v9018_v10 }
  0xcd   :  { %v1006_v42 = vrot.slane %v5745_v25, %v9018_v10  ;;  %v1010_v26 = vrot.slane %v5764_v35, %v9018_v10  ;;  %v1014_v6 = vrot.slane %v5767_v45, %v9018_v10  ;;  %v1018_v51 = vrot.slane %v5772_v30, %v9018_v10 }
  0xce   :  { %v1022_v63 = vrot.slane %v5775_v54, %v9018_v10  ;;  %v1026_v60 = vrot.slane %v5778_v36, %v9018_v10  ;;  %v1027_v62 = vmul.f32 %v978_v41, %v9019_v57  ;;  %v1028_v38 = vmul.f32 %v982_v24, %v9019_v57 }
  0xcf   :  { %v1029_v33 = vmul.f32 %v986_v5, %v9019_v57  ;;  %v1030_v29 = vmul.f32 %v990_v11, %v9019_v57  ;;  %v1031_v19 = vmul.f32 %v994_v58, %v9019_v57  ;;  %v1032_v16 = vmul.f32 %v998_v61, %v9019_v57 }
  0xd0   :  { %v1033_v52 = vmul.f32 %v1002_v39, %v9019_v57  ;;  %v1034_v56 = vmul.f32 %v1006_v42, %v9019_v57  ;;  %v1035_v47 = vmul.f32 %v1010_v26, %v9019_v57  ;;  %v1036_v55 = vmul.f32 %v1014_v6, %v9019_v57  ;;  %v9020_v26 = vld [vmem:[#allocation7_spill] sm:$0xff] }
  0xd1   :  { %v1037_v43 = vmul.f32 %v1018_v51, %v9019_v57  ;;  %v1038_v0 = vmul.f32 %v1022_v63, %v9019_v57  ;;  %v1039_v3 = vmul.f32 %v1026_v60, %v9019_v57  ;;  %v1040_v15 = vadd.f32 %v1027_v62, %v958_v13 }
  0xd2   :  { %v1041_v7 = vadd.f32 %v1028_v38, %v959_v31  ;;  %v1042_v8 = vadd.f32 %v1029_v33, %v960_v17  ;;  %v1043_v12 = vadd.f32 %v1030_v29, %v961_v40  ;;  %v1044_v4 = vadd.f32 %v1031_v19, %v962_v49 }
  0xd3   :  { %v1045_v41 = vadd.f32 %v1032_v16, %v963_v28  ;;  %v1046_v24 = vadd.f32 %v1033_v52, %v964_v20  ;;  %v1047_v5 = vadd.f32 %v1034_v56, %v965_v2  ;;  %v1048_v11 = vadd.f32 %v1035_v47, %v966_v44 }
  0xd4   :  { %v1049_v58 = vadd.f32 %v1036_v55, %v967_v1  ;;  %v1050_v61 = vadd.f32 %v1037_v43, %v968_v37  ;;  %v1051_v39 = vadd.f32 %v1038_v0, %v969_v9  ;;  %v1052_v42 = vadd.f32 %v1039_v3, %v970_v34  ;;  %v9021_v9 = vld [vmem:[#allocation15_spill] sm:$0xff] }
  0xd5   :  { %v1060_v6 = vrot.slane %v5696_v46, %v9020_v26  ;;  %v1064_v51 = vrot.slane %v5699_v14, %v9020_v26  ;;  %v1068_v13 = vrot.slane %v5702_v32, %v9020_v26  ;;  %v1072_v31 = vrot.slane %v5705_v50, %v9020_v26 }
  0xd6   :  { %v1076_v17 = vrot.slane %v5708_v23, %v9020_v26  ;;  %v1080_v40 = vrot.slane %v5734_v22, %v9020_v26  ;;  %v1084_v49 = vrot.slane %v5742_v48, %v9020_v26  ;;  %v1088_v28 = vrot.slane %v5745_v25, %v9020_v26 }
  0xd7   :  { %v1092_v20 = vrot.slane %v5764_v35, %v9020_v26  ;;  %v1096_v2 = vrot.slane %v5767_v45, %v9020_v26  ;;  %v1100_v44 = vrot.slane %v5772_v30, %v9020_v26  ;;  %v1104_v1 = vrot.slane %v5775_v54, %v9020_v26 }
  0xd8   :  { %v1108_v37 = vrot.slane %v5778_v36, %v9020_v26  ;;  %v1109_v34 = vmul.f32 %v1060_v6, %v9021_v9  ;;  %v1110_v63 = vmul.f32 %v1064_v51, %v9021_v9  ;;  %v1111_v60 = vmul.f32 %v1068_v13, %v9021_v9 }
  0xd9   :  { %v1112_v57 = vmul.f32 %v1072_v31, %v9021_v9  ;;  %v1113_v62 = vmul.f32 %v1076_v17, %v9021_v9  ;;  %v1114_v38 = vmul.f32 %v1080_v40, %v9021_v9  ;;  %v1115_v33 = vmul.f32 %v1084_v49, %v9021_v9 }
  0xda   :  { %v1116_v29 = vmul.f32 %v1088_v28, %v9021_v9  ;;  %v1117_v19 = vmul.f32 %v1092_v20, %v9021_v9  ;;  %v1118_v16 = vmul.f32 %v1096_v2, %v9021_v9  ;;  %v1119_v52 = vmul.f32 %v1100_v44, %v9021_v9  ;;  %v9022_v2 = vld [vmem:[#allocation10_spill] sm:$0xff] }
  0xdb   :  { %v1120_v56 = vmul.f32 %v1104_v1, %v9021_v9  ;;  %v1121_v47 = vmul.f32 %v1108_v37, %v9021_v9  ;;  %v1122_v55 = vadd.f32 %v1109_v34, %v1040_v15  ;;  %v1123_v43 = vadd.f32 %v1110_v63, %v1041_v7 }
  0xdc   :  { %v1124_v0 = vadd.f32 %v1111_v60, %v1042_v8  ;;  %v1125_v3 = vadd.f32 %v1112_v57, %v1043_v12  ;;  %v1126_v6 = vadd.f32 %v1113_v62, %v1044_v4  ;;  %v1127_v51 = vadd.f32 %v1114_v38, %v1045_v41  ;;  %v9023_v41 = vld [vmem:[#allocation14_spill] sm:$0xff] }
  0xdd   :  { %v1128_v13 = vadd.f32 %v1115_v33, %v1046_v24  ;;  %v1129_v31 = vadd.f32 %v1116_v29, %v1047_v5  ;;  %v1130_v17 = vadd.f32 %v1117_v19, %v1048_v11  ;;  %v1131_v40 = vadd.f32 %v1118_v16, %v1049_v58 }
  0xde   :  { %v1132_v49 = vadd.f32 %v1119_v52, %v1050_v61  ;;  %v1133_v28 = vadd.f32 %v1120_v56, %v1051_v39  ;;  %v1134_v20 = vadd.f32 %v1121_v47, %v1052_v42  ;;  %v1142_v44 = vrot.slane %v5696_v46, %v9022_v2  ;;  %v9024_v47 = vld [vmem:[#allocation11_spill] sm:$0xff] }
  0xdf   :  { %v1146_v1 = vrot.slane %v5699_v14, %v9022_v2  ;;  %v1150_v15 = vrot.slane %v5702_v32, %v9022_v2  ;;  %v1154_v7 = vrot.slane %v5705_v50, %v9022_v2  ;;  %v1158_v8 = vrot.slane %v5708_v23, %v9022_v2 }
  0xe0   :  { %v1162_v12 = vrot.slane %v5734_v22, %v9022_v2  ;;  %v1166_v4 = vrot.slane %v5742_v48, %v9022_v2  ;;  %v1170_v46 = vrot.slane %v5745_v25, %v9022_v2  ;;  %v1174_v14 = vrot.slane %v5764_v35, %v9022_v2 }
  0xe1   :  { %v1178_v32 = vrot.slane %v5767_v45, %v9022_v2  ;;  %v1182_v50 = vrot.slane %v5772_v30, %v9022_v2  ;;  %v1186_v23 = vrot.slane %v5775_v54, %v9022_v2  ;;  %v1190_v22 = vrot.slane %v5778_v36, %v9022_v2 }
  0xe2   :  { %v1191_v48 = vmul.f32 %v1142_v44, %v9023_v41  ;;  %v1192_v24 = vmul.f32 %v1146_v1, %v9023_v41  ;;  %v1193_v25 = vmul.f32 %v1150_v15, %v9023_v41  ;;  %v1194_v35 = vmul.f32 %v1154_v7, %v9023_v41 }
  0xe3   :  { %v1195_v5 = vmul.f32 %v1158_v8, %v9023_v41  ;;  %v1196_v45 = vmul.f32 %v1162_v12, %v9023_v41  ;;  %v1197_v30 = vmul.f32 %v1166_v4, %v9023_v41  ;;  %v1198_v11 = vmul.f32 %v1170_v46, %v9023_v41 }
  0xe4   :  { %v1199_v54 = vmul.f32 %v1174_v14, %v9023_v41  ;;  %v1200_v36 = vmul.f32 %v1178_v32, %v9023_v41  ;;  %v1201_v58 = vmul.f32 %v1182_v50, %v9023_v41  ;;  %v1202_v61 = vmul.f32 %v1186_v23, %v9023_v41 }
  0xe5   :  { %v1203_v39 = vmul.f32 %v1190_v22, %v9023_v41  ;;  %v1204_v42 = vadd.f32 %v1191_v48, %v1122_v55  ;;  %v1205_v37 = vadd.f32 %v1192_v24, %v1123_v43  ;;  %v1206_v9 = vadd.f32 %v1193_v25, %v1124_v0  ;;  %v9026_v0 = vld [vmem:[#allocation12_spill] sm:$0xff] }
  0xe6   :  { %v1207_v34 = vadd.f32 %v1194_v35, %v1125_v3  ;;  %v1208_v63 = vadd.f32 %v1195_v5, %v1126_v6  ;;  %v1209_v60 = vadd.f32 %v1196_v45, %v1127_v51  ;;  %v1210_v57 = vadd.f32 %v1197_v30, %v1128_v13  ;;  %v9027_v6 = vld [vmem:[#allocation13_spill] sm:$0xff]  ;;  %v9033_v30 = vld [vmem:[#allocation2_spill] sm:$0xff] }
  0xe7   :  { %v1211_v62 = vadd.f32 %v1198_v11, %v1129_v31  ;;  %v1212_v38 = vadd.f32 %v1199_v54, %v1130_v17  ;;  %v1213_v33 = vadd.f32 %v1200_v36, %v1131_v40  ;;  %v1214_v29 = vadd.f32 %v1201_v58, %v1132_v49  ;;  %v5140_v49 = vld [vmem:[%s8862_s6 + $0x46] ss:$8 sm:$0xf] }
  0xe8   :  { %v1215_v19 = vadd.f32 %v1202_v61, %v1133_v28  ;;  %v1216_v16 = vadd.f32 %v1203_v39, %v1134_v20  ;;  %v6113_v52 = vadd.f32 %v5838_v27, %v1204_v42  ;;  %v6116_v56 = vadd.f32 %v5838_v27, %v1205_v37  ;;  %v5141_v28 = vld [vmem:[%s8862_s6 + $0x46] ss:$8 sm:$0x10]  ;;  %v9035_v42 = vld [vmem:[#allocation4_spill] sm:$0xff] }
  0xe9   :  { %v6120_v55 = vrot.slane %v9024_v47, %v9009_v59  ;;  %v6123_v43 = vadd.f32 %v5838_v27, %v1206_v9  ;;  %v6131_v13 = vrot.slane %v9024_v47, %v9010_v18  ;;  %v6134_v31 = vadd.f32 %v5838_v27, %v1207_v34 }
  0xea   :  { %v1285_v3 = vmul.f32 %v6113_v52, %v9026_v0  ;;  %v1286_v51 = vmul.f32 %v6116_v56, %v9027_v6  ;;  %v6138_v17 = vrot.slane %v9024_v47, %v9011_v21  ;;  %v6141_v40 = vadd.f32 %v5838_v27, %v1208_v63 }
  0xeb   :  { %9025 = vst [vmem:[#allocation3_spill] sm:$0xff] %v6120_v55  ;;  %9028 = vst [vmem:[#allocation15_spill] sm:$0xff] %v6131_v13  ;;  %v1287_v20 = vmul.f32 %v6123_v43, %v6120_v55  ;;  %v6155_v7 = vrot.slane %v9024_v47, %v9018_v10  ;;  %v6158_v8 = vadd.f32 %v5838_v27, %v1209_v60 }
  0xec   :  { %9029 = vst [vmem:[#allocation14_spill] sm:$0xff] %v6138_v17  ;;  %v1298_v44 = vadd.f32 %v1286_v51, %v1285_v3  ;;  %v1322_v1 = vmul.f32 %v1285_v3, %v6113_v52  ;;  %v1323_v15 = vmul.f32 %v1286_v51, %v6116_v56  ;;  %v1288_v12 = vmul.f32 %v6134_v31, %v6131_v13 }
  0xed   :  { %9030 = vst [vmem:[#allocation11_spill] sm:$0xff] %v6155_v7  ;;  %v44_v46 = vor.u32 %v5141_v28, %v5140_v49  ;;  %v6164_v14 = vrot.slane %v9024_v47, %v9020_v26  ;;  %v6167_v32 = vadd.f32 %v5838_v27, %v1210_v57  ;;  %v1289_v50 = vmul.f32 %v6141_v40, %v6138_v17 }
  0xee   :  { %v1299_v4 = vadd.f32 %v1298_v44, %v1287_v20  ;;  %v1324_v22 = vmul.f32 %v1287_v20, %v6123_v43  ;;  %v1335_v41 = vadd.f32 %v1323_v15, %v1322_v1  ;;  %v6174_v48 = vrot.slane %v9024_v47, %v9022_v2 }
  0xef   :  { %9031 = vst [vmem:[#allocation17_spill] sm:$0xff] %v6164_v14  ;;  %v6177_v24 = vadd.f32 %v5838_v27, %v1211_v62  ;;  %v1290_v25 = vmul.f32 %v6158_v8, %v6155_v7  ;;  %v1325_v5 = vmul.f32 %v1288_v12, %v6134_v31  ;;  %v6183_v11 = vrot.slane %v44_v46, %v9033_v30 }
  0xf0   :  { %v1300_v23 = vadd.f32 %v1299_v4, %v1288_v12  ;;  %9032 = vst [vmem:[#allocation18_spill] sm:$0xff] %v6174_v48  ;;  %v1336_v45 = vadd.f32 %v1335_v41, %v1324_v22  ;;  %v6186_v54 = vadd.f32 %v5838_v27, %v1212_v38  ;;  %v1291_v36 = vmul.f32 %v6167_v32, %v6164_v14 }
  0xf1   :  { %9034 = vst [vmem:[#allocation19_spill] sm:$0xff] %v6183_v11  ;;  %v1326_v61 = vmul.f32 %v1289_v50, %v6141_v40  ;;  %v6192_v37 = vrot.slane %v44_v46, %v9035_v42  ;;  %v6195_v9 = vadd.f32 %v5838_v27, %v1213_v33  ;;  %v1292_v34 = vmul.f32 %v6177_v24, %v6174_v48 }
  0xf2   :  { %v1301_v35 = vadd.f32 %v1300_v23, %v1289_v50  ;;  %v1337_v39 = vadd.f32 %v1336_v45, %v1325_v5  ;;  %v1327_v60 = vmul.f32 %v1290_v25, %v6158_v8  ;;  %v6201_v62 = vrot.slane %v44_v46, %v9009_v59 }
  0xf3   :  { %9036 = vst [vmem:[#allocation20_spill] sm:$0xff] %v6192_v37  ;;  %v6204_v38 = vadd.f32 %v5838_v27, %v1214_v29  ;;  %v1293_v47 = vmul.f32 %v6186_v54, %v6183_v11  ;;  %v1328_v33 = vmul.f32 %v1291_v36, %v6167_v32  ;;  %v6210_v49 = vrot.slane %v44_v46, %v9010_v18 }
  0xf4   :  { %v1302_v58 = vadd.f32 %v1301_v35, %v1290_v25  ;;  %v1338_v57 = vadd.f32 %v1337_v39, %v1326_v61  ;;  %9037 = vst [vmem:[#allocation21_spill] sm:$0xff] %v6201_v62  ;;  %v6213_v28 = vrot.slane %v44_v46, %v9011_v21  ;;  %v6216_v20 = vadd.f32 %v5838_v27, %v1215_v19 }
  0xf5   :  { %9038 = vst [vmem:[#allocation22_spill] sm:$0xff] %v6210_v49  ;;  %v6219_v44 = vadd.f32 %v5838_v27, %v1216_v16  ;;  %v1294_v29 = vmul.f32 %v6195_v9, %v6192_v37  ;;  %v1329_v15 = vmul.f32 %v1292_v34, %v6177_v24  ;;  %v1295_v4 = vmul.f32 %v6204_v38, %v6201_v62 }
  0xf6   :  { %v1303_v63 = vadd.f32 %v1302_v58, %v1291_v36  ;;  %v1339_v51 = vadd.f32 %v1338_v57, %v1327_v60  ;;  %9039 = vst [vmem:[#allocation23_spill] sm:$0xff] %v6213_v28  ;;  %v1330_v46 = vmul.f32 %v1293_v47, %v6186_v54  ;;  %v1296_v27 = vmul.f32 %v6216_v20, %v6210_v49 }
  0xf7   :  { %v1297_v19 = vmul.f32 %v6219_v44, %v6213_v28  ;;  %v1331_v22 = vmul.f32 %v1294_v29, %v6195_v9  ;;  %v1332_v35 = vmul.f32 %v1295_v4, %v6204_v38 }
  0xf8   :  { %v1304_v3 = vadd.f32 %v1303_v63, %v1292_v34  ;;  %v1340_v12 = vadd.f32 %v1339_v51, %v1328_v33  ;;  %v1333_v61 = vmul.f32 %v1296_v27, %v6216_v20  ;;  %v1350_v34 = vmul.f32 %v5873_v53, %v5873_v53  ;;  %v6243_v51 = vld [vmem:[%s8859_s1] sm:$0xff] }
  0xf9   :  { %v1310_v45 = vsel %vm1309_vm2, %v1297_v19, 0.0  ;;  %v1334_v36 = vmul.f32 %v1297_v19, %v6219_v44  ;;  %v5300_v33 = vmov 16  }
  0xfa   :  { %v1305_v1 = vadd.f32 %v1304_v3, %v1293_v47  ;;  %v1341_v23 = vadd.f32 %v1340_v12, %v1329_v15  ;;  %v9040_v47 = vld [vmem:[#allocation16_spill] sm:$0xff]  ;;  %5227 = vset.pattern.permute.xlu1 %v5300_v33  ;;  %v5303_v15 = vmov 19   ;;  %v9041_v12 = vmov 0  }
  0xfb   :  { %v1346_v60 = vsel %vm1309_vm2, %v1334_v36, 0.0  ;;  %v1351_v3 = vmul.f32 %v9040_v47, %v1350_v34  ;;  %v5304_v34 = vmov 23   ;;  %v5308_v47 = vmov 28  }
  0xfc   :  { %v1306_v50 = vadd.f32 %v1305_v1, %v1294_v29  ;;  %v1342_v41 = vadd.f32 %v1341_v23, %v1330_v46  ;;  %v5301_v29 = vmov 17   ;;  %v5302_v1 = vmov 18  }
  0xfd   :  { %v5310_v33 = vmov 31  }
  0xfe   :  { %v1307_v16 = vadd.f32 %v1306_v50, %v1295_v4  ;;  %v1343_v5 = vadd.f32 %v1342_v41, %v1331_v22 }
 0x100   :  { %v1308_v25 = vadd.f32 %v1307_v16, %v1296_v27  ;;  %v1344_v39 = vadd.f32 %v1343_v5, %v1332_v35  ;;  %v1359_v5 = vld [vmem:[%s8864_s3] sm:$0xff] }
 0x102   :  { %v1311_v58 = vadd.f32 %v1310_v45, %v1308_v25  ;;  %v1345_v63 = vadd.f32 %v1344_v39, %v1333_v61 }
 0x104   :  { %1312 = vadd.xlane.f32.xlu1 %v1311_v58  ;;  %v1347_v57 = vadd.f32 %v1346_v60, %v1345_v63  ;;  %v1363_v58 = vld [vmem:[%s8865_s4] sm:$0xff]  ;;  %v5305_v63 = vmov 20   ;;  %v5306_v60 = vmov 25  }
 0x106   :  { %1348 = vadd.xlane.f32.xlu0 %v1347_v57  ;;  %v5307_v57 = vmov 21  }
 0x108   :  { %1352 = vadd.xlane.f32.xlu1 %v1351_v3  ;;  %v5309_v3 = vmov 22  }
 0x119   :  { %1405 = vperm.xlu1 %5227, %v6243_v51  }
 0x11d   :  { %5228 = vset.pattern.permute.xlu1 %v5301_v29  ;;  %v9042_v29 = vmov 2  }
 0x11e   :  { %1474 = vperm.xlu1 %5228, %v6243_v51  }
 0x122   :  { %5229 = vset.pattern.permute.xlu1 %v5302_v1  ;;  %v5282_v1 = vld [vmem:[%s8860_s2] sm:$0xff] }
 0x123   :  { %1556 = vperm.xlu1 %5229, %v6243_v51  }
 0x127   :  { %5230 = vset.pattern.permute.xlu1 %v5303_v15  ;;  %v9043_v15 = vmov 1  }
 0x128   :  { %1638 = vperm.xlu1 %5230, %v6243_v51  }
 0x12c   :  { %5231 = vset.pattern.permute.xlu1 %v9041_v12 }
 0x13a   :  { %v1320_v4 = vpop.xlane.xlu0 %1319 }
 0x191   :  { %v1313_v50 = vpop.xlane.xlu1 %1312 }
 0x192   :  { %v1321_v46 = vadd.f32 %v1320_v4, %v1313_v50  ;;  %v5311_v4 = vmov 24   ;;  %v5312_v50 = vmov 26  }
 0x193   :  { %v1349_v19 = vpop.xlane.xlu0 %1348 }
 0x194   :  { %v1355_v23 = vmul.f32 0.00125, %v1321_v46  ;;  %v5313_v46 = vmov 27  }
 0x195   :  { %v1353_v27 = vpop.xlane.xlu1 %1352 }
 0x196   :  { %v1354_v16 = vadd.f32 %v1353_v27, %v1349_v19  ;;  %v1357_v22 = vmul.f32 %v1355_v23, %v1355_v23  ;;  %v5315_v19 = vmov 30   ;;  %v8900_v27 = vmov 3  }
 0x198   :  { %v1356_v41 = vmul.f32 0.00125, %v1354_v16 }
 0x199   :  { %v6274_v16 = vpop.permute.xlu1 %1405 }
 0x19a   :  { %v1358_v25 = vsub.f32 %v1356_v41, %v1357_v22  ;;  %9044 = vst [vmem:[#allocation16_spill] sm:$0xff] %v6274_v16 }
 0x19c   :  { %v1360_v35 = vadd.f32 1e-05, %v1358_v25 }
 0x19d   :  { %v6276_v22 = vpop.permute.xlu1 %1474 }
 0x19e   :  { %5275 = vrsqrt.f32 %v1360_v35 }
 0x1a2   :  { %v6278_v41 = vpop.permute.xlu1 %1556 }
 0x1a7   :  { %v6280_v25 = vpop.permute.xlu1 %1638 }
 0x1a8   :  { %v5276_v45 = vpop.eup %5275  ;;  %9045 = vst [vmem:[#allocation24_spill] sm:$0xff] %v6280_v25 }
 0x1a9   :  { %v1362_v36 = vmul.f32 %v5276_v45, %v1359_v5 }
 0x1ab   :  { %1368 = vperm.xlu0 %5226, %v1362_v36   ;;  %v1364_v61 = vmul.f32 %v1362_v36, %v1355_v23  ;;  %v5314_v23 = vmov 29  }
 0x1ad   :  { %v1365_v39 = vsub.f32 %v1363_v58, %v1364_v61 }
 0x1af   :  { %1386 = vperm.xlu1 %5231, %v1365_v39   ;;  %5235 = vset.pattern.permute.xlu0 %v5304_v34 }
 0x1b0   :  { %1966 = vperm.xlu0 %5235, %v6243_v51  }
 0x1b3   :  { %5232 = vset.pattern.permute.xlu1 %v5305_v63 }
 0x1b4   :  { %1720 = vperm.xlu1 %5232, %v6243_v51   ;;  %5238 = vset.pattern.permute.xlu0 %v5306_v60 }
 0x1b5   :  { %2184 = vperm.xlu0 %5238, %v6243_v51  }
 0x1b8   :  { %5233 = vset.pattern.permute.xlu1 %v5307_v57 }
 0x1b9   :  { %1802 = vperm.xlu1 %5233, %v6243_v51   ;;  %5241 = vset.pattern.permute.xlu0 %v5308_v47 }
 0x1ba   :  { %2430 = vperm.xlu0 %5241, %v6243_v51  }
 0x1bd   :  { %5234 = vset.pattern.permute.xlu1 %v5309_v3 }
 0x1be   :  { %1884 = vperm.xlu1 %5234, %v6243_v51   ;;  %5244 = vset.pattern.permute.xlu0 %v5310_v33 }
 0x1bf   :  { %2676 = vperm.xlu0 %5244, %v6243_v51  }
 0x1c2   :  { %5236 = vset.pattern.permute.xlu1 %v9042_v29 }
 0x1c3   :  { %2048 = vperm.xlu1 %5236, %v5282_v1   ;;  %5246 = vset.pattern.permute.xlu0 %v9043_v15 }
 0x1c7   :  { %5237 = vset.pattern.permute.xlu1 %v5311_v4 }
 0x1c8   :  { %2115 = vperm.xlu1 %5237, %v6243_v51  }
 0x1cc   :  { %5239 = vset.pattern.permute.xlu1 %v5312_v50 }
 0x1cd   :  { %2266 = vperm.xlu1 %5239, %v6243_v51  }
 0x1d1   :  { %5240 = vset.pattern.permute.xlu1 %v5313_v46 }
 0x1d2   :  { %2348 = vperm.xlu1 %5240, %v6243_v51  }
 0x1d6   :  { %5242 = vset.pattern.permute.xlu1 %v5314_v23 }
 0x1d7   :  { %2512 = vperm.xlu1 %5242, %v6243_v51  }
 0x1db   :  { %5243 = vset.pattern.permute.xlu1 %v5315_v19 }
 0x1dc   :  { %2594 = vperm.xlu1 %5243, %v6243_v51  }
 0x1e0   :  { %5245 = vset.pattern.permute.xlu1 %v8900_v27 }
 0x1e1   :  { %2758 = vperm.xlu1 %5245, %v5282_v1  }
 0x22a   :  { %v1369_v35 = vpop.permute.xlu0 %1368 }
 0x22b   :  { %v1371_v5 = vmul.f32 %v1369_v35, %v6113_v52  ;;  %v1372_v45 = vmul.f32 %v1369_v35, %v6116_v56  ;;  %v1373_v36 = vmul.f32 %v1369_v35, %v6123_v43  ;;  %v1374_v51 = vmul.f32 %v1369_v35, %v6134_v31 }
 0x22c   :  { %v1375_v58 = vmul.f32 %v1369_v35, %v6141_v40  ;;  %v1376_v61 = vmul.f32 %v1369_v35, %v6158_v8  ;;  %v1377_v39 = vmul.f32 %v1369_v35, %v6167_v32  ;;  %v1378_v34 = vmul.f32 %v1369_v35, %v6177_v24 }
 0x22d   :  { %v1379_v63 = vmul.f32 %v1369_v35, %v6186_v54  ;;  %v1380_v60 = vmul.f32 %v1369_v35, %v6195_v9  ;;  %v1381_v52 = vmul.f32 %v1369_v35, %v6204_v38  ;;  %v1382_v56 = vmul.f32 %v1369_v35, %v6216_v20 }
 0x22e   :  { %v1383_v43 = vmul.f32 %v1369_v35, %v6219_v44  ;;  %v1387_v57 = vpop.permute.xlu1 %1386  ;;  %v1402_v33 = vmul.f32 %v1369_v35, %v5873_v53 }
 0x22f   :  { %v6295_v31 = vadd.f32 %v1387_v57, %v1371_v5  ;;  %v6297_v40 = vadd.f32 %v1387_v57, %v1372_v45  ;;  %v6299_v8 = vadd.f32 %v1387_v57, %v1373_v36  ;;  %v6301_v32 = vadd.f32 %v1387_v57, %v1374_v51  ;;  %v6322_v4 = vpop.permute.xlu0 %1966 }
 0x230   :  { %v6303_v24 = vadd.f32 %v1387_v57, %v1375_v58  ;;  %v6305_v54 = vadd.f32 %v1387_v57, %v1376_v61  ;;  %v6307_v9 = vadd.f32 %v1387_v57, %v1377_v39  ;;  %v6309_v38 = vadd.f32 %v1387_v57, %v1378_v34  ;;  %9047 = vst [vmem:[#allocation26_spill] sm:$0xff] %v6322_v4 }
 0x231   :  { %v6311_v20 = vadd.f32 %v1387_v57, %v1379_v63  ;;  %v6313_v44 = vadd.f32 %v1387_v57, %v1380_v60  ;;  %v6315_v47 = vadd.f32 %v1387_v57, %v1381_v52  ;;  %v6317_v3 = vadd.f32 %v1387_v57, %v1382_v56 }
 0x232   :  { %v6320_v1 = vadd.f32 %v1387_v57, %v1383_v43  ;;  %v1972_v50 = vrot.slane %v6295_v31, %v9022_v2  ;;  %v1976_v46 = vrot.slane %v6297_v40, %v9022_v2  ;;  %v1980_v23 = vrot.slane %v6299_v8, %v9022_v2 }
 0x233   :  { %v1984_v19 = vrot.slane %v6301_v32, %v9022_v2  ;;  %v1988_v5 = vrot.slane %v6303_v24, %v9022_v2  ;;  %v1992_v53 = vrot.slane %v6305_v54, %v9022_v2  ;;  %v6336_v35 = vadd.f32 %v1402_v33, %v1387_v57 }
 0x234   :  { %9046 = vst [vmem:[#allocation25_spill] sm:$0xff] %v6320_v1  ;;  %v1996_v45 = vrot.slane %v6307_v9, %v9022_v2  ;;  %v6347_v61 = vmul.f32 %v1972_v50, %v6322_v4  ;;  %v6350_v39 = vmul.f32 %v1976_v46, %v6322_v4  ;;  %v6353_v34 = vmul.f32 %v1980_v23, %v6322_v4 }
 0x235   :  { %9048 = vst [vmem:[#allocation27_spill] sm:$0xff] %v6336_v35  ;;  %v6356_v63 = vmul.f32 %v1984_v19, %v6322_v4  ;;  %v6359_v60 = vmul.f32 %v1988_v5, %v6322_v4  ;;  %v6362_v52 = vmul.f32 %v1992_v53, %v6322_v4  ;;  %v1411_v43 = vrot.slane %v6295_v31, %v9033_v30 }
 0x236   :  { %v6365_v56 = vmul.f32 %v1996_v45, %v6322_v4  ;;  %v1415_v57 = vrot.slane %v6297_v40, %v9033_v30  ;;  %v1419_v33 = vrot.slane %v6299_v8, %v9033_v30  ;;  %v1423_v50 = vrot.slane %v6301_v32, %v9033_v30 }
 0x237   :  { %9049 = vst [vmem:[#allocation28_spill] sm:$0xff] %v6362_v52  ;;  %v1427_v46 = vrot.slane %v6303_v24, %v9033_v30  ;;  %v1431_v23 = vrot.slane %v6305_v54, %v9033_v30  ;;  %v1435_v19 = vrot.slane %v6307_v9, %v9033_v30  ;;  %v1439_v5 = vrot.slane %v6309_v38, %v9033_v30 }
 0x238   :  { %9050 = vst [vmem:[#allocation29_spill] sm:$0xff] %v6365_v56  ;;  %v1443_v53 = vrot.slane %v6311_v20, %v9033_v30  ;;  %v1447_v45 = vrot.slane %v6313_v44, %v9033_v30  ;;  %v1451_v27 = vrot.slane %v6315_v47, %v9033_v30  ;;  %v1460_v58 = vmul.f32 %v1411_v43, %v6274_v16 }
 0x239   :  { %v1461_v51 = vmul.f32 %v1415_v57, %v6274_v16  ;;  %v1462_v36 = vmul.f32 %v1419_v33, %v6274_v16  ;;  %v1463_v12 = vmul.f32 %v1423_v50, %v6274_v16  ;;  %v1464_v29 = vmul.f32 %v1427_v46, %v6274_v16 }
 0x23a   :  { %v1465_v15 = vmul.f32 %v1431_v23, %v6274_v16  ;;  %v1466_v49 = vmul.f32 %v1435_v19, %v6274_v16  ;;  %v1467_v28 = vmul.f32 %v1439_v5, %v6274_v16  ;;  %v1468_v62 = vmul.f32 %v1443_v53, %v6274_v16 }
 0x23b   :  { %v1469_v37 = vmul.f32 %v1447_v45, %v6274_v16  ;;  %v1470_v43 = vmul.f32 %v1451_v27, %v6274_v16  ;;  %v1480_v57 = vrot.slane %v6295_v31, %v9035_v42  ;;  %v1484_v33 = vrot.slane %v6297_v40, %v9035_v42 }
 0x23c   :  { %v1488_v50 = vrot.slane %v6299_v8, %v9035_v42  ;;  %v1492_v46 = vrot.slane %v6301_v32, %v9035_v42  ;;  %v1496_v23 = vrot.slane %v6303_v24, %v9035_v42  ;;  %v1500_v19 = vrot.slane %v6305_v54, %v9035_v42 }
 0x23d   :  { %v1504_v27 = vrot.slane %v6307_v9, %v9035_v42  ;;  %v1508_v5 = vrot.slane %v6309_v38, %v9035_v42  ;;  %v1512_v53 = vrot.slane %v6311_v20, %v9035_v42  ;;  %v1516_v45 = vrot.slane %v6313_v44, %v9035_v42 }
 0x23e   :  { %v1520_v11 = vrot.slane %v6315_v47, %v9035_v42  ;;  %v1529_v48 = vmul.f32 %v1480_v57, %v6276_v22  ;;  %v1530_v14 = vmul.f32 %v1484_v33, %v6276_v22  ;;  %v1531_v7 = vmul.f32 %v1488_v50, %v6276_v22 }
 0x23f   :  { %v1532_v17 = vmul.f32 %v1492_v46, %v6276_v22  ;;  %v1533_v13 = vmul.f32 %v1496_v23, %v6276_v22  ;;  %v1534_v55 = vmul.f32 %v1500_v19, %v6276_v22  ;;  %v1535_v6 = vmul.f32 %v1504_v27, %v6276_v22 }
 0x240   :  { %v1536_v0 = vmul.f32 %v1508_v5, %v6276_v22  ;;  %v1537_v16 = vmul.f32 %v1512_v53, %v6276_v22  ;;  %v1538_v42 = vmul.f32 %v1516_v45, %v6276_v22  ;;  %v1539_v57 = vmul.f32 %v1520_v11, %v6276_v22 }
 0x241   :  { %v1542_v35 = vadd.f32 %v1529_v48, %v1460_v58  ;;  %v1543_v33 = vadd.f32 %v1530_v14, %v1461_v51  ;;  %v1544_v30 = vadd.f32 %v1531_v7, %v1462_v36  ;;  %v1545_v50 = vadd.f32 %v1532_v17, %v1463_v12 }
 0x242   :  { %v1546_v2 = vadd.f32 %v1533_v13, %v1464_v29  ;;  %v1547_v46 = vadd.f32 %v1534_v55, %v1465_v15  ;;  %v1548_v4 = vadd.f32 %v1535_v6, %v1466_v49  ;;  %v1549_v23 = vadd.f32 %v1536_v0, %v1467_v28 }
 0x243   :  { %v1550_v56 = vadd.f32 %v1537_v16, %v1468_v62  ;;  %v1551_v19 = vadd.f32 %v1538_v42, %v1469_v37  ;;  %v1552_v52 = vadd.f32 %v1539_v57, %v1470_v43  ;;  %v1562_v27 = vrot.slane %v6295_v31, %v9009_v59 }
 0x244   :  { %v1566_v5 = vrot.slane %v6297_v40, %v9009_v59  ;;  %v1570_v11 = vrot.slane %v6299_v8, %v9009_v59  ;;  %v1574_v7 = vrot.slane %v6301_v32, %v9009_v59  ;;  %v1578_v55 = vrot.slane %v6303_v24, %v9009_v59 }
 0x245   :  { %v1582_v0 = vrot.slane %v6305_v54, %v9009_v59  ;;  %v1586_v6 = vrot.slane %v6307_v9, %v9009_v59  ;;  %v1590_v13 = vrot.slane %v6309_v38, %v9009_v59  ;;  %v1594_v17 = vrot.slane %v6311_v20, %v9009_v59 }
 0x246   :  { %v1598_v14 = vrot.slane %v6313_v44, %v9009_v59  ;;  %v1602_v48 = vrot.slane %v6315_v47, %v9009_v59  ;;  %v1611_v42 = vmul.f32 %v1562_v27, %v6278_v41  ;;  %v1612_v37 = vmul.f32 %v1566_v5, %v6278_v41 }
 0x247   :  { %v1613_v62 = vmul.f32 %v1570_v11, %v6278_v41  ;;  %v1614_v49 = vmul.f32 %v1574_v7, %v6278_v41  ;;  %v1615_v28 = vmul.f32 %v1578_v55, %v6278_v41  ;;  %v1616_v12 = vmul.f32 %v1582_v0, %v6278_v41 }
 0x248   :  { %v1617_v29 = vmul.f32 %v1586_v6, %v6278_v41  ;;  %v1618_v15 = vmul.f32 %v1590_v13, %v6278_v41  ;;  %v1619_v16 = vmul.f32 %v1594_v17, %v6278_v41  ;;  %v1620_v36 = vmul.f32 %v1598_v14, %v6278_v41 }
 0x249   :  { %v1621_v51 = vmul.f32 %v1602_v48, %v6278_v41  ;;  %v1624_v58 = vadd.f32 %v1611_v42, %v1542_v35  ;;  %v1625_v43 = vadd.f32 %v1612_v37, %v1543_v33  ;;  %v1626_v53 = vadd.f32 %v1613_v62, %v1544_v30 }
 0x24a   :  { %v1627_v45 = vadd.f32 %v1614_v49, %v1545_v50  ;;  %v1628_v57 = vadd.f32 %v1615_v28, %v1546_v2  ;;  %v1629_v27 = vadd.f32 %v1616_v12, %v1547_v46  ;;  %v1630_v5 = vadd.f32 %v1617_v29, %v1548_v4 }
 0x24b   :  { %v1631_v11 = vadd.f32 %v1618_v15, %v1549_v23  ;;  %v1632_v7 = vadd.f32 %v1619_v16, %v1550_v56  ;;  %v1633_v55 = vadd.f32 %v1620_v36, %v1551_v19  ;;  %v1634_v0 = vadd.f32 %v1621_v51, %v1552_v52 }
 0x24c   :  { %v1644_v6 = vrot.slane %v6295_v31, %v9010_v18  ;;  %v1648_v13 = vrot.slane %v6297_v40, %v9010_v18  ;;  %v1652_v17 = vrot.slane %v6299_v8, %v9010_v18  ;;  %v1656_v30 = vrot.slane %v6301_v32, %v9010_v18 }
 0x24d   :  { %v1660_v2 = vrot.slane %v6303_v24, %v9010_v18  ;;  %v1664_v4 = vrot.slane %v6305_v54, %v9010_v18  ;;  %v1668_v35 = vrot.slane %v6307_v9, %v9010_v18  ;;  %v1672_v52 = vrot.slane %v6309_v38, %v9010_v18 }
 0x24e   :  { %v1676_v56 = vrot.slane %v6311_v20, %v9010_v18  ;;  %v1680_v33 = vrot.slane %v6313_v44, %v9010_v18  ;;  %v1684_v50 = vrot.slane %v6315_v47, %v9010_v18  ;;  %v1693_v46 = vmul.f32 %v1644_v6, %v6280_v25 }
 0x24f   :  { %v1694_v23 = vmul.f32 %v1648_v13, %v6280_v25  ;;  %v1695_v19 = vmul.f32 %v1652_v17, %v6280_v25  ;;  %v1696_v14 = vmul.f32 %v1656_v30, %v6280_v25  ;;  %v1697_v48 = vmul.f32 %v1660_v2, %v6280_v25 }
 0x250   :  { %v1698_v42 = vmul.f32 %v1664_v4, %v6280_v25  ;;  %v1699_v37 = vmul.f32 %v1668_v35, %v6280_v25  ;;  %v1700_v62 = vmul.f32 %v1672_v52, %v6280_v25  ;;  %v1701_v49 = vmul.f32 %v1676_v56, %v6280_v25 }
 0x251   :  { %v1702_v28 = vmul.f32 %v1680_v33, %v6280_v25  ;;  %v1703_v12 = vmul.f32 %v1684_v50, %v6280_v25  ;;  %v1706_v29 = vadd.f32 %v1693_v46, %v1624_v58  ;;  %v1707_v15 = vadd.f32 %v1694_v23, %v1625_v43 }
 0x252   :  { %v1708_v16 = vadd.f32 %v1695_v19, %v1626_v53  ;;  %v1709_v36 = vadd.f32 %v1696_v14, %v1627_v45  ;;  %v1710_v51 = vadd.f32 %v1697_v48, %v1628_v57  ;;  %v1711_v6 = vadd.f32 %v1698_v42, %v1629_v27  ;;  %v6509_v53 = vpop.permute.xlu1 %1720 }
 0x253   :  { %v1712_v13 = vadd.f32 %v1699_v37, %v1630_v5  ;;  %v1713_v17 = vadd.f32 %v1700_v62, %v1631_v11  ;;  %v1714_v30 = vadd.f32 %v1701_v49, %v1632_v7  ;;  %v1715_v2 = vadd.f32 %v1702_v28, %v1633_v55 }
 0x254   :  { %v1716_v4 = vadd.f32 %v1703_v12, %v1634_v0  ;;  %v1726_v35 = vrot.slane %v6295_v31, %v9011_v21  ;;  %v1730_v52 = vrot.slane %v6297_v40, %v9011_v21  ;;  %v1734_v56 = vrot.slane %v6299_v8, %v9011_v21 }
 0x255   :  { %v1738_v58 = vrot.slane %v6301_v32, %v9011_v21  ;;  %v1742_v43 = vrot.slane %v6303_v24, %v9011_v21  ;;  %v1746_v45 = vrot.slane %v6305_v54, %v9011_v21  ;;  %v1750_v57 = vrot.slane %v6307_v9, %v9011_v21 }
 0x256   :  { %v1754_v27 = vrot.slane %v6309_v38, %v9011_v21  ;;  %v1758_v5 = vrot.slane %v6311_v20, %v9011_v21  ;;  %v1762_v11 = vrot.slane %v6313_v44, %v9011_v21  ;;  %v1766_v7 = vrot.slane %v6315_v47, %v9011_v21 }
 0x257   :  { %v1770_v55 = vrot.slane %v6317_v3, %v9011_v21  ;;  %v1774_v0 = vrot.slane %v6320_v1, %v9011_v21  ;;  %v1775_v33 = vmul.f32 %v1726_v35, %v6509_v53  ;;  %v1776_v50 = vmul.f32 %v1730_v52, %v6509_v53 }
 0x258   :  { %v1777_v46 = vmul.f32 %v1734_v56, %v6509_v53  ;;  %v1778_v23 = vmul.f32 %v1738_v58, %v6509_v53  ;;  %v1779_v19 = vmul.f32 %v1742_v43, %v6509_v53  ;;  %v1780_v14 = vmul.f32 %v1746_v45, %v6509_v53 }
 0x259   :  { %v1781_v48 = vmul.f32 %v1750_v57, %v6509_v53  ;;  %v1782_v42 = vmul.f32 %v1754_v27, %v6509_v53  ;;  %v1783_v37 = vmul.f32 %v1758_v5, %v6509_v53  ;;  %v1784_v62 = vmul.f32 %v1762_v11, %v6509_v53 }
 0x25a   :  { %v1785_v49 = vmul.f32 %v1766_v7, %v6509_v53  ;;  %v6539_v28 = vmul.f32 %v1770_v55, %v6509_v53  ;;  %v6542_v12 = vmul.f32 %v1774_v0, %v6509_v53  ;;  %v1788_v35 = vadd.f32 %v1775_v33, %v1706_v29 }
 0x25b   :  { %v1789_v52 = vadd.f32 %v1776_v50, %v1707_v15  ;;  %v1790_v56 = vadd.f32 %v1777_v46, %v1708_v16  ;;  %v1791_v58 = vadd.f32 %v1778_v23, %v1709_v36  ;;  %v1792_v43 = vadd.f32 %v1779_v19, %v1710_v51  ;;  %v6554_v16 = vpop.permute.xlu1 %1802 }
 0x25c   :  { %9051 = vst [vmem:[#allocation30_spill] sm:$0xff] %v6542_v12  ;;  %v1793_v45 = vadd.f32 %v1780_v14, %v1711_v6  ;;  %v1794_v57 = vadd.f32 %v1781_v48, %v1712_v13  ;;  %v1795_v27 = vadd.f32 %v1782_v42, %v1713_v17  ;;  %v1796_v1 = vadd.f32 %v1783_v37, %v1714_v30 }
 0x25d   :  { %v1797_v5 = vadd.f32 %v1784_v62, %v1715_v2  ;;  %v6544_v25 = vadd.f32 %v1785_v49, %v1716_v4  ;;  %v1808_v11 = vrot.slane %v6295_v31, %v9018_v10  ;;  %v1812_v7 = vrot.slane %v6297_v40, %v9018_v10 }
 0x25e   :  { %v1816_v29 = vrot.slane %v6299_v8, %v9018_v10  ;;  %v1820_v15 = vrot.slane %v6301_v32, %v9018_v10  ;;  %v1824_v36 = vrot.slane %v6303_v24, %v9018_v10  ;;  %v1828_v51 = vrot.slane %v6305_v54, %v9018_v10 }
 0x25f   :  { %v1832_v6 = vrot.slane %v6307_v9, %v9018_v10  ;;  %v1836_v13 = vrot.slane %v6309_v38, %v9018_v10  ;;  %v1840_v17 = vrot.slane %v6311_v20, %v9018_v10  ;;  %v1844_v30 = vrot.slane %v6313_v44, %v9018_v10 }
 0x260   :  { %v1848_v2 = vrot.slane %v6315_v47, %v9018_v10  ;;  %v1852_v4 = vrot.slane %v6317_v3, %v9018_v10  ;;  %v1857_v55 = vmul.f32 %v1808_v11, %v6554_v16  ;;  %v1858_v0 = vmul.f32 %v1812_v7, %v6554_v16 }
 0x261   :  { %v1859_v33 = vmul.f32 %v1816_v29, %v6554_v16  ;;  %v1860_v50 = vmul.f32 %v1820_v15, %v6554_v16  ;;  %v1861_v46 = vmul.f32 %v1824_v36, %v6554_v16  ;;  %v1862_v23 = vmul.f32 %v1828_v51, %v6554_v16 }
 0x262   :  { %v1863_v19 = vmul.f32 %v1832_v6, %v6554_v16  ;;  %v1864_v14 = vmul.f32 %v1836_v13, %v6554_v16  ;;  %v1865_v48 = vmul.f32 %v1840_v17, %v6554_v16  ;;  %v1866_v42 = vmul.f32 %v1844_v30, %v6554_v16 }
 0x263   :  { %v6583_v37 = vmul.f32 %v1848_v2, %v6554_v16  ;;  %v6586_v62 = vmul.f32 %v1852_v4, %v6554_v16  ;;  %v1870_v49 = vadd.f32 %v1857_v55, %v1788_v35  ;;  %v1871_v11 = vadd.f32 %v1858_v0, %v1789_v52  ;;  %v6594_v2 = vpop.permute.xlu1 %1884 }
 0x264   :  { %v1872_v7 = vadd.f32 %v1859_v33, %v1790_v56  ;;  %v1873_v29 = vadd.f32 %v1860_v50, %v1791_v58  ;;  %v1874_v15 = vadd.f32 %v1861_v46, %v1792_v43  ;;  %v1875_v36 = vadd.f32 %v1862_v23, %v1793_v45 }
 0x265   :  { %v1876_v51 = vadd.f32 %v1863_v19, %v1794_v57  ;;  %v1877_v6 = vadd.f32 %v1864_v14, %v1795_v27  ;;  %v1878_v12 = vadd.f32 %v1865_v48, %v1796_v1  ;;  %v6588_v13 = vadd.f32 %v1866_v42, %v1797_v5 }
 0x266   :  { %v1890_v17 = vrot.slane %v6295_v31, %v9020_v26  ;;  %v1894_v30 = vrot.slane %v6297_v40, %v9020_v26  ;;  %v1898_v35 = vrot.slane %v6299_v8, %v9020_v26  ;;  %v1902_v52 = vrot.slane %v6301_v32, %v9020_v26 }
 0x267   :  { %v1906_v56 = vrot.slane %v6303_v24, %v9020_v26  ;;  %v1910_v1 = vrot.slane %v6305_v54, %v9020_v26  ;;  %v1914_v31 = vrot.slane %v6307_v9, %v9020_v26  ;;  %v1918_v40 = vrot.slane %v6309_v38, %v9020_v26 }
 0x268   :  { %v1922_v58 = vrot.slane %v6311_v20, %v9020_v26  ;;  %v1926_v8 = vrot.slane %v6313_v44, %v9020_v26  ;;  %v1930_v32 = vrot.slane %v6315_v47, %v9020_v26  ;;  %v1939_v24 = vmul.f32 %v1890_v17, %v6594_v2 }
 0x269   :  { %v1940_v43 = vmul.f32 %v1894_v30, %v6594_v2  ;;  %v1941_v54 = vmul.f32 %v1898_v35, %v6594_v2  ;;  %v1942_v9 = vmul.f32 %v1902_v52, %v6594_v2  ;;  %v1943_v45 = vmul.f32 %v1906_v56, %v6594_v2  ;;  %v9058_v56 = vld [vmem:[#allocation27_spill] sm:$0xff] }
 0x26a   :  { %v1944_v57 = vmul.f32 %v1910_v1, %v6594_v2  ;;  %v1945_v27 = vmul.f32 %v1914_v31, %v6594_v2  ;;  %v1946_v5 = vmul.f32 %v1918_v40, %v6594_v2  ;;  %v1947_v4 = vmul.f32 %v1922_v58, %v6594_v2  ;;  %v9060_v31 = vld [vmem:[#allocation4_spill] sm:$0xff] }
 0x26b   :  { %v6624_v55 = vmul.f32 %v1926_v8, %v6594_v2  ;;  %v6627_v0 = vmul.f32 %v1930_v32, %v6594_v2  ;;  %v1952_v33 = vadd.f32 %v1939_v24, %v1870_v49  ;;  %v1953_v50 = vadd.f32 %v1940_v43, %v1871_v11  ;;  %v9062_v24 = vld [vmem:[#allocation16_spill] sm:$0xff] }
 0x26c   :  { %v1954_v46 = vadd.f32 %v1941_v54, %v1872_v7  ;;  %v1955_v23 = vadd.f32 %v1942_v9, %v1873_v29  ;;  %v1956_v19 = vadd.f32 %v1943_v45, %v1874_v15  ;;  %v1957_v14 = vadd.f32 %v1944_v57, %v1875_v36  ;;  %v9052_v7 = vld [vmem:[#allocation28_spill] sm:$0xff]  ;;  %v9054_v36 = vld [vmem:[#allocation26_spill] sm:$0xff] }
 0x26d   :  { %v1958_v48 = vadd.f32 %v1945_v27, %v1876_v51  ;;  %v6629_v42 = vadd.f32 %v1946_v5, %v1877_v6  ;;  %v6631_v17 = vadd.f32 %v1947_v4, %v1878_v12  ;;  %v6634_v30 = vadd.f32 %v6347_v61, %v1952_v33  ;;  %v9053_v12 = vld [vmem:[#allocation29_spill] sm:$0xff]  ;;  %v6654_v61 = vpop.permute.xlu1 %2048  ;;  %v9057_v6 = vld [vmem:[#allocation2_spill] sm:$0xff]  ;;  %v9063_v57 = vld [vmem:[#allocation24_spill] sm:$0xff] }
 0x26e   :  { %v6637_v35 = vadd.f32 %v6350_v39, %v1953_v50  ;;  %v6640_v52 = vadd.f32 %v6353_v34, %v1954_v46  ;;  %v6643_v49 = vadd.f32 %v6356_v63, %v1955_v23  ;;  %v6646_v11 = vadd.f32 %v6359_v60, %v1956_v19  ;;  %v9055_v39 = vld [vmem:[#allocation10_spill] sm:$0xff] }
 0x26f   :  { %v6649_v29 = vadd.f32 %v9052_v7, %v1957_v14  ;;  %v6652_v15 = vadd.f32 %v9053_v12, %v1958_v48  ;;  %v9056_v51 = vrot.slane %v6309_v38, %v9055_v39  ;;  %v2067_v63 = vrot.slane %v9058_v56, %v9057_v6  ;;  %v9064_v14 = vld [vmem:[#allocation25_spill] sm:$0xff] }
 0x270   :  { %v9059_v60 = vrot.slane %v6311_v20, %v9055_v39  ;;  %v2072_v40 = vrot.slane %v9058_v56, %v9060_v31  ;;  %v2078_v58 = vrot.slane %v9058_v56, %v9009_v59  ;;  %v2084_v8 = vrot.slane %v9058_v56, %v9010_v18 }
 0x271   :  { %v2028_v34 = vmul.f32 %v9056_v51, %v9054_v36  ;;  %v9061_v38 = vrot.slane %v6313_v44, %v9055_v39  ;;  %v2068_v43 = vmul.f32 %v2067_v63, %v9062_v24  ;;  %v2090_v20 = vrot.slane %v9058_v56, %v9011_v21  ;;  %v6692_v46 = vpop.permute.xlu1 %2115 }
 0x272   :  { %v2029_v1 = vmul.f32 %v9059_v60, %v9054_v36  ;;  %v2096_v54 = vrot.slane %v9058_v56, %v9018_v10  ;;  %v2073_v9 = vmul.f32 %v2072_v40, %v6276_v22  ;;  %v2079_v45 = vmul.f32 %v2078_v58, %v6278_v41 }
 0x273   :  { %v2030_v32 = vmul.f32 %v9061_v38, %v9054_v36  ;;  %v2085_v27 = vmul.f32 %v2084_v8, %v9063_v57  ;;  %v2102_v5 = vrot.slane %v9058_v56, %v9020_v26  ;;  %v2091_v44 = vmul.f32 %v2090_v20, %v6509_v53 }
 0x274   :  { %v2097_v4 = vmul.f32 %v2096_v54, %v6554_v16  ;;  %v2108_v33 = vrot.slane %v9058_v56, %v9055_v39  ;;  %v1455_v50 = vrot.slane %v6317_v3, %v9057_v6  ;;  %v2074_v23 = vadd.f32 %v2073_v9, %v2068_v43 }
 0x275   :  { %v2103_v19 = vmul.f32 %v2102_v5, %v6594_v2  ;;  %v1459_v48 = vrot.slane %v9064_v14, %v9057_v6  ;;  %v1524_v7 = vrot.slane %v6317_v3, %v9060_v31  ;;  %v1528_v12 = vrot.slane %v9064_v14, %v9060_v31 }
 0x276   :  { %v1471_v53 = vmul.f32 %v1455_v50, %v9062_v24  ;;  %v1606_v51 = vrot.slane %v6317_v3, %v9009_v59  ;;  %v1610_v56 = vrot.slane %v9064_v14, %v9009_v59  ;;  %v2080_v63 = vadd.f32 %v2079_v45, %v2074_v23 }
 0x277   :  { %v1472_v60 = vmul.f32 %v1459_v48, %v9062_v24  ;;  %v1540_v40 = vmul.f32 %v1524_v7, %v6276_v22  ;;  %v1688_v58 = vrot.slane %v6317_v3, %v9010_v18  ;;  %v1541_v8 = vmul.f32 %v1528_v12, %v6276_v22 }
 0x278   :  { %v1622_v38 = vmul.f32 %v1606_v51, %v6278_v41  ;;  %v1623_v43 = vmul.f32 %v1610_v56, %v6278_v41  ;;  %v1692_v20 = vrot.slane %v9064_v14, %v9010_v18  ;;  %v2086_v54 = vadd.f32 %v2085_v27, %v2080_v63  ;;  %v6723_v41 = vpop.permute.xlu1 %2266 }
 0x279   :  { %v1553_v9 = vadd.f32 %v1540_v40, %v1471_v53  ;;  %v1704_v45 = vmul.f32 %v1688_v58, %v9063_v57  ;;  %v1856_v24 = vrot.slane %v9064_v14, %v9018_v10  ;;  %v1554_v5 = vadd.f32 %v1541_v8, %v1472_v60 }
 0x27a   :  { %v1705_v50 = vmul.f32 %v1692_v20, %v9063_v57  ;;  %v1880_v22 = vadd.f32 %v6583_v37, %v6544_v25  ;;  %v1934_v23 = vrot.slane %v6317_v3, %v9020_v26  ;;  %v2092_v48 = vadd.f32 %v2091_v44, %v2086_v54  ;;  %v9066_v54 = vld [vmem:[#allocation8_spill] sm:$0xff] }
 0x27b   :  { %v1635_v7 = vadd.f32 %v1622_v38, %v1553_v9  ;;  %v1869_v27 = vmul.f32 %v1856_v24, %v6554_v16  ;;  %v1938_v53 = vrot.slane %v9064_v14, %v9020_v26  ;;  %v1636_v12 = vadd.f32 %v1623_v43, %v1554_v5 }
 0x27c   :  { %v1950_v51 = vmul.f32 %v1934_v23, %v6594_v2  ;;  %v1961_v57 = vadd.f32 %v6624_v55, %v6588_v13  ;;  %v1962_v25 = vadd.f32 %v6627_v0, %v1880_v22  ;;  %v2098_v37 = vadd.f32 %v2097_v4, %v2092_v48  ;;  %v9065_v4 = vld [vmem:[#allocation30_spill] sm:$0xff]  ;;  %v6743_v43 = vpop.permute.xlu1 %2348 }
 0x27d   :  { %v1717_v56 = vadd.f32 %v1704_v45, %v1635_v7  ;;  %v1951_v63 = vmul.f32 %v1938_v53, %v6594_v2  ;;  %v2012_v44 = vrot.slane %v6315_v47, %v9055_v39  ;;  %v2109_v16 = vmul.f32 %v2108_v33, %v9054_v36 }
 0x27e   :  { %v1718_v60 = vadd.f32 %v1705_v50, %v1636_v12  ;;  %v2016_v40 = vrot.slane %v6317_v3, %v9055_v39  ;;  %v2041_v58 = vadd.f32 %v2028_v34, %v6629_v42  ;;  %v2104_v8 = vadd.f32 %v2103_v19, %v2098_v37 }
 0x27f   :  { %v1799_v13 = vadd.f32 %v6539_v28, %v1717_v56  ;;  %v2031_v55 = vmul.f32 %v2012_v44, %v9054_v36  ;;  %v2042_v0 = vadd.f32 %v2029_v1, %v6631_v17  ;;  %v2043_v38 = vadd.f32 %v2030_v32, %v1961_v57  ;;  %v6751_v1 = vpop.permute.xlu0 %2184 }
 0x280   :  { %v1800_v2 = vadd.f32 %v9065_v4, %v1718_v60  ;;  %v2110_v47 = vadd.f32 %v2109_v16, %v2104_v8  ;;  %vm2112_vm3 = vcmp.eq.s32.totalorder %v9066_v54, 2  ;;  %v2020_v28 = vrot.slane %v9064_v14, %v9055_v39  ;;  %v6757_v5 = vpop.permute.xlu1 %2512 }
 0x281   :  { %v1881_v33 = vadd.f32 %v6586_v62, %v1799_v13  ;;  %v2044_v20 = vadd.f32 %v2031_v55, %v1962_v25  ;;  %v2032_v17 = vmul.f32 %v2016_v40, %v9054_v36  ;;  %9067 = vst [vmem:[#allocation28_spill] sm:$0xff] %v6757_v5  ;;  %v6775_v37 = vadd.f32 %v6654_v61, %v6637_v35 }
 0x282   :  { %v1882_v3 = vadd.f32 %v1869_v27, %v1800_v2  ;;  %v2111_v42 = vadd.f32 %v2110_v47, %v6654_v61  ;;  %v2033_v50 = vmul.f32 %v2020_v28, %v9054_v36  ;;  %v6771_v36 = vadd.f32 %v6654_v61, %v6634_v30 }
 0x283   :  { %v1963_v34 = vadd.f32 %v1950_v51, %v1881_v33  ;;  %v6764_v7 = vpop.permute.xlu0 %2430  ;;  %v6784_v40 = vadd.f32 %v6654_v61, %v6640_v52  ;;  %v6788_v30 = vadd.f32 %v6654_v61, %v6643_v49  ;;  %v6793_v8 = vadd.f32 %v6654_v61, %v6646_v11 }
 0x284   :  { %v1964_v32 = vadd.f32 %v1951_v63, %v1882_v3  ;;  %v2113_v19 = vsel %vm2112_vm3, %v6654_v61, %v2111_v42  ;;  %v6777_v56 = vpop.permute.xlu1 %2594  ;;  %v6800_v2 = vadd.f32 %v6654_v61, %v6649_v29  ;;  %v6804_v52 = vadd.f32 %v6654_v61, %v6652_v15 }
 0x285   :  { %v2045_v9 = vadd.f32 %v2032_v17, %v1963_v34  ;;  %v2777_v62 = vrot.slane %v2113_v19, %v9057_v6  ;;  %v2782_v45 = vrot.slane %v2113_v19, %v9060_v31  ;;  %v2788_v24 = vrot.slane %v2113_v19, %v9009_v59  ;;  %9068 = vst [vmem:[#allocation29_spill] sm:$0xff] %v6777_v56 }
 0x286   :  { %v2794_v48 = vrot.slane %v2113_v19, %v9010_v18  ;;  %v2800_v12 = vrot.slane %v2113_v19, %v9011_v21  ;;  %v2046_v51 = vadd.f32 %v2033_v50, %v1964_v32  ;;  %v2806_v25 = vrot.slane %v2113_v19, %v9018_v10 }
 0x287   :  { %v2778_v14 = vmul.f32 %v2777_v62, %v6692_v46  ;;  %v2783_v22 = vmul.f32 %v2782_v45, %v6751_v1  ;;  %v2789_v23 = vmul.f32 %v2788_v24, %v6723_v41  ;;  %v2812_v60 = vrot.slane %v2113_v19, %v9020_v26  ;;  %v6795_v13 = vpop.permute.xlu0 %2676 }
 0x288   :  { %v2795_v53 = vmul.f32 %v2794_v48, %v6743_v43  ;;  %v2801_v44 = vmul.f32 %v2800_v12, %v6764_v7  ;;  %v2807_v16 = vmul.f32 %v2806_v25, %v6757_v5  ;;  %v2818_v35 = vrot.slane %v2113_v19, %v9055_v39  ;;  %9069 = vst [vmem:[#allocation26_spill] sm:$0xff] %v6795_v13  ;;  %v6839_v19 = vpop.permute.xlu1 %2758  ;;  %v6862_v12 = vld [vmem:[%s8863_s5 + $0x1] ss:$0 sm:$0xff] }
 0x289   :  { %v2784_v27 = vadd.f32 %v2783_v22, %v2778_v14  ;;  %v2813_v4 = vmul.f32 %v2812_v60, %v6777_v56  ;;  %v6807_v49 = vadd.f32 %v6654_v61, %v2041_v58  ;;  %v6810_v47 = vadd.f32 %v6654_v61, %v2042_v0  ;;  %9070 = vst [vmem:[#allocation27_spill] sm:$0xff] %v6839_v19 }
 0x28a   :  { %v6813_v11 = vadd.f32 %v6654_v61, %v2043_v38  ;;  %v6816_v33 = vadd.f32 %v6654_v61, %v2044_v20  ;;  %v6819_v29 = vadd.f32 %v6654_v61, %v2045_v9  ;;  %v2121_v15 = vrot.slane %v6771_v36, %v9057_v6  ;;  %9071 = vst [vmem:[#allocation16_spill] sm:$0xff] %v6862_v12 }
 0x28b   :  { %v2790_v57 = vadd.f32 %v2789_v23, %v2784_v27  ;;  %v2125_v58 = vrot.slane %v6775_v37, %v9057_v6  ;;  %v2819_v42 = vmul.f32 %v2818_v35, %v6795_v13  ;;  %v6827_v0 = vadd.f32 %v6654_v61, %v2046_v51 }
 0x28c   :  { %v2129_v38 = vrot.slane %v6784_v40, %v9057_v6  ;;  %v2133_v20 = vrot.slane %v6788_v30, %v9057_v6  ;;  %v2137_v28 = vrot.slane %v6793_v8, %v9057_v6  ;;  %v2141_v17 = vrot.slane %v6800_v2, %v9057_v6 }
 0x28d   :  { %v2796_v63 = vadd.f32 %v2795_v53, %v2790_v57  ;;  %v2145_v32 = vrot.slane %v6804_v52, %v9057_v6  ;;  %vm2822_vm4 = vcmp.eq.s32.totalorder %v9066_v54, 3  ;;  %v2149_v61 = vrot.slane %v6807_v49, %v9057_v6 }
 0x28e   :  { %v2153_v9 = vrot.slane %v6810_v47, %v9057_v6  ;;  %v2157_v62 = vrot.slane %v6813_v11, %v9057_v6  ;;  %v2161_v24 = vrot.slane %v6816_v33, %v9057_v6  ;;  %v2165_v50 = vrot.slane %v6819_v29, %v9057_v6 }
 0x28f   :  { %v2802_v55 = vadd.f32 %v2801_v44, %v2796_v63  ;;  %v2170_v14 = vmul.f32 %v2121_v15, %v6692_v46  ;;  %v2169_v22 = vrot.slane %v6827_v0, %v9057_v6  ;;  %v2171_v23 = vmul.f32 %v2125_v58, %v6692_v46 }
 0x290   :  { %v2172_v48 = vmul.f32 %v2129_v38, %v6692_v46  ;;  %v2173_v27 = vmul.f32 %v2133_v20, %v6692_v46  ;;  %v2174_v51 = vmul.f32 %v2137_v28, %v6692_v46  ;;  %v2175_v57 = vmul.f32 %v2141_v17, %v6692_v46 }
 0x291   :  { %v2808_v3 = vadd.f32 %v2807_v16, %v2802_v55  ;;  %v2176_v25 = vmul.f32 %v2145_v32, %v6692_v46  ;;  %v2190_v63 = vrot.slane %v6771_v36, %v9060_v31  ;;  %v2194_v44 = vrot.slane %v6775_v37, %v9060_v31 }
 0x292   :  { %v2198_v16 = vrot.slane %v6784_v40, %v9060_v31  ;;  %v2202_v60 = vrot.slane %v6788_v30, %v9060_v31  ;;  %v2206_v55 = vrot.slane %v6793_v8, %v9060_v31  ;;  %v2218_v58 = vrot.slane %v6807_v49, %v9060_v31 }
 0x293   :  { %v2814_v34 = vadd.f32 %v2813_v4, %v2808_v3  ;;  %v2210_v4 = vrot.slane %v6800_v2, %v9060_v31  ;;  %v2214_v3 = vrot.slane %v6804_v52, %v9060_v31  ;;  %v2226_v38 = vrot.slane %v6813_v11, %v9060_v31 }
 0x294   :  { %v2177_v20 = vmul.f32 %v2149_v61, %v6692_v46  ;;  %v2179_v28 = vmul.f32 %v2157_v62, %v6692_v46  ;;  %v2230_v17 = vrot.slane %v6816_v33, %v9060_v31  ;;  %v2234_v32 = vrot.slane %v6819_v29, %v9060_v31 }
 0x295   :  { %v2820_v45 = vadd.f32 %v2819_v42, %v2814_v34  ;;  %v2222_v42 = vrot.slane %v6810_v47, %v9060_v31  ;;  %v2178_v34 = vmul.f32 %v2153_v9, %v6692_v46  ;;  %v2240_v54 = vmul.f32 %v2194_v44, %v6751_v1 }
 0x296   :  { %v2241_v61 = vmul.f32 %v2198_v16, %v6751_v1  ;;  %v2242_v9 = vmul.f32 %v2202_v60, %v6751_v1  ;;  %v2243_v62 = vmul.f32 %v2206_v55, %v6751_v1  ;;  %v2244_v6 = vmul.f32 %v2210_v4, %v6751_v1 }
 0x297   :  { %v2821_v53 = vadd.f32 %v2820_v45, %v6839_v19  ;;  %v2238_v45 = vrot.slane %v6827_v0, %v9060_v31  ;;  %v2248_v31 = vmul.f32 %v2226_v38, %v6751_v1  ;;  %v2181_v44 = vmul.f32 %v2165_v50, %v6692_v46 }
 0x298   :  { %v2182_v16 = vmul.f32 %v2169_v22, %v6692_v46  ;;  %v2249_v60 = vmul.f32 %v2230_v17, %v6751_v1  ;;  %v2250_v55 = vmul.f32 %v2234_v32, %v6751_v1  ;;  %v2254_v13 = vadd.f32 %v2241_v61, %v2172_v48 }
 0x299   :  { %v6878_v35 = vsel %vm2822_vm4, %v6839_v19, %v2821_v53  ;;  %v2239_v53 = vmul.f32 %v2190_v63, %v6751_v1  ;;  %v2180_v63 = vmul.f32 %v2161_v24, %v6692_v46  ;;  %v2251_v4 = vmul.f32 %v2238_v45, %v6751_v1 }
 0x29a   :  { %9072 = vst [vmem:[#allocation24_spill] sm:$0xff] %v6878_v35  ;;  %v2857_v15 = vmul.f32 %v6862_v12, %v6878_v35  ;;  %v2246_v12 = vmul.f32 %v2218_v58, %v6751_v1  ;;  %v2247_v35 = vmul.f32 %v2222_v42, %v6751_v1  ;;  %v2255_v58 = vadd.f32 %v2242_v9, %v2173_v27 }
 0x29b   :  { %v2252_v19 = vadd.f32 %v2239_v53, %v2170_v14  ;;  %v2256_v39 = vadd.f32 %v2243_v62, %v2174_v51  ;;  %v2257_v42 = vadd.f32 %v2244_v6, %v2175_v57  ;;  %v2261_v24 = vadd.f32 %v2248_v31, %v2179_v28 }
 0x29c   :  { %2858 = vadd.xlane.f32.xlu0 %v2857_v15  ;;  %v2245_v15 = vmul.f32 %v2214_v3, %v6751_v1  ;;  %v2253_v3 = vadd.f32 %v2240_v54, %v2171_v23  ;;  %v2259_v38 = vadd.f32 %v2246_v12, %v2177_v20  ;;  %v2260_v26 = vadd.f32 %v2247_v35, %v2178_v34 }
 0x29d   :  { %v2262_v5 = vadd.f32 %v2249_v60, %v2180_v63  ;;  %v2272_v46 = vrot.slane %v6771_v36, %v9009_v59  ;;  %v2276_v50 = vrot.slane %v6775_v37, %v9009_v59  ;;  %v2280_v1 = vrot.slane %v6784_v40, %v9009_v59 }
 0x29e   :  { %v2258_v56 = vadd.f32 %v2245_v15, %v2176_v25  ;;  %v2284_v54 = vrot.slane %v6788_v30, %v9009_v59  ;;  %v2288_v6 = vrot.slane %v6793_v8, %v9009_v59  ;;  %v2292_v14 = vrot.slane %v6800_v2, %v9009_v59 }
 0x29f   :  { %v2296_v31 = vrot.slane %v6804_v52, %v9009_v59  ;;  %v2300_v22 = vrot.slane %v6807_v49, %v9009_v59  ;;  %v2304_v23 = vrot.slane %v6810_v47, %v9009_v59  ;;  %v2308_v48 = vrot.slane %v6813_v11, %v9009_v59 }
 0x2a0   :  { %v2312_v27 = vrot.slane %v6816_v33, %v9009_v59  ;;  %v2316_v12 = vrot.slane %v6819_v29, %v9009_v59  ;;  %v2321_v51 = vmul.f32 %v2272_v46, %v6723_v41  ;;  %v2322_v57 = vmul.f32 %v2276_v50, %v6723_v41 }
 0x2a1   :  { %v2323_v25 = vmul.f32 %v2280_v1, %v6723_v41  ;;  %v2324_v35 = vmul.f32 %v2284_v54, %v6723_v41  ;;  %v2325_v20 = vmul.f32 %v2288_v6, %v6723_v41  ;;  %v2326_v34 = vmul.f32 %v2292_v14, %v6723_v41 }
 0x2a2   :  { %v2327_v28 = vmul.f32 %v2296_v31, %v6723_v41  ;;  %v2320_v17 = vrot.slane %v6827_v0, %v9009_v59  ;;  %v2328_v32 = vmul.f32 %v2300_v22, %v6723_v41  ;;  %v2329_v45 = vmul.f32 %v2304_v23, %v6723_v41 }
 0x2a3   :  { %v2330_v53 = vmul.f32 %v2308_v48, %v6723_v41  ;;  %v2263_v61 = vadd.f32 %v2250_v55, %v2181_v44  ;;  %v2264_v9 = vadd.f32 %v2251_v4, %v2182_v16  ;;  %v2331_v62 = vmul.f32 %v2312_v27, %v6723_v41 }
 0x2a4   :  { %v2332_v15 = vmul.f32 %v2316_v12, %v6723_v41  ;;  %v2333_v63 = vmul.f32 %v2320_v17, %v6723_v41  ;;  %v2334_v60 = vadd.f32 %v2321_v51, %v2252_v19  ;;  %v2335_v46 = vadd.f32 %v2322_v57, %v2253_v3 }
 0x2a5   :  { %v2336_v50 = vadd.f32 %v2323_v25, %v2254_v13  ;;  %v2337_v1 = vadd.f32 %v2324_v35, %v2255_v58  ;;  %v2338_v54 = vadd.f32 %v2325_v20, %v2256_v39  ;;  %v2339_v6 = vadd.f32 %v2326_v34, %v2257_v42 }
 0x2a6   :  { %v2340_v14 = vadd.f32 %v2327_v28, %v2258_v56  ;;  %v2341_v31 = vadd.f32 %v2328_v32, %v2259_v38  ;;  %v2342_v22 = vadd.f32 %v2329_v45, %v2260_v26  ;;  %v2343_v23 = vadd.f32 %v2330_v53, %v2261_v24 }
 0x2a7   :  { %v2354_v44 = vrot.slane %v6771_v36, %v9010_v18  ;;  %v2358_v16 = vrot.slane %v6775_v37, %v9010_v18  ;;  %v2362_v55 = vrot.slane %v6784_v40, %v9010_v18  ;;  %v2366_v41 = vrot.slane %v6788_v30, %v9010_v18 }
 0x2a8   :  { %v2370_v39 = vrot.slane %v6793_v8, %v9010_v18  ;;  %v2374_v56 = vrot.slane %v6800_v2, %v9010_v18  ;;  %v2378_v26 = vrot.slane %v6804_v52, %v9010_v18  ;;  %v2382_v13 = vrot.slane %v6807_v49, %v9010_v18 }
 0x2a9   :  { %v2386_v19 = vrot.slane %v6810_v47, %v9010_v18  ;;  %v2390_v4 = vrot.slane %v6813_v11, %v9010_v18  ;;  %v2394_v3 = vrot.slane %v6816_v33, %v9010_v18  ;;  %v2398_v58 = vrot.slane %v6819_v29, %v9010_v18 }
 0x2aa   :  { %v2402_v42 = vrot.slane %v6827_v0, %v9010_v18  ;;  %v2403_v38 = vmul.f32 %v2354_v44, %v6743_v43  ;;  %v2404_v24 = vmul.f32 %v2358_v16, %v6743_v43  ;;  %v2405_v48 = vmul.f32 %v2362_v55, %v6743_v43 }
 0x2ab   :  { %v2406_v27 = vmul.f32 %v2366_v41, %v6743_v43  ;;  %v2407_v12 = vmul.f32 %v2370_v39, %v6743_v43  ;;  %v2408_v51 = vmul.f32 %v2374_v56, %v6743_v43  ;;  %v2409_v57 = vmul.f32 %v2378_v26, %v6743_v43 }
 0x2ac   :  { %v2410_v25 = vmul.f32 %v2382_v13, %v6743_v43  ;;  %v2344_v35 = vadd.f32 %v2331_v62, %v2262_v5  ;;  %v2345_v20 = vadd.f32 %v2332_v15, %v2263_v61  ;;  %v2411_v34 = vmul.f32 %v2386_v19, %v6743_v43 }
 0x2ad   :  { %v2412_v28 = vmul.f32 %v2390_v4, %v6743_v43  ;;  %v2346_v17 = vadd.f32 %v2333_v63, %v2264_v9  ;;  %v2413_v32 = vmul.f32 %v2394_v3, %v6743_v43  ;;  %v2414_v45 = vmul.f32 %v2398_v58, %v6743_v43 }
 0x2ae   :  { %v2415_v53 = vmul.f32 %v2402_v42, %v6743_v43  ;;  %v2416_v44 = vadd.f32 %v2403_v38, %v2334_v60  ;;  %v2417_v16 = vadd.f32 %v2404_v24, %v2335_v46  ;;  %v2418_v55 = vadd.f32 %v2405_v48, %v2336_v50 }
 0x2af   :  { %v2419_v41 = vadd.f32 %v2406_v27, %v2337_v1  ;;  %v2420_v39 = vadd.f32 %v2407_v12, %v2338_v54  ;;  %v2421_v56 = vadd.f32 %v2408_v51, %v2339_v6  ;;  %v2422_v26 = vadd.f32 %v2409_v57, %v2340_v14 }
 0x2b0   :  { %v2423_v5 = vadd.f32 %v2410_v25, %v2341_v31  ;;  %v2424_v61 = vadd.f32 %v2411_v34, %v2342_v22  ;;  %v2425_v62 = vadd.f32 %v2412_v28, %v2343_v23  ;;  %v2436_v15 = vrot.slane %v6771_v36, %v9011_v21 }
 0x2b1   :  { %v2440_v9 = vrot.slane %v6775_v37, %v9011_v21  ;;  %v2444_v63 = vrot.slane %v6784_v40, %v9011_v21  ;;  %v2448_v43 = vrot.slane %v6788_v30, %v9011_v21  ;;  %v2452_v60 = vrot.slane %v6793_v8, %v9011_v21 }
 0x2b2   :  { %v2456_v46 = vrot.slane %v6800_v2, %v9011_v21  ;;  %v2460_v50 = vrot.slane %v6804_v52, %v9011_v21  ;;  %v2464_v1 = vrot.slane %v6807_v49, %v9011_v21  ;;  %v2468_v54 = vrot.slane %v6810_v47, %v9011_v21 }
 0x2b3   :  { %v2472_v6 = vrot.slane %v6813_v11, %v9011_v21  ;;  %v2426_v14 = vadd.f32 %v2413_v32, %v2344_v35  ;;  %v2476_v31 = vrot.slane %v6816_v33, %v9011_v21  ;;  %v2480_v22 = vrot.slane %v6819_v29, %v9011_v21 }
 0x2b4   :  { %v2484_v23 = vrot.slane %v6827_v0, %v9011_v21  ;;  %v2427_v13 = vadd.f32 %v2414_v45, %v2345_v20  ;;  %v2428_v19 = vadd.f32 %v2415_v53, %v2346_v17  ;;  %v2485_v4 = vmul.f32 %v2436_v15, %v6764_v7 }
 0x2b5   :  { %v2486_v3 = vmul.f32 %v2440_v9, %v6764_v7  ;;  %v2487_v58 = vmul.f32 %v2444_v63, %v6764_v7  ;;  %v2488_v42 = vmul.f32 %v2448_v43, %v6764_v7  ;;  %v2489_v38 = vmul.f32 %v2452_v60, %v6764_v7 }
 0x2b6   :  { %v2490_v24 = vmul.f32 %v2456_v46, %v6764_v7  ;;  %v2491_v48 = vmul.f32 %v2460_v50, %v6764_v7  ;;  %v2492_v27 = vmul.f32 %v2464_v1, %v6764_v7  ;;  %v2493_v12 = vmul.f32 %v2468_v54, %v6764_v7 }
 0x2b7   :  { %v2494_v51 = vmul.f32 %v2472_v6, %v6764_v7  ;;  %v2495_v57 = vmul.f32 %v2476_v31, %v6764_v7  ;;  %v2496_v25 = vmul.f32 %v2480_v22, %v6764_v7  ;;  %v2497_v35 = vmul.f32 %v2484_v23, %v6764_v7 }
 0x2b8   :  { %v2498_v20 = vadd.f32 %v2485_v4, %v2416_v44  ;;  %v2499_v34 = vadd.f32 %v2486_v3, %v2417_v16  ;;  %v2500_v28 = vadd.f32 %v2487_v58, %v2418_v55  ;;  %v2501_v17 = vadd.f32 %v2488_v42, %v2419_v41 }
 0x2b9   :  { %v2502_v32 = vadd.f32 %v2489_v38, %v2420_v39  ;;  %v2503_v45 = vadd.f32 %v2490_v24, %v2421_v56  ;;  %v2504_v53 = vadd.f32 %v2491_v48, %v2422_v26  ;;  %v2505_v15 = vadd.f32 %v2492_v27, %v2423_v5 }
 0x2ba   :  { %v2506_v9 = vadd.f32 %v2493_v12, %v2424_v61  ;;  %v2507_v63 = vadd.f32 %v2494_v51, %v2425_v62  ;;  %v2508_v43 = vadd.f32 %v2495_v57, %v2426_v14  ;;  %v2509_v60 = vadd.f32 %v2496_v25, %v2427_v13  ;;  %v9073_v61 = vld [vmem:[#allocation28_spill] sm:$0xff] }
 0x2bb   :  { %v2518_v46 = vrot.slane %v6771_v36, %v9018_v10  ;;  %v2522_v50 = vrot.slane %v6775_v37, %v9018_v10  ;;  %v2526_v7 = vrot.slane %v6784_v40, %v9018_v10  ;;  %v2530_v44 = vrot.slane %v6788_v30, %v9018_v10 }
 0x2bc   :  { %v2534_v16 = vrot.slane %v6793_v8, %v9018_v10  ;;  %v2538_v55 = vrot.slane %v6800_v2, %v9018_v10  ;;  %v2542_v41 = vrot.slane %v6804_v52, %v9018_v10  ;;  %v2546_v39 = vrot.slane %v6807_v49, %v9018_v10 }
 0x2bd   :  { %v2550_v56 = vrot.slane %v6810_v47, %v9018_v10  ;;  %v2554_v26 = vrot.slane %v6813_v11, %v9018_v10  ;;  %v2558_v5 = vrot.slane %v6816_v33, %v9018_v10  ;;  %v2567_v62 = vmul.f32 %v2518_v46, %v9073_v61  ;;  %v9074_v46 = vld [vmem:[#allocation7_spill] sm:$0xff] }
 0x2be   :  { %v2568_v1 = vmul.f32 %v2522_v50, %v9073_v61  ;;  %v2562_v54 = vrot.slane %v6819_v29, %v9018_v10  ;;  %v2569_v6 = vmul.f32 %v2526_v7, %v9073_v61  ;;  %v2570_v14 = vmul.f32 %v2530_v44, %v9073_v61 }
 0x2bf   :  { %v2571_v31 = vmul.f32 %v2534_v16, %v9073_v61  ;;  %v2566_v22 = vrot.slane %v6827_v0, %v9018_v10  ;;  %v2572_v23 = vmul.f32 %v2538_v55, %v9073_v61  ;;  %v2573_v13 = vmul.f32 %v2542_v41, %v9073_v61 }
 0x2c0   :  { %v2574_v4 = vmul.f32 %v2546_v39, %v9073_v61  ;;  %v2510_v3 = vadd.f32 %v2497_v35, %v2428_v19  ;;  %v2575_v58 = vmul.f32 %v2550_v56, %v9073_v61  ;;  %v2576_v42 = vmul.f32 %v2554_v26, %v9073_v61 }
 0x2c1   :  { %v2577_v38 = vmul.f32 %v2558_v5, %v9073_v61  ;;  %v2578_v24 = vmul.f32 %v2562_v54, %v9073_v61  ;;  %v2579_v48 = vmul.f32 %v2566_v22, %v9073_v61  ;;  %v2580_v27 = vadd.f32 %v2567_v62, %v2498_v20  ;;  %v9075_v20 = vld [vmem:[#allocation29_spill] sm:$0xff] }
 0x2c2   :  { %v2581_v12 = vadd.f32 %v2568_v1, %v2499_v34  ;;  %v2582_v51 = vadd.f32 %v2569_v6, %v2500_v28  ;;  %v2583_v57 = vadd.f32 %v2570_v14, %v2501_v17  ;;  %v2584_v25 = vadd.f32 %v2571_v31, %v2502_v32 }
 0x2c3   :  { %v2600_v50 = vrot.slane %v6771_v36, %v9074_v46  ;;  %v2585_v7 = vadd.f32 %v2572_v23, %v2503_v45  ;;  %v2586_v19 = vadd.f32 %v2573_v13, %v2504_v53  ;;  %v2587_v35 = vadd.f32 %v2574_v4, %v2505_v15  ;;  %v9077_v23 = vld [vmem:[#allocation26_spill] sm:$0xff] }
 0x2c4   :  { %v2604_v44 = vrot.slane %v6775_v37, %v9074_v46  ;;  %v2588_v16 = vadd.f32 %v2575_v58, %v2506_v9  ;;  %v7079_v55 = vadd.f32 %v2576_v42, %v2507_v63  ;;  %v2608_v41 = vrot.slane %v6784_v40, %v9074_v46  ;;  %v9076_v63 = vld [vmem:[#allocation10_spill] sm:$0xff] }
 0x2c5   :  { %v2649_v34 = vmul.f32 %v2600_v50, %v9075_v20  ;;  %v2590_v28 = vadd.f32 %v2577_v38, %v2508_v43  ;;  %v7084_v17 = vadd.f32 %v2578_v24, %v2509_v60  ;;  %v7086_v32 = vadd.f32 %v2579_v48, %v2510_v3 }
 0x2c6   :  { %v2650_v45 = vmul.f32 %v2604_v44, %v9075_v20  ;;  %v2612_v53 = vrot.slane %v6788_v30, %v9074_v46  ;;  %v2616_v15 = vrot.slane %v6793_v8, %v9074_v46  ;;  %v2651_v9 = vmul.f32 %v2608_v41, %v9075_v20 }
 0x2c7   :  { %v2682_v39 = vrot.slane %v6771_v36, %v9076_v63  ;;  %v2620_v43 = vrot.slane %v6800_v2, %v9074_v46  ;;  %v2624_v60 = vrot.slane %v6804_v52, %v9074_v46  ;;  %v2628_v56 = vrot.slane %v6807_v49, %v9074_v46 }
 0x2c8   :  { %v2686_v26 = vrot.slane %v6775_v37, %v9076_v63  ;;  %v2632_v5 = vrot.slane %v6810_v47, %v9074_v46  ;;  %v2652_v61 = vmul.f32 %v2612_v53, %v9075_v20  ;;  %v2662_v62 = vadd.f32 %v2649_v34, %v2580_v27 }
 0x2c9   :  { %v2690_v36 = vrot.slane %v6784_v40, %v9076_v63  ;;  %v2636_v1 = vrot.slane %v6813_v11, %v9074_v46  ;;  %v2640_v54 = vrot.slane %v6816_v33, %v9074_v46  ;;  %v2644_v6 = vrot.slane %v6819_v29, %v9074_v46 }
 0x2ca   :  { %v2663_v14 = vadd.f32 %v2650_v45, %v2581_v12  ;;  %v2653_v37 = vmul.f32 %v2616_v15, %v9075_v20  ;;  %v2664_v31 = vadd.f32 %v2651_v9, %v2582_v51  ;;  %v2694_v22 = vrot.slane %v6788_v30, %v9076_v63 }
 0x2cb   :  { %v2731_v13 = vmul.f32 %v2682_v39, %v9077_v23  ;;  %v2648_v40 = vrot.slane %v6827_v0, %v9074_v46  ;;  %v2654_v4 = vmul.f32 %v2620_v43, %v9075_v20  ;;  %v2655_v3 = vmul.f32 %v2624_v60, %v9075_v20  ;;  %v9078_v39 = vld [vmem:[#allocation27_spill] sm:$0xff] }
 0x2cc   :  { %v2732_v58 = vmul.f32 %v2686_v26, %v9077_v23  ;;  %v2665_v42 = vadd.f32 %v2652_v61, %v2583_v57  ;;  %v2698_v38 = vrot.slane %v6793_v8, %v9076_v63  ;;  %v2733_v24 = vmul.f32 %v2690_v36, %v9077_v23 }
 0x2cd   :  { %v2744_v48 = vadd.f32 %v2731_v13, %v2662_v62  ;;  %v2656_v30 = vmul.f32 %v2628_v56, %v9075_v20  ;;  %v2657_v27 = vmul.f32 %v2632_v5, %v9075_v20  ;;  %v2658_v12 = vmul.f32 %v2636_v1, %v9075_v20  ;;  %v9079_v1 = vld [vmem:[#allocation12_spill] sm:$0xff]  ;;  %v9081_v13 = vld [vmem:[#allocation3_spill] sm:$0xff] }
 0x2ce   :  { %v2745_v51 = vadd.f32 %v2732_v58, %v2663_v14  ;;  %v2666_v50 = vadd.f32 %v2653_v37, %v2584_v25  ;;  %v2702_v44 = vrot.slane %v6800_v2, %v9076_v63  ;;  %v2734_v41 = vmul.f32 %v2694_v22, %v9077_v23 }
 0x2cf   :  { %v2746_v57 = vadd.f32 %v2733_v24, %v2664_v31  ;;  %v2659_v34 = vmul.f32 %v2640_v54, %v9075_v20  ;;  %v2660_v8 = vmul.f32 %v2644_v6, %v9075_v20  ;;  %v2667_v45 = vadd.f32 %v2654_v4, %v2585_v7 }
 0x2d0   :  { %v2706_v53 = vrot.slane %v6804_v52, %v9076_v63  ;;  %v2735_v15 = vmul.f32 %v2698_v38, %v9077_v23  ;;  %v2747_v9 = vadd.f32 %v2734_v41, %v2665_v42  ;;  %v7139_v43 = vadd.f32 %v9078_v39, %v2744_v48  ;;  %v9082_v38 = vld [vmem:[#allocation15_spill] sm:$0xff] }
 0x2d1   :  { %v7142_v25 = vadd.f32 %v9078_v39, %v2745_v51  ;;  %v2661_v2 = vmul.f32 %v2648_v40, %v9075_v20  ;;  %v2668_v60 = vadd.f32 %v2655_v3, %v2586_v19  ;;  %v2669_v56 = vadd.f32 %v2656_v30, %v2587_v35  ;;  %v9080_v19 = vld [vmem:[#allocation13_spill] sm:$0xff]  ;;  %v9083_v51 = vld [vmem:[#allocation14_spill] sm:$0xff] }
 0x2d2   :  { %v2710_v26 = vrot.slane %v6807_v49, %v9076_v63  ;;  %v2670_v7 = vadd.f32 %v2657_v27, %v2588_v16  ;;  %v2736_v5 = vmul.f32 %v2702_v44, %v9077_v23  ;;  %v2748_v52 = vadd.f32 %v2735_v15, %v2666_v50 }
 0x2d3   :  { %v7149_v61 = vadd.f32 %v9078_v39, %v2746_v57  ;;  %v2714_v62 = vrot.slane %v6810_v47, %v9076_v63  ;;  %v2737_v36 = vmul.f32 %v2706_v53, %v9077_v23  ;;  %v2825_v20 = vmul.f32 %v7139_v43, %v9079_v1 }
 0x2d4   :  { %v2826_v35 = vmul.f32 %v7142_v25, %v9080_v19  ;;  %v2671_v49 = vadd.f32 %v2658_v12, %v7079_v55  ;;  %v2672_v16 = vadd.f32 %v2659_v34, %v2590_v28  ;;  %v2749_v54 = vadd.f32 %v2736_v5, %v2667_v45  ;;  %v9084_v45 = vld [vmem:[#allocation11_spill] sm:$0xff] }
 0x2d5   :  { %v7160_v6 = vadd.f32 %v9078_v39, %v2747_v9  ;;  %v2673_v14 = vadd.f32 %v2660_v8, %v7084_v17  ;;  %v2718_v47 = vrot.slane %v6813_v11, %v9076_v63  ;;  %v2738_v37 = vmul.f32 %v2710_v26, %v9077_v23 }
 0x2d6   :  { %v2750_v31 = vadd.f32 %v2737_v36, %v2668_v60  ;;  %v7167_v22 = vadd.f32 %v9078_v39, %v2748_v52  ;;  %v2827_v40 = vmul.f32 %v7149_v61, %v9081_v13  ;;  %v2838_v55 = vadd.f32 %v2826_v35, %v2825_v20 }
 0x2d7   :  { %v2861_v28 = vmul.f32 %v2825_v20, %v7139_v43  ;;  %v2722_v4 = vrot.slane %v6816_v33, %v9076_v63  ;;  %v2739_v17 = vmul.f32 %v2714_v62, %v9077_v23  ;;  %v2751_v3 = vadd.f32 %v2738_v37, %v2669_v56 }
 0x2d8   :  { %v2862_v11 = vmul.f32 %v2826_v35, %v7142_v25  ;;  %v2726_v58 = vrot.slane %v6819_v29, %v9076_v63  ;;  %v7179_v42 = vadd.f32 %v9078_v39, %v2749_v54  ;;  %v2828_v24 = vmul.f32 %v7160_v6, %v9082_v38  ;;  %v9086_v54 = vld [vmem:[#allocation18_spill] sm:$0xff] }
 0x2d9   :  { %v2839_v48 = vadd.f32 %v2838_v55, %v2827_v40  ;;  %v2730_v30 = vrot.slane %v6827_v0, %v9076_v63  ;;  %v2740_v33 = vmul.f32 %v2718_v47, %v9077_v23  ;;  %v2752_v27 = vadd.f32 %v2739_v17, %v2670_v7 }
 0x2da   :  { %v7187_v12 = vadd.f32 %v9078_v39, %v2750_v31  ;;  %v2829_v50 = vmul.f32 %v7167_v22, %v9083_v51  ;;  %v2863_v44 = vmul.f32 %v2827_v40, %v7149_v61  ;;  %v2874_v41 = vadd.f32 %v2862_v11, %v2861_v28  ;;  %v9087_v40 = vld [vmem:[#allocation19_spill] sm:$0xff]  ;;  %v9088_v11 = vld [vmem:[#allocation20_spill] sm:$0xff] }
 0x2db   :  { %v2840_v29 = vadd.f32 %v2839_v48, %v2828_v24  ;;  %v2674_v57 = vadd.f32 %v2661_v2, %v7086_v32  ;;  %v2741_v34 = vmul.f32 %v2722_v4, %v9077_v23  ;;  %v2753_v8 = vadd.f32 %v2740_v33, %v2671_v49  ;;  %v9085_v2 = vld [vmem:[#allocation17_spill] sm:$0xff] }
 0x2dc   :  { %v7195_v0 = vadd.f32 %v9078_v39, %v2751_v3  ;;  %v2830_v53 = vmul.f32 %v7179_v42, %v9084_v45  ;;  %v2864_v9 = vmul.f32 %v2828_v24, %v7160_v6  ;;  %v2875_v60 = vadd.f32 %v2874_v41, %v2863_v44  ;;  %v9089_v33 = vld [vmem:[#allocation21_spill] sm:$0xff]  ;;  %v9090_v41 = vld [vmem:[#allocation23_spill] sm:$0xff] }
 0x2dd   :  { %v2841_v15 = vadd.f32 %v2840_v29, %v2829_v50  ;;  %v2742_v56 = vmul.f32 %v2726_v58, %v9077_v23  ;;  %v2743_v26 = vmul.f32 %v2730_v30, %v9077_v23  ;;  %v2754_v7 = vadd.f32 %v2741_v34, %v2672_v16  ;;  %v9091_v34 = vld [vmem:[#allocation22_spill] sm:$0xff] }
 0x2de   :  { %v7203_v32 = vadd.f32 %v9078_v39, %v2752_v27  ;;  %v2831_v5 = vmul.f32 %v7187_v12, %v9085_v2  ;;  %v2865_v62 = vmul.f32 %v2829_v50, %v7167_v22  ;;  %v2876_v36 = vadd.f32 %v2875_v60, %v2864_v9 }
 0x2df   :  { %v2842_v52 = vadd.f32 %v2841_v15, %v2830_v53  ;;  %v2755_v20 = vadd.f32 %v2742_v56, %v2673_v14  ;;  %v2756_v35 = vadd.f32 %v2743_v26, %v2674_v57  ;;  %v7209_v49 = vadd.f32 %v9078_v39, %v2753_v8 }
 0x2e0   :  { %v2832_v47 = vmul.f32 %v7195_v0, %v9086_v54  ;;  %v2866_v16 = vmul.f32 %v2830_v53, %v7179_v42  ;;  %v2877_v37 = vadd.f32 %v2876_v36, %v2865_v62  ;;  %v7215_v31 = vadd.f32 %v9078_v39, %v2754_v7  ;;  %v9092_v36 = vld [vmem:[#allocation24_spill] sm:$0xff] }
 0x2e1   :  { %v2843_v23 = vadd.f32 %v2842_v52, %v2831_v5  ;;  %v2833_v55 = vmul.f32 %v7203_v32, %v9087_v40  ;;  %v2867_v14 = vmul.f32 %v2831_v5, %v7187_v12  ;;  %v7221_v17 = vadd.f32 %v9078_v39, %v2755_v20  ;;  %v9104_v40 = vld [vmem:[#allocation4_spill] sm:$0xff] }
 0x2e2   :  { %v2878_v4 = vadd.f32 %v2877_v37, %v2866_v16  ;;  %v7224_v3 = vadd.f32 %v9078_v39, %v2756_v35  ;;  %v2834_v58 = vmul.f32 %v7209_v49, %v9088_v11  ;;  %v2868_v48 = vmul.f32 %v2832_v47, %v7195_v0  ;;  %v9093_v16 = vld [vmem:[#allocation16_spill] sm:$0xff] }
 0x2e3   :  { %v2844_v28 = vadd.f32 %v2843_v23, %v2832_v47  ;;  %v2835_v27 = vmul.f32 %v7215_v31, %v9089_v33  ;;  %v2869_v29 = vmul.f32 %v2833_v55, %v7203_v32  ;;  %v2836_v39 = vmul.f32 %v7221_v17, %v9091_v34 }
 0x2e4   :  { %v2879_v30 = vadd.f32 %v2878_v4, %v2867_v14  ;;  %v2837_v57 = vmul.f32 %v7224_v3, %v9090_v41  ;;  %v2870_v53 = vmul.f32 %v2834_v58, %v7209_v49  ;;  %v2889_v20 = vmul.f32 %v9092_v36, %v9092_v36 }
 0x2e5   :  { %v2845_v24 = vadd.f32 %v2844_v28, %v2833_v55  ;;  %v2871_v60 = vmul.f32 %v2835_v27, %v7215_v31  ;;  %v2872_v52 = vmul.f32 %v2836_v39, %v7221_v17  ;;  %v5317_v55 = vmov 32   ;;  %v7248_v28 = vld [vmem:[%s8859_s1] sm:$0xff] }
 0x2e6   :  { %v2880_v44 = vadd.f32 %v2879_v30, %v2868_v48  ;;  %v2849_v26 = vsel %vm1309_vm2, %v2837_v57, 0.0  ;;  %v2873_v7 = vmul.f32 %v2837_v57, %v7224_v3  ;;  %v2890_v37 = vmul.f32 %v9093_v16, %v2889_v20  ;;  %5247 = vset.pattern.permute.xlu1 %v5317_v55  ;;  %v5286_v55 = vld [vmem:[%s8860_s2] sm:$0xff] }
 0x2e7   :  { %v2846_v50 = vadd.f32 %v2845_v24, %v2834_v58  ;;  %v5318_v14 = vmov 33   ;;  %v5319_v4 = vmov 34   ;;  %v5320_v58 = vmov 35  }
 0x2e8   :  { %v2881_v15 = vadd.f32 %v2880_v44, %v2869_v29  ;;  %v2885_v47 = vsel %vm1309_vm2, %v2873_v7, 0.0  ;;  %v9094_v24 = vmov 1   ;;  %v5285_v7 = vld [vmem:[%s8865_s4] sm:$0xff]  ;;  %v5323_v20 = vmov 40  }
 0x2e9   :  { %v2847_v8 = vadd.f32 %v2846_v50, %v2835_v27  ;;  %v5327_v16 = vmov 46  }
 0x2ea   :  { %v2882_v56 = vadd.f32 %v2881_v15, %v2870_v53 }
 0x2eb   :  { %v2848_v9 = vadd.f32 %v2847_v8, %v2836_v39 }
 0x2ec   :  { %v2883_v62 = vadd.f32 %v2882_v56, %v2871_v60  ;;  %v5284_v60 = vld [vmem:[%s8864_s3] sm:$0xff] }
 0x2ed   :  { %v2850_v5 = vadd.f32 %v2849_v26, %v2848_v9 }
 0x2ee   :  { %v2884_v35 = vadd.f32 %v2883_v62, %v2872_v52  ;;  %v5321_v52 = vmov 38   ;;  %v5322_v62 = vmov 36  }
 0x2ef   :  { %2851 = vadd.xlane.f32.xlu1 %v2850_v5 }
 0x2f0   :  { %v2886_v23 = vadd.f32 %v2885_v47, %v2884_v35  ;;  %v5324_v35 = vmov 37   ;;  %v5325_v47 = vmov 43  }
 0x2f2   :  { %2887 = vadd.xlane.f32.xlu0 %v2886_v23  ;;  %v5326_v23 = vmov 39  }
 0x2f3   :  { %2891 = vadd.xlane.f32.xlu1 %v2890_v37  ;;  %v8951_v37 = vmov 4  }
 0x304   :  { %2942 = vperm.xlu1 %5247, %v7248_v28  }
 0x308   :  { %5248 = vset.pattern.permute.xlu1 %v5318_v14  ;;  %v9095_v14 = vmov 2  }
 0x309   :  { %3011 = vperm.xlu1 %5248, %v7248_v28  }
 0x30d   :  { %5249 = vset.pattern.permute.xlu1 %v5319_v4  ;;  %v5329_v4 = vmov 41  }
 0x30e   :  { %3093 = vperm.xlu1 %5249, %v7248_v28  }
 0x312   :  { %5250 = vset.pattern.permute.xlu1 %v5320_v58  ;;  %v5330_v58 = vmov 42  }
 0x313   :  { %3175 = vperm.xlu1 %5250, %v7248_v28  }
 0x317   :  { %5251 = vset.pattern.permute.xlu1 %v9094_v24 }
 0x329   :  { %v2859_v48 = vpop.xlane.xlu0 %2858 }
 0x37c   :  { %v2852_v30 = vpop.xlane.xlu1 %2851 }
 0x37d   :  { %v2860_v27 = vadd.f32 %v2859_v48, %v2852_v30  ;;  %v5331_v48 = vmov 44   ;;  %v5332_v30 = vmov 45  }
 0x37f   :  { %v2894_v50 = vmul.f32 0.00086805556, %v2860_v27  ;;  %v2888_v29 = vpop.xlane.xlu0 %2887  ;;  %v5333_v27 = vmov 47  }
 0x380   :  { %v2892_v44 = vpop.xlane.xlu1 %2891 }
 0x381   :  { %v2893_v57 = vadd.f32 %v2892_v44, %v2888_v29  ;;  %v2896_v39 = vmul.f32 %v2894_v50, %v2894_v50 }
 0x383   :  { %v2895_v8 = vmul.f32 0.00086805556, %v2893_v57 }
 0x384   :  { %v7280_v29 = vpop.permute.xlu1 %2942 }
 0x385   :  { %v2897_v53 = vsub.f32 %v2895_v8, %v2896_v39  ;;  %9096 = vst [vmem:[#allocation25_spill] sm:$0xff] %v7280_v29 }
 0x387   :  { %v2898_v15 = vadd.f32 1e-05, %v2897_v53 }
 0x388   :  { %v7282_v44 = vpop.permute.xlu1 %3011 }
 0x389   :  { %5277 = vrsqrt.f32 %v2898_v15 }
 0x38d   :  { %v7284_v57 = vpop.permute.xlu1 %3093 }
 0x392   :  { %v7286_v39 = vpop.permute.xlu1 %3175 }
 0x393   :  { %v5278_v9 = vpop.eup %5277  ;;  %9097 = vst [vmem:[#allocation30_spill] sm:$0xff] %v7286_v39 }
 0x394   :  { %v2900_v56 = vmul.f32 %v5284_v60, %v5278_v9 }
 0x396   :  { %2905 = vperm.xlu0 %5246, %v2900_v56   ;;  %v2901_v26 = vmul.f32 %v2900_v56, %v2894_v50  ;;  %v8952_v50 = vmov 5  }
 0x398   :  { %v2902_v5 = vsub.f32 %v5285_v7, %v2901_v26 }
 0x39a   :  { %2923 = vperm.xlu1 %5251, %v2902_v5   ;;  %5254 = vset.pattern.permute.xlu0 %v5321_v52 }
 0x39b   :  { %3421 = vperm.xlu0 %5254, %v7248_v28  }
 0x39e   :  { %5252 = vset.pattern.permute.xlu1 %v5322_v62 }
 0x39f   :  { %3257 = vperm.xlu1 %5252, %v7248_v28   ;;  %5257 = vset.pattern.permute.xlu0 %v5323_v20 }
 0x3a0   :  { %3652 = vperm.xlu0 %5257, %v7248_v28  }
 0x3a3   :  { %5253 = vset.pattern.permute.xlu1 %v5324_v35 }
 0x3a4   :  { %3339 = vperm.xlu1 %5253, %v7248_v28   ;;  %5260 = vset.pattern.permute.xlu0 %v5325_v47 }
 0x3a5   :  { %3885 = vperm.xlu0 %5260, %v7248_v28  }
 0x3a8   :  { %5255 = vset.pattern.permute.xlu1 %v5326_v23 }
 0x3a9   :  { %3503 = vperm.xlu1 %5255, %v7248_v28   ;;  %5263 = vset.pattern.permute.xlu0 %v5327_v16 }
 0x3aa   :  { %4131 = vperm.xlu0 %5263, %v7248_v28  }
 0x3ad   :  { %5256 = vset.pattern.permute.xlu1 %v8951_v37 }
 0x3ae   :  { %3585 = vperm.xlu1 %5256, %v5286_v55   ;;  %5267 = vset.pattern.permute.xlu0 %v9095_v14 }
 0x3b2   :  { %5258 = vset.pattern.permute.xlu1 %v5329_v4 }
 0x3b3   :  { %3721 = vperm.xlu1 %5258, %v7248_v28  }
 0x3b7   :  { %5259 = vset.pattern.permute.xlu1 %v5330_v58 }
 0x3b8   :  { %3803 = vperm.xlu1 %5259, %v7248_v28  }
 0x3bc   :  { %5261 = vset.pattern.permute.xlu1 %v5331_v48 }
 0x3bd   :  { %3967 = vperm.xlu1 %5261, %v7248_v28  }
 0x3c1   :  { %5262 = vset.pattern.permute.xlu1 %v5332_v30 }
 0x3c2   :  { %4049 = vperm.xlu1 %5262, %v7248_v28  }
 0x3c6   :  { %5264 = vset.pattern.permute.xlu1 %v5333_v27 }
 0x3c7   :  { %4213 = vperm.xlu1 %5264, %v7248_v28  }
 0x3cb   :  { %5265 = vset.pattern.permute.xlu1 %v8952_v50 }
 0x3cc   :  { %4295 = vperm.xlu1 %5265, %v5286_v55  }
 0x3d0   :  { %5266 = vset.pattern.permute.xlu1 %v9095_v14 }
 0x415   :  { %v2906_v8 = vpop.permute.xlu0 %2905 }
 0x416   :  { %v2908_v53 = vmul.f32 %v2906_v8, %v7139_v43  ;;  %v2909_v15 = vmul.f32 %v2906_v8, %v7142_v25  ;;  %v2910_v28 = vmul.f32 %v2906_v8, %v7149_v61  ;;  %v2911_v9 = vmul.f32 %v2906_v8, %v7160_v6 }
 0x417   :  { %v2912_v60 = vmul.f32 %v2906_v8, %v7167_v22  ;;  %v2913_v56 = vmul.f32 %v2906_v8, %v7179_v42  ;;  %v2914_v26 = vmul.f32 %v2906_v8, %v7187_v12  ;;  %v2915_v7 = vmul.f32 %v2906_v8, %v7195_v0 }
 0x418   :  { %v2916_v5 = vmul.f32 %v2906_v8, %v7203_v32  ;;  %v2917_v52 = vmul.f32 %v2906_v8, %v7209_v49  ;;  %v2918_v43 = vmul.f32 %v2906_v8, %v7215_v31  ;;  %v2919_v25 = vmul.f32 %v2906_v8, %v7221_v17 }
 0x419   :  { %v2920_v61 = vmul.f32 %v2906_v8, %v7224_v3  ;;  %v2924_v62 = vpop.permute.xlu1 %2923  ;;  %v2939_v47 = vmul.f32 %v2906_v8, %v9092_v36 }
 0x41a   :  { %v7301_v6 = vadd.f32 %v2924_v62, %v2908_v53  ;;  %v7303_v22 = vadd.f32 %v2924_v62, %v2909_v15  ;;  %v7305_v42 = vadd.f32 %v2924_v62, %v2910_v28  ;;  %v7307_v12 = vadd.f32 %v2924_v62, %v2911_v9  ;;  %v7332_v4 = vpop.permute.xlu0 %3421 }
 0x41b   :  { %v7309_v0 = vadd.f32 %v2924_v62, %v2912_v60  ;;  %v7311_v32 = vadd.f32 %v2924_v62, %v2913_v56  ;;  %v7313_v49 = vadd.f32 %v2924_v62, %v2914_v26  ;;  %v7315_v31 = vadd.f32 %v2924_v62, %v2915_v7  ;;  %9099 = vst [vmem:[#allocation29_spill] sm:$0xff] %v7332_v4 }
 0x41c   :  { %v7317_v17 = vadd.f32 %v2924_v62, %v2916_v5  ;;  %v7319_v3 = vadd.f32 %v2924_v62, %v2917_v52  ;;  %v7321_v20 = vadd.f32 %v2924_v62, %v2918_v43  ;;  %v7323_v35 = vadd.f32 %v2924_v62, %v2919_v25 }
 0x41d   :  { %v7326_v23 = vadd.f32 %v2924_v62, %v2920_v61  ;;  %v3427_v16 = vrot.slane %v7301_v6, %v9074_v46  ;;  %v3431_v55 = vrot.slane %v7303_v22, %v9074_v46  ;;  %v3435_v58 = vrot.slane %v7305_v42, %v9074_v46  ;;  %v9103_v61 = vld [vmem:[#allocation2_spill] sm:$0xff] }
 0x41e   :  { %v3439_v48 = vrot.slane %v7307_v12, %v9074_v46  ;;  %v3443_v30 = vrot.slane %v7309_v0, %v9074_v46  ;;  %v3447_v36 = vrot.slane %v7311_v32, %v9074_v46  ;;  %v3451_v27 = vrot.slane %v7313_v49, %v9074_v46 }
 0x41f   :  { %9098 = vst [vmem:[#allocation28_spill] sm:$0xff] %v7326_v23  ;;  %v3455_v8 = vrot.slane %v7315_v31, %v9074_v46  ;;  %v7346_v53 = vadd.f32 %v2939_v47, %v2924_v62  ;;  %v7355_v60 = vmul.f32 %v3427_v16, %v7332_v4  ;;  %v7358_v56 = vmul.f32 %v3431_v55, %v7332_v4 }
 0x420   :  { %v7361_v26 = vmul.f32 %v3435_v58, %v7332_v4  ;;  %v7364_v7 = vmul.f32 %v3439_v48, %v7332_v4  ;;  %v7367_v5 = vmul.f32 %v3443_v30, %v7332_v4  ;;  %v7370_v52 = vmul.f32 %v3447_v36, %v7332_v4 }
 0x421   :  { %9100 = vst [vmem:[#allocation26_spill] sm:$0xff] %v7346_v53  ;;  %v7373_v43 = vmul.f32 %v3451_v27, %v7332_v4  ;;  %v7376_v25 = vmul.f32 %v3455_v8, %v7332_v4  ;;  %v2948_v62 = vrot.slane %v7301_v6, %v9103_v61  ;;  %v2952_v47 = vrot.slane %v7303_v22, %v9103_v61 }
 0x422   :  { %v2956_v16 = vrot.slane %v7305_v42, %v9103_v61  ;;  %v2960_v55 = vrot.slane %v7307_v12, %v9103_v61  ;;  %v2964_v58 = vrot.slane %v7309_v0, %v9103_v61  ;;  %v2968_v48 = vrot.slane %v7311_v32, %v9103_v61 }
 0x423   :  { %9101 = vst [vmem:[#allocation27_spill] sm:$0xff] %v7373_v43  ;;  %9102 = vst [vmem:[#allocation24_spill] sm:$0xff] %v7376_v25  ;;  %v2972_v30 = vrot.slane %v7313_v49, %v9103_v61  ;;  %v2976_v36 = vrot.slane %v7315_v31, %v9103_v61  ;;  %v2980_v27 = vrot.slane %v7317_v17, %v9103_v61 }
 0x424   :  { %v2984_v8 = vrot.slane %v7319_v3, %v9103_v61  ;;  %v2988_v37 = vrot.slane %v7321_v20, %v9103_v61  ;;  %v2997_v50 = vmul.f32 %v2948_v62, %v7280_v29  ;;  %v2998_v9 = vmul.f32 %v2952_v47, %v7280_v29 }
 0x425   :  { %v2999_v28 = vmul.f32 %v2956_v16, %v7280_v29  ;;  %v3000_v15 = vmul.f32 %v2960_v55, %v7280_v29  ;;  %v3001_v14 = vmul.f32 %v2964_v58, %v7280_v29  ;;  %v3002_v24 = vmul.f32 %v2968_v48, %v7280_v29 }
 0x426   :  { %v3003_v34 = vmul.f32 %v2972_v30, %v7280_v29  ;;  %v3004_v41 = vmul.f32 %v2976_v36, %v7280_v29  ;;  %v3005_v33 = vmul.f32 %v2980_v27, %v7280_v29  ;;  %v3006_v11 = vmul.f32 %v2984_v8, %v7280_v29 }
 0x427   :  { %v3007_v62 = vmul.f32 %v2988_v37, %v7280_v29  ;;  %v3017_v47 = vrot.slane %v7301_v6, %v9104_v40  ;;  %v3021_v16 = vrot.slane %v7303_v22, %v9104_v40  ;;  %v3025_v55 = vrot.slane %v7305_v42, %v9104_v40 }
 0x428   :  { %v3029_v58 = vrot.slane %v7307_v12, %v9104_v40  ;;  %v3033_v48 = vrot.slane %v7309_v0, %v9104_v40  ;;  %v3037_v30 = vrot.slane %v7311_v32, %v9104_v40  ;;  %v3041_v37 = vrot.slane %v7313_v49, %v9104_v40 }
 0x429   :  { %v3045_v36 = vrot.slane %v7315_v31, %v9104_v40  ;;  %v3049_v27 = vrot.slane %v7317_v17, %v9104_v40  ;;  %v3053_v8 = vrot.slane %v7319_v3, %v9104_v40  ;;  %v3057_v54 = vrot.slane %v7321_v20, %v9104_v40 }
 0x42a   :  { %v3066_v2 = vmul.f32 %v3017_v47, %v7282_v44  ;;  %v3067_v45 = vmul.f32 %v3021_v16, %v7282_v44  ;;  %v3068_v51 = vmul.f32 %v3025_v55, %v7282_v44  ;;  %v3069_v38 = vmul.f32 %v3029_v58, %v7282_v44 }
 0x42b   :  { %v3070_v13 = vmul.f32 %v3033_v48, %v7282_v44  ;;  %v3071_v19 = vmul.f32 %v3037_v30, %v7282_v44  ;;  %v3072_v1 = vmul.f32 %v3041_v37, %v7282_v44  ;;  %v3073_v29 = vmul.f32 %v3045_v36, %v7282_v44 }
 0x42c   :  { %v3074_v53 = vmul.f32 %v3049_v27, %v7282_v44  ;;  %v3075_v40 = vmul.f32 %v3053_v8, %v7282_v44  ;;  %v3076_v47 = vmul.f32 %v3057_v54, %v7282_v44  ;;  %v3079_v61 = vadd.f32 %v3066_v2, %v2997_v50 }
 0x42d   :  { %v3080_v16 = vadd.f32 %v3067_v45, %v2998_v9  ;;  %v3081_v46 = vadd.f32 %v3068_v51, %v2999_v28  ;;  %v3082_v55 = vadd.f32 %v3069_v38, %v3000_v15  ;;  %v3083_v4 = vadd.f32 %v3070_v13, %v3001_v14 }
 0x42e   :  { %v3084_v58 = vadd.f32 %v3071_v19, %v3002_v24  ;;  %v3085_v63 = vadd.f32 %v3072_v1, %v3003_v34  ;;  %v3086_v48 = vadd.f32 %v3073_v29, %v3004_v41  ;;  %v3087_v25 = vadd.f32 %v3074_v53, %v3005_v33 }
 0x42f   :  { %v3088_v30 = vadd.f32 %v3075_v40, %v3006_v11  ;;  %v3089_v43 = vadd.f32 %v3076_v47, %v3007_v62  ;;  %v3099_v37 = vrot.slane %v7301_v6, %v9009_v59  ;;  %v3103_v36 = vrot.slane %v7303_v22, %v9009_v59 }
 0x430   :  { %v3107_v54 = vrot.slane %v7305_v42, %v9009_v59  ;;  %v3111_v51 = vrot.slane %v7307_v12, %v9009_v59  ;;  %v3115_v19 = vrot.slane %v7309_v0, %v9009_v59  ;;  %v3119_v1 = vrot.slane %v7311_v32, %v9009_v59 }
 0x431   :  { %v3123_v13 = vrot.slane %v7313_v49, %v9009_v59  ;;  %v3127_v38 = vrot.slane %v7315_v31, %v9009_v59  ;;  %v3131_v45 = vrot.slane %v7317_v17, %v9009_v59  ;;  %v3135_v2 = vrot.slane %v7319_v3, %v9009_v59 }
 0x432   :  { %v3139_v40 = vrot.slane %v7321_v20, %v9009_v59  ;;  %v3148_v11 = vmul.f32 %v3099_v37, %v7284_v57  ;;  %v3149_v33 = vmul.f32 %v3103_v36, %v7284_v57  ;;  %v3150_v41 = vmul.f32 %v3107_v54, %v7284_v57 }
 0x433   :  { %v3151_v34 = vmul.f32 %v3111_v51, %v7284_v57  ;;  %v3152_v24 = vmul.f32 %v3115_v19, %v7284_v57  ;;  %v3153_v14 = vmul.f32 %v3119_v1, %v7284_v57  ;;  %v3154_v50 = vmul.f32 %v3123_v13, %v7284_v57 }
 0x434   :  { %v3155_v29 = vmul.f32 %v3127_v38, %v7284_v57  ;;  %v3156_v53 = vmul.f32 %v3131_v45, %v7284_v57  ;;  %v3157_v15 = vmul.f32 %v3135_v2, %v7284_v57  ;;  %v3158_v28 = vmul.f32 %v3139_v40, %v7284_v57 }
 0x435   :  { %v3161_v9 = vadd.f32 %v3148_v11, %v3079_v61  ;;  %v3162_v62 = vadd.f32 %v3149_v33, %v3080_v16  ;;  %v3163_v27 = vadd.f32 %v3150_v41, %v3081_v46  ;;  %v3164_v8 = vadd.f32 %v3151_v34, %v3082_v55 }
 0x436   :  { %v3165_v47 = vadd.f32 %v3152_v24, %v3083_v4  ;;  %v3166_v37 = vadd.f32 %v3153_v14, %v3084_v58  ;;  %v3167_v36 = vadd.f32 %v3154_v50, %v3085_v63  ;;  %v3168_v54 = vadd.f32 %v3155_v29, %v3086_v48 }
 0x437   :  { %v3169_v51 = vadd.f32 %v3156_v53, %v3087_v25  ;;  %v3170_v19 = vadd.f32 %v3157_v15, %v3088_v30  ;;  %v3171_v1 = vadd.f32 %v3158_v28, %v3089_v43  ;;  %v3181_v13 = vrot.slane %v7301_v6, %v9010_v18 }
 0x438   :  { %v3185_v38 = vrot.slane %v7303_v22, %v9010_v18  ;;  %v3189_v45 = vrot.slane %v7305_v42, %v9010_v18  ;;  %v3193_v46 = vrot.slane %v7307_v12, %v9010_v18  ;;  %v3197_v4 = vrot.slane %v7309_v0, %v9010_v18 }
 0x439   :  { %v3201_v63 = vrot.slane %v7311_v32, %v9010_v18  ;;  %v3205_v43 = vrot.slane %v7313_v49, %v9010_v18  ;;  %v3209_v25 = vrot.slane %v7315_v31, %v9010_v18  ;;  %v3213_v61 = vrot.slane %v7317_v17, %v9010_v18 }
 0x43a   :  { %v3217_v16 = vrot.slane %v7319_v3, %v9010_v18  ;;  %v3221_v55 = vrot.slane %v7321_v20, %v9010_v18  ;;  %v3230_v58 = vmul.f32 %v3181_v13, %v7286_v39  ;;  %v3231_v48 = vmul.f32 %v3185_v38, %v7286_v39 }
 0x43b   :  { %v3232_v30 = vmul.f32 %v3189_v45, %v7286_v39  ;;  %v3233_v2 = vmul.f32 %v3193_v46, %v7286_v39  ;;  %v3234_v40 = vmul.f32 %v3197_v4, %v7286_v39  ;;  %v3235_v11 = vmul.f32 %v3201_v63, %v7286_v39 }
 0x43c   :  { %v3236_v33 = vmul.f32 %v3205_v43, %v7286_v39  ;;  %v3237_v41 = vmul.f32 %v3209_v25, %v7286_v39  ;;  %v3238_v34 = vmul.f32 %v3213_v61, %v7286_v39  ;;  %v3239_v24 = vmul.f32 %v3217_v16, %v7286_v39 }
 0x43d   :  { %v3240_v14 = vmul.f32 %v3221_v55, %v7286_v39  ;;  %v3243_v50 = vadd.f32 %v3230_v58, %v3161_v9  ;;  %v3244_v29 = vadd.f32 %v3231_v48, %v3162_v62  ;;  %v3245_v53 = vadd.f32 %v3232_v30, %v3163_v27  ;;  %v7516_v9 = vpop.permute.xlu1 %3257 }
 0x43e   :  { %v3246_v15 = vadd.f32 %v3233_v2, %v3164_v8  ;;  %v3247_v28 = vadd.f32 %v3234_v40, %v3165_v47  ;;  %v3248_v13 = vadd.f32 %v3235_v11, %v3166_v37  ;;  %v3249_v38 = vadd.f32 %v3236_v33, %v3167_v36 }
 0x43f   :  { %v3250_v45 = vadd.f32 %v3237_v41, %v3168_v54  ;;  %v3251_v46 = vadd.f32 %v3238_v34, %v3169_v51  ;;  %v3252_v4 = vadd.f32 %v3239_v24, %v3170_v19  ;;  %v3253_v63 = vadd.f32 %v3240_v14, %v3171_v1 }
 0x440   :  { %v3263_v43 = vrot.slane %v7301_v6, %v9011_v21  ;;  %v3267_v25 = vrot.slane %v7303_v22, %v9011_v21  ;;  %v3271_v61 = vrot.slane %v7305_v42, %v9011_v21  ;;  %v3275_v62 = vrot.slane %v7307_v12, %v9011_v21 }
 0x441   :  { %v3279_v27 = vrot.slane %v7309_v0, %v9011_v21  ;;  %v3283_v8 = vrot.slane %v7311_v32, %v9011_v21  ;;  %v3287_v47 = vrot.slane %v7313_v49, %v9011_v21  ;;  %v3291_v37 = vrot.slane %v7315_v31, %v9011_v21 }
 0x442   :  { %v3295_v36 = vrot.slane %v7317_v17, %v9011_v21  ;;  %v3299_v54 = vrot.slane %v7319_v3, %v9011_v21  ;;  %v3303_v51 = vrot.slane %v7321_v20, %v9011_v21  ;;  %v3307_v19 = vrot.slane %v7323_v35, %v9011_v21 }
 0x443   :  { %v3311_v1 = vrot.slane %v7326_v23, %v9011_v21  ;;  %v3312_v16 = vmul.f32 %v3263_v43, %v7516_v9  ;;  %v3313_v55 = vmul.f32 %v3267_v25, %v7516_v9  ;;  %v3314_v58 = vmul.f32 %v3271_v61, %v7516_v9 }
 0x444   :  { %v3315_v48 = vmul.f32 %v3275_v62, %v7516_v9  ;;  %v3316_v30 = vmul.f32 %v3279_v27, %v7516_v9  ;;  %v3317_v2 = vmul.f32 %v3283_v8, %v7516_v9  ;;  %v3318_v40 = vmul.f32 %v3287_v47, %v7516_v9 }
 0x445   :  { %v3319_v11 = vmul.f32 %v3291_v37, %v7516_v9  ;;  %v3320_v33 = vmul.f32 %v3295_v36, %v7516_v9  ;;  %v3321_v41 = vmul.f32 %v3299_v54, %v7516_v9  ;;  %v3322_v34 = vmul.f32 %v3303_v51, %v7516_v9 }
 0x446   :  { %v7550_v24 = vmul.f32 %v3307_v19, %v7516_v9  ;;  %v7553_v14 = vmul.f32 %v3311_v1, %v7516_v9  ;;  %v3325_v43 = vadd.f32 %v3312_v16, %v3243_v50  ;;  %v3326_v25 = vadd.f32 %v3313_v55, %v3244_v29  ;;  %v7561_v19 = vpop.permute.xlu1 %3339 }
 0x447   :  { %v3327_v61 = vadd.f32 %v3314_v58, %v3245_v53  ;;  %v3328_v62 = vadd.f32 %v3315_v48, %v3246_v15  ;;  %v3329_v27 = vadd.f32 %v3316_v30, %v3247_v28  ;;  %v3330_v8 = vadd.f32 %v3317_v2, %v3248_v13 }
 0x448   :  { %9105 = vst [vmem:[#allocation16_spill] sm:$0xff] %v7553_v14  ;;  %v3331_v47 = vadd.f32 %v3318_v40, %v3249_v38  ;;  %v3332_v37 = vadd.f32 %v3319_v11, %v3250_v45  ;;  %v3333_v23 = vadd.f32 %v3320_v33, %v3251_v46  ;;  %v3334_v36 = vadd.f32 %v3321_v41, %v3252_v4 }
 0x449   :  { %v7555_v39 = vadd.f32 %v3322_v34, %v3253_v63  ;;  %v3345_v54 = vrot.slane %v7301_v6, %v9018_v10  ;;  %v3349_v51 = vrot.slane %v7303_v22, %v9018_v10  ;;  %v3353_v50 = vrot.slane %v7305_v42, %v9018_v10 }
 0x44a   :  { %v3357_v29 = vrot.slane %v7307_v12, %v9018_v10  ;;  %v3361_v53 = vrot.slane %v7309_v0, %v9018_v10  ;;  %v3365_v15 = vrot.slane %v7311_v32, %v9018_v10  ;;  %v3369_v28 = vrot.slane %v7313_v49, %v9018_v10 }
 0x44b   :  { %v3373_v13 = vrot.slane %v7315_v31, %v9018_v10  ;;  %v3377_v38 = vrot.slane %v7317_v17, %v9018_v10  ;;  %v3381_v45 = vrot.slane %v7319_v3, %v9018_v10  ;;  %v3385_v46 = vrot.slane %v7321_v20, %v9018_v10 }
 0x44c   :  { %v3389_v4 = vrot.slane %v7323_v35, %v9018_v10  ;;  %v3394_v63 = vmul.f32 %v3345_v54, %v7561_v19  ;;  %v3395_v1 = vmul.f32 %v3349_v51, %v7561_v19  ;;  %v3396_v16 = vmul.f32 %v3353_v50, %v7561_v19 }
 0x44d   :  { %v3397_v55 = vmul.f32 %v3357_v29, %v7561_v19  ;;  %v3398_v58 = vmul.f32 %v3361_v53, %v7561_v19  ;;  %v3399_v48 = vmul.f32 %v3365_v15, %v7561_v19  ;;  %v3400_v30 = vmul.f32 %v3369_v28, %v7561_v19 }
 0x44e   :  { %v3401_v2 = vmul.f32 %v3373_v13, %v7561_v19  ;;  %v3402_v40 = vmul.f32 %v3377_v38, %v7561_v19  ;;  %v3403_v11 = vmul.f32 %v3381_v45, %v7561_v19  ;;  %v7594_v33 = vmul.f32 %v3385_v46, %v7561_v19 }
 0x44f   :  { %v7597_v41 = vmul.f32 %v3389_v4, %v7561_v19  ;;  %v3407_v34 = vadd.f32 %v3394_v63, %v3325_v43  ;;  %v3408_v54 = vadd.f32 %v3395_v1, %v3326_v25  ;;  %v3409_v51 = vadd.f32 %v3396_v16, %v3327_v61  ;;  %v9106_v61 = vld [vmem:[#allocation27_spill] sm:$0xff] }
 0x450   :  { %v3410_v50 = vadd.f32 %v3397_v55, %v3328_v62  ;;  %v3411_v29 = vadd.f32 %v3398_v58, %v3329_v27  ;;  %v3412_v53 = vadd.f32 %v3399_v48, %v3330_v8  ;;  %v3413_v15 = vadd.f32 %v3400_v30, %v3331_v47  ;;  %v9107_v27 = vld [vmem:[#allocation24_spill] sm:$0xff]  ;;  %v9108_v47 = vld [vmem:[#allocation10_spill] sm:$0xff] }
 0x451   :  { %v3414_v28 = vadd.f32 %v3401_v2, %v3332_v37  ;;  %v7599_v14 = vadd.f32 %v3402_v40, %v3333_v23  ;;  %v7601_v13 = vadd.f32 %v3403_v11, %v3334_v36  ;;  %v3489_v38 = vadd.f32 %v7355_v60, %v3407_v34  ;;  %v7611_v23 = vpop.permute.xlu1 %3503 }
 0x452   :  { %v3490_v45 = vadd.f32 %v7358_v56, %v3408_v54  ;;  %v3491_v46 = vadd.f32 %v7361_v26, %v3409_v51  ;;  %v3492_v4 = vadd.f32 %v7364_v7, %v3410_v50  ;;  %v3493_v43 = vadd.f32 %v7367_v5, %v3411_v29  ;;  %v9109_v51 = vld [vmem:[#allocation29_spill] sm:$0xff]  ;;  %v9110_v50 = vld [vmem:[#allocation7_spill] sm:$0xff] }
 0x453   :  { %v3494_v25 = vadd.f32 %v7370_v52, %v3412_v53  ;;  %v3495_v62 = vadd.f32 %v9106_v61, %v3413_v15  ;;  %v3496_v8 = vadd.f32 %v9107_v27, %v3414_v28  ;;  %v3509_v37 = vrot.slane %v7301_v6, %v9108_v47  ;;  %v9112_v28 = vld [vmem:[#allocation2_spill] sm:$0xff] }
 0x454   :  { %v3513_v60 = vrot.slane %v7303_v22, %v9108_v47  ;;  %v3517_v56 = vrot.slane %v7305_v42, %v9108_v47  ;;  %v3521_v26 = vrot.slane %v7307_v12, %v9108_v47  ;;  %v3525_v7 = vrot.slane %v7309_v0, %v9108_v47 }
 0x455   :  { %v3529_v5 = vrot.slane %v7311_v32, %v9108_v47  ;;  %v3533_v52 = vrot.slane %v7313_v49, %v9108_v47  ;;  %v3537_v6 = vrot.slane %v7315_v31, %v9108_v47  ;;  %v3541_v22 = vrot.slane %v7317_v17, %v9108_v47  ;;  %v7667_v15 = vpop.permute.xlu1 %3585 }
 0x456   :  { %v3545_v42 = vrot.slane %v7319_v3, %v9108_v47  ;;  %v3558_v12 = vmul.f32 %v3509_v37, %v7611_v23  ;;  %v3559_v36 = vmul.f32 %v3513_v60, %v7611_v23  ;;  %v3560_v0 = vmul.f32 %v3517_v56, %v7611_v23  ;;  %v9117_v60 = vld [vmem:[#allocation25_spill] sm:$0xff] }
 0x457   :  { %v3561_v32 = vmul.f32 %v3521_v26, %v7611_v23  ;;  %v3562_v63 = vmul.f32 %v3525_v7, %v7611_v23  ;;  %v3563_v49 = vmul.f32 %v3529_v5, %v7611_v23  ;;  %v3564_v31 = vmul.f32 %v3533_v52, %v7611_v23  ;;  %v9118_v52 = vld [vmem:[#allocation30_spill] sm:$0xff] }
 0x458   :  { %v3565_v1 = vmul.f32 %v3537_v6, %v7611_v23  ;;  %v7642_v16 = vmul.f32 %v3541_v22, %v7611_v23  ;;  %v7645_v55 = vmul.f32 %v3545_v42, %v7611_v23  ;;  %v7647_v58 = vadd.f32 %v3558_v12, %v3489_v38  ;;  %v9113_v38 = vld [vmem:[#allocation26_spill] sm:$0xff] }
 0x459   :  { %v7649_v48 = vadd.f32 %v3559_v36, %v3490_v45  ;;  %v7651_v30 = vadd.f32 %v3560_v0, %v3491_v46  ;;  %v7653_v2 = vadd.f32 %v3561_v32, %v3492_v4  ;;  %v7655_v40 = vadd.f32 %v3562_v63, %v3493_v43  ;;  %v9114_v46 = vld [vmem:[#allocation4_spill] sm:$0xff] }
 0x45a   :  { %v7657_v11 = vadd.f32 %v3563_v49, %v3494_v25  ;;  %v7659_v34 = vadd.f32 %v3564_v31, %v3495_v62  ;;  %v7661_v54 = vadd.f32 %v3565_v1, %v3496_v8  ;;  %v9111_v29 = vrot.slane %v7317_v17, %v9110_v50  ;;  %v9119_v0 = vld [vmem:[#allocation28_spill] sm:$0xff] }
 0x45b   :  { %v3604_v45 = vrot.slane %v9113_v38, %v9112_v28  ;;  %v3609_v4 = vrot.slane %v9113_v38, %v9114_v46  ;;  %v3615_v43 = vrot.slane %v9113_v38, %v9009_v59  ;;  %v3621_v25 = vrot.slane %v9113_v38, %v9010_v18 }
 0x45c   :  { %v3484_v53 = vmul.f32 %v9111_v29, %v9109_v51  ;;  %v9115_v61 = vrot.slane %v7319_v3, %v9110_v50  ;;  %v9116_v62 = vrot.slane %v7321_v20, %v9110_v50  ;;  %v3627_v8 = vrot.slane %v9113_v38, %v9011_v21  ;;  %v7713_v29 = vpop.permute.xlu1 %3721 }
 0x45d   :  { %v3633_v37 = vrot.slane %v9113_v38, %v9018_v10  ;;  %v3605_v56 = vmul.f32 %v3604_v45, %v9117_v60  ;;  %v3610_v26 = vmul.f32 %v3609_v4, %v7282_v44  ;;  %v3639_v7 = vrot.slane %v9113_v38, %v9110_v50 }
 0x45e   :  { %v3485_v17 = vmul.f32 %v9115_v61, %v9109_v51  ;;  %v3486_v27 = vmul.f32 %v9116_v62, %v9109_v51  ;;  %v3645_v3 = vrot.slane %v9113_v38, %v9108_v47  ;;  %v3616_v5 = vmul.f32 %v3615_v43, %v7284_v57 }
 0x45f   :  { %v3622_v6 = vmul.f32 %v3621_v25, %v9118_v52  ;;  %v3628_v22 = vmul.f32 %v3627_v8, %v7516_v9  ;;  %v3634_v42 = vmul.f32 %v3633_v37, %v7561_v19  ;;  %v3611_v12 = vadd.f32 %v3610_v26, %v3605_v56 }
 0x460   :  { %v2992_v36 = vrot.slane %v7323_v35, %v9112_v28  ;;  %v2996_v32 = vrot.slane %v9119_v0, %v9112_v28  ;;  %v3061_v63 = vrot.slane %v7323_v35, %v9114_v46  ;;  %v3065_v49 = vrot.slane %v9119_v0, %v9114_v46 }
 0x461   :  { %v3143_v31 = vrot.slane %v7323_v35, %v9009_v59  ;;  %v3147_v9 = vrot.slane %v9119_v0, %v9009_v59  ;;  %v3225_v1 = vrot.slane %v7323_v35, %v9010_v18  ;;  %v3617_v38 = vadd.f32 %v3616_v5, %v3611_v12 }
 0x462   :  { %v3008_v45 = vmul.f32 %v2992_v36, %v9117_v60  ;;  %v3009_v4 = vmul.f32 %v2996_v32, %v9117_v60  ;;  %v3077_v43 = vmul.f32 %v3061_v63, %v7282_v44  ;;  %v3640_v25 = vmul.f32 %v3639_v7, %v9109_v51 }
 0x463   :  { %v3646_v61 = vmul.f32 %v3645_v3, %v7611_v23  ;;  %v3078_v62 = vmul.f32 %v3065_v49, %v7282_v44  ;;  %v3229_v8 = vrot.slane %v9119_v0, %v9010_v18  ;;  %v3623_v37 = vadd.f32 %v3622_v6, %v3617_v38 }
 0x464   :  { %v3090_v56 = vadd.f32 %v3077_v43, %v3008_v45  ;;  %v3159_v26 = vmul.f32 %v3143_v31, %v7284_v57  ;;  %v3393_v5 = vrot.slane %v9119_v0, %v9018_v10  ;;  %v3160_v60 = vmul.f32 %v3147_v9, %v7284_v57  ;;  %v7736_v57 = vpop.permute.xlu1 %3803  ;;  %v9120_v45 = vld [vmem:[#allocation16_spill] sm:$0xff] }
 0x465   :  { %v3091_v12 = vadd.f32 %v3078_v62, %v3009_v4  ;;  %v3241_v36 = vmul.f32 %v3225_v1, %v9118_v52  ;;  %v3417_v7 = vadd.f32 %v7594_v33, %v7555_v39  ;;  %v3629_v3 = vadd.f32 %v3628_v22, %v3623_v37 }
 0x466   :  { %v3172_v44 = vadd.f32 %v3159_v26, %v3090_v56  ;;  %v3242_v32 = vmul.f32 %v3229_v8, %v9118_v52  ;;  %v3406_v6 = vmul.f32 %v3393_v5, %v7561_v19  ;;  %v3471_v49 = vrot.slane %v7323_v35, %v9110_v50 }
 0x467   :  { %v3173_v63 = vadd.f32 %v3160_v60, %v3091_v12  ;;  %v3497_v31 = vadd.f32 %v3484_v53, %v7599_v14  ;;  %v3498_v38 = vadd.f32 %v3485_v17, %v7601_v13  ;;  %v3635_v9 = vadd.f32 %v3634_v42, %v3629_v3 }
 0x468   :  { %v3254_v1 = vadd.f32 %v3241_v36, %v3172_v44  ;;  %v3475_v39 = vrot.slane %v9119_v0, %v9110_v50  ;;  %v3499_v33 = vadd.f32 %v3486_v27, %v3417_v7  ;;  %v3549_v19 = vrot.slane %v7321_v20, %v9108_v47  ;;  %v7759_v37 = vpop.permute.xlu1 %3967 }
 0x469   :  { %v3255_v22 = vadd.f32 %v3242_v32, %v3173_v63  ;;  %v3553_v52 = vrot.slane %v7323_v35, %v9108_v47  ;;  %v3557_v14 = vrot.slane %v9119_v0, %v9108_v47  ;;  %v3641_v53 = vadd.f32 %v3640_v25, %v3635_v9  ;;  %v9121_v25 = vld [vmem:[#allocation8_spill] sm:$0xff] }
 0x46a   :  { %v3336_v13 = vadd.f32 %v7550_v24, %v3254_v1  ;;  %v3579_v17 = vadd.f32 %v7642_v16, %v3497_v31  ;;  %v3580_v42 = vadd.f32 %v7645_v55, %v3498_v38  ;;  %v3568_v27 = vmul.f32 %v3549_v19, %v7611_v23  ;;  %v7757_v55 = vpop.permute.xlu0 %3652 }
 0x46b   :  { %v3337_v4 = vadd.f32 %v9120_v45, %v3255_v22  ;;  %v3569_v43 = vmul.f32 %v3553_v52, %v7611_v23  ;;  %v3570_v20 = vmul.f32 %v3557_v14, %v7611_v23  ;;  %v3647_v62 = vadd.f32 %v3646_v61, %v3641_v53 }
 0x46c   :  { %v3418_v35 = vadd.f32 %v7597_v41, %v3336_v13  ;;  %v3487_v0 = vmul.f32 %v3471_v49, %v9109_v51  ;;  %vm3649_vm5 = vcmp.eq.s32.totalorder %v9121_v25, 4  ;;  %v3488_v16 = vmul.f32 %v3475_v39, %v9109_v51  ;;  %v7772_v32 = vpop.permute.xlu1 %4049 }
 0x46d   :  { %v3419_v24 = vadd.f32 %v3406_v6, %v3337_v4  ;;  %v3581_v8 = vadd.f32 %v3568_v27, %v3499_v33  ;;  %v3648_v56 = vadd.f32 %v3647_v62, %v7667_v15  ;;  %9122 = vst [vmem:[#allocation27_spill] sm:$0xff] %v7772_v32  ;;  %v7780_v39 = vadd.f32 %v7667_v15, %v7647_v58 }
 0x46e   :  { %v3500_v26 = vadd.f32 %v3487_v0, %v3418_v35  ;;  %v7770_v44 = vpop.permute.xlu0 %3885  ;;  %v7784_v33 = vadd.f32 %v7667_v15, %v7649_v48  ;;  %v7788_v22 = vadd.f32 %v7667_v15, %v7651_v30  ;;  %v7792_v19 = vadd.f32 %v7667_v15, %v7653_v2 }
 0x46f   :  { %v3501_v5 = vadd.f32 %v3488_v16, %v3419_v24  ;;  %v3650_v23 = vsel %vm3649_vm5, %v7667_v15, %v3648_v56  ;;  %v7798_v58 = vadd.f32 %v7667_v15, %v7655_v40  ;;  %v7806_v30 = vadd.f32 %v7667_v15, %v7657_v11 }
 0x470   :  { %v3582_v61 = vadd.f32 %v3569_v43, %v3500_v26  ;;  %v4314_v41 = vrot.slane %v3650_v23, %v9112_v28  ;;  %v4319_v12 = vrot.slane %v3650_v23, %v9114_v46  ;;  %v4325_v60 = vrot.slane %v3650_v23, %v9009_v59  ;;  %v7802_v48 = vpop.permute.xlu1 %4213 }
 0x471   :  { %v4331_v3 = vrot.slane %v3650_v23, %v9010_v18  ;;  %v4337_v63 = vrot.slane %v3650_v23, %v9011_v21  ;;  %v3583_v49 = vadd.f32 %v3570_v20, %v3501_v5  ;;  %v4343_v1 = vrot.slane %v3650_v23, %v9018_v10  ;;  %9124 = vst [vmem:[#allocation29_spill] sm:$0xff] %v7802_v48 }
 0x472   :  { %v4315_v51 = vmul.f32 %v4314_v41, %v7757_v55  ;;  %v4320_v36 = vmul.f32 %v4319_v12, %v7713_v29  ;;  %v4326_v7 = vmul.f32 %v4325_v60, %v7736_v57  ;;  %v4349_v53 = vrot.slane %v3650_v23, %v9110_v50  ;;  %v7800_v13 = vpop.permute.xlu0 %4131 }
 0x473   :  { %v4332_v38 = vmul.f32 %v4331_v3, %v7770_v44  ;;  %v4338_v9 = vmul.f32 %v4337_v63, %v7759_v37  ;;  %v4344_v14 = vmul.f32 %v4343_v1, %v7772_v32  ;;  %9123 = vst [vmem:[#allocation24_spill] sm:$0xff] %v7800_v13  ;;  %v7810_v2 = vadd.f32 %v7667_v15, %v7659_v34 }
 0x474   :  { %v4321_v6 = vadd.f32 %v4320_v36, %v4315_v51  ;;  %v7814_v45 = vadd.f32 %v7667_v15, %v7661_v54  ;;  %v7817_v4 = vadd.f32 %v7667_v15, %v3579_v17  ;;  %v4355_v27 = vrot.slane %v3650_v23, %v9108_v47  ;;  %v7853_v23 = vpop.permute.xlu1 %4295 }
 0x475   :  { %v7821_v43 = vadd.f32 %v7667_v15, %v3580_v42  ;;  %v7824_v11 = vadd.f32 %v7667_v15, %v3581_v8  ;;  %v7827_v20 = vadd.f32 %v7667_v15, %v3582_v61  ;;  %v3658_v34 = vrot.slane %v7780_v39, %v9112_v28  ;;  %9125 = vst [vmem:[#allocation26_spill] sm:$0xff] %v7853_v23 }
 0x476   :  { %v4327_v31 = vadd.f32 %v4326_v7, %v4321_v6  ;;  %v3662_v54 = vrot.slane %v7784_v33, %v9112_v28  ;;  %v3666_v17 = vrot.slane %v7788_v22, %v9112_v28  ;;  %v4350_v35 = vmul.f32 %v4349_v53, %v7800_v13 }
 0x477   :  { %v4356_v42 = vmul.f32 %v4355_v27, %v7802_v48  ;;  %v7838_v0 = vadd.f32 %v7667_v15, %v3583_v49  ;;  %v3670_v24 = vrot.slane %v7792_v19, %v9112_v28  ;;  %v3674_v16 = vrot.slane %v7798_v58, %v9112_v28 }
 0x478   :  { %v4333_v52 = vadd.f32 %v4332_v38, %v4327_v31  ;;  %v3678_v8 = vrot.slane %v7806_v30, %v9112_v28  ;;  %v3682_v56 = vrot.slane %v7810_v2, %v9112_v28  ;;  %vm4359_vm6 = vcmp.eq.s32.totalorder %v9121_v25, 5 }
 0x479   :  { %v3686_v5 = vrot.slane %v7814_v45, %v9112_v28  ;;  %v3690_v15 = vrot.slane %v7817_v4, %v9112_v28  ;;  %v3694_v61 = vrot.slane %v7821_v43, %v9112_v28  ;;  %v3698_v41 = vrot.slane %v7824_v11, %v9112_v28 }
 0x47a   :  { %v4339_v40 = vadd.f32 %v4338_v9, %v4333_v52  ;;  %v3702_v12 = vrot.slane %v7827_v20, %v9112_v28  ;;  %v3707_v60 = vmul.f32 %v3658_v34, %v7757_v55  ;;  %v3706_v36 = vrot.slane %v7838_v0, %v9112_v28  ;;  %v7874_v9 = vld [vmem:[%s8863_s5 + $0x2] ss:$0 sm:$0xff] }
 0x47b   :  { %v3708_v7 = vmul.f32 %v3662_v54, %v7757_v55  ;;  %v3709_v3 = vmul.f32 %v3666_v17, %v7757_v55  ;;  %v3710_v6 = vmul.f32 %v3670_v24, %v7757_v55  ;;  %v3711_v63 = vmul.f32 %v3674_v16, %v7757_v55  ;;  %9126 = vst [vmem:[#allocation25_spill] sm:$0xff] %v7874_v9 }
 0x47c   :  { %v4345_v62 = vadd.f32 %v4344_v14, %v4339_v40  ;;  %v3712_v49 = vmul.f32 %v3678_v8, %v7757_v55  ;;  %v3713_v31 = vmul.f32 %v3682_v56, %v7757_v55  ;;  %v3714_v1 = vmul.f32 %v3686_v5, %v7757_v55 }
 0x47d   :  { %v3727_v52 = vrot.slane %v7780_v39, %v9114_v46  ;;  %v3731_v14 = vrot.slane %v7784_v33, %v9114_v46  ;;  %v3735_v53 = vrot.slane %v7788_v22, %v9114_v46  ;;  %v3739_v40 = vrot.slane %v7792_v19, %v9114_v46 }
 0x47e   :  { %v4351_v26 = vadd.f32 %v4350_v35, %v4345_v62  ;;  %v3743_v27 = vrot.slane %v7798_v58, %v9114_v46  ;;  %v3747_v34 = vrot.slane %v7806_v30, %v9114_v46  ;;  %v3751_v17 = vrot.slane %v7810_v2, %v9114_v46 }
 0x47f   :  { %v3755_v62 = vrot.slane %v7814_v45, %v9114_v46  ;;  %v3759_v35 = vrot.slane %v7817_v4, %v9114_v46  ;;  %v3715_v24 = vmul.f32 %v3690_v15, %v7757_v55  ;;  %v3716_v16 = vmul.f32 %v3694_v61, %v7757_v55 }
 0x480   :  { %v4357_v51 = vadd.f32 %v4356_v42, %v4351_v26  ;;  %v3763_v25 = vrot.slane %v7821_v43, %v9114_v46  ;;  %v3767_v8 = vrot.slane %v7824_v11, %v9114_v46  ;;  %v3771_v56 = vrot.slane %v7827_v20, %v9114_v46 }
 0x481   :  { %v3775_v26 = vrot.slane %v7838_v0, %v9114_v46  ;;  %v3776_v5 = vmul.f32 %v3727_v52, %v7713_v29  ;;  %v3778_v15 = vmul.f32 %v3735_v53, %v7713_v29  ;;  %v3779_v61 = vmul.f32 %v3739_v40, %v7713_v29 }
 0x482   :  { %v4358_v38 = vadd.f32 %v4357_v51, %v7853_v23  ;;  %v3777_v51 = vmul.f32 %v3731_v14, %v7713_v29  ;;  %v3781_v28 = vmul.f32 %v3747_v34, %v7713_v29  ;;  %v3717_v46 = vmul.f32 %v3698_v41, %v7757_v55 }
 0x483   :  { %v3718_v52 = vmul.f32 %v3702_v12, %v7757_v55  ;;  %v3719_v14 = vmul.f32 %v3706_v36, %v7757_v55  ;;  %v3785_v53 = vmul.f32 %v3763_v25, %v7713_v29  ;;  %v3786_v40 = vmul.f32 %v3767_v8, %v7713_v29 }
 0x484   :  { %v7892_v54 = vsel %vm4359_vm6, %v7853_v23, %v4358_v38  ;;  %v3780_v38 = vmul.f32 %v3743_v27, %v7713_v29  ;;  %v3784_v23 = vmul.f32 %v3759_v35, %v7713_v29  ;;  %v3787_v27 = vmul.f32 %v3771_v56, %v7713_v29 }
 0x485   :  { %9127 = vst [vmem:[#allocation30_spill] sm:$0xff] %v7892_v54  ;;  %v4394_v42 = vmul.f32 %v7874_v9, %v7892_v54  ;;  %v3782_v9 = vmul.f32 %v3751_v17, %v7713_v29  ;;  %v3783_v54 = vmul.f32 %v3755_v62, %v7713_v29  ;;  %v3788_v34 = vmul.f32 %v3775_v26, %v7713_v29 }
 0x486   :  { %v3790_v17 = vadd.f32 %v3777_v51, %v3708_v7  ;;  %v3791_v48 = vadd.f32 %v3778_v15, %v3709_v3  ;;  %v3792_v62 = vadd.f32 %v3779_v61, %v3710_v6  ;;  %v3793_v47 = vadd.f32 %v3780_v38, %v3711_v63 }
 0x487   :  { %4395 = vadd.xlane.f32.xlu1 %v4394_v42  ;;  %v3789_v42 = vadd.f32 %v3776_v5, %v3707_v60  ;;  %v3794_v35 = vadd.f32 %v3781_v28, %v3712_v49  ;;  %v3795_v13 = vadd.f32 %v3782_v9, %v3713_v31  ;;  %v3796_v41 = vadd.f32 %v3783_v54, %v3714_v1 }
 0x488   :  { %v3797_v50 = vadd.f32 %v3784_v23, %v3715_v24  ;;  %v3798_v12 = vadd.f32 %v3785_v53, %v3716_v16  ;;  %v3809_v55 = vrot.slane %v7780_v39, %v9009_v59  ;;  %v3813_v36 = vrot.slane %v7784_v33, %v9009_v59 }
 0x489   :  { %v3817_v25 = vrot.slane %v7788_v22, %v9009_v59  ;;  %v3821_v29 = vrot.slane %v7792_v19, %v9009_v59  ;;  %v3825_v60 = vrot.slane %v7798_v58, %v9009_v59  ;;  %v3829_v28 = vrot.slane %v7806_v30, %v9009_v59 }
 0x48a   :  { %v3833_v23 = vrot.slane %v7810_v2, %v9009_v59  ;;  %v3837_v7 = vrot.slane %v7814_v45, %v9009_v59  ;;  %v3841_v3 = vrot.slane %v7817_v4, %v9009_v59  ;;  %v3845_v6 = vrot.slane %v7821_v43, %v9009_v59 }
 0x48b   :  { %v3849_v63 = vrot.slane %v7824_v11, %v9009_v59  ;;  %v3853_v49 = vrot.slane %v7827_v20, %v9009_v59  ;;  %v3857_v31 = vrot.slane %v7838_v0, %v9009_v59  ;;  %v3858_v9 = vmul.f32 %v3809_v55, %v7736_v57 }
 0x48c   :  { %v3859_v1 = vmul.f32 %v3813_v36, %v7736_v57  ;;  %v3860_v54 = vmul.f32 %v3817_v25, %v7736_v57  ;;  %v3861_v24 = vmul.f32 %v3821_v29, %v7736_v57  ;;  %v3862_v16 = vmul.f32 %v3825_v60, %v7736_v57 }
 0x48d   :  { %v3863_v8 = vmul.f32 %v3829_v28, %v7736_v57  ;;  %v3864_v56 = vmul.f32 %v3833_v23, %v7736_v57  ;;  %v3865_v26 = vmul.f32 %v3837_v7, %v7736_v57  ;;  %v3866_v5 = vmul.f32 %v3841_v3, %v7736_v57 }
 0x48e   :  { %v3867_v51 = vmul.f32 %v3845_v6, %v7736_v57  ;;  %v3799_v15 = vadd.f32 %v3786_v40, %v3717_v46  ;;  %v3800_v61 = vadd.f32 %v3787_v27, %v3718_v52  ;;  %v3801_v38 = vadd.f32 %v3788_v34, %v3719_v14 }
 0x48f   :  { %v3868_v53 = vmul.f32 %v3849_v63, %v7736_v57  ;;  %v3869_v55 = vmul.f32 %v3853_v49, %v7736_v57  ;;  %v3870_v36 = vmul.f32 %v3857_v31, %v7736_v57  ;;  %v3871_v25 = vadd.f32 %v3858_v9, %v3789_v42 }
 0x490   :  { %v3872_v29 = vadd.f32 %v3859_v1, %v3790_v17  ;;  %v3873_v60 = vadd.f32 %v3860_v54, %v3791_v48  ;;  %v3874_v28 = vadd.f32 %v3861_v24, %v3792_v62  ;;  %v3875_v23 = vadd.f32 %v3862_v16, %v3793_v47 }
 0x491   :  { %v3876_v59 = vadd.f32 %v3863_v8, %v3794_v35  ;;  %v3877_v7 = vadd.f32 %v3864_v56, %v3795_v13  ;;  %v3878_v32 = vadd.f32 %v3865_v26, %v3796_v41  ;;  %v3879_v3 = vadd.f32 %v3866_v5, %v3797_v50 }
 0x492   :  { %v3880_v10 = vadd.f32 %v3867_v51, %v3798_v12  ;;  %v3891_v46 = vrot.slane %v7780_v39, %v9010_v18  ;;  %v3895_v52 = vrot.slane %v7784_v33, %v9010_v18  ;;  %v3899_v14 = vrot.slane %v7788_v22, %v9010_v18 }
 0x493   :  { %v3903_v57 = vrot.slane %v7792_v19, %v9010_v18  ;;  %v3907_v47 = vrot.slane %v7798_v58, %v9010_v18  ;;  %v3911_v13 = vrot.slane %v7806_v30, %v9010_v18  ;;  %v3915_v50 = vrot.slane %v7810_v2, %v9010_v18 }
 0x494   :  { %v3919_v48 = vrot.slane %v7814_v45, %v9010_v18  ;;  %v3923_v40 = vrot.slane %v7817_v4, %v9010_v18  ;;  %v3927_v27 = vrot.slane %v7821_v43, %v9010_v18  ;;  %v3931_v34 = vrot.slane %v7824_v11, %v9010_v18 }
 0x495   :  { %v3935_v42 = vrot.slane %v7827_v20, %v9010_v18  ;;  %v3881_v17 = vadd.f32 %v3868_v53, %v3799_v15  ;;  %v3882_v62 = vadd.f32 %v3869_v55, %v3800_v61  ;;  %v3883_v35 = vadd.f32 %v3870_v36, %v3801_v38 }
 0x496   :  { %v3939_v41 = vrot.slane %v7838_v0, %v9010_v18  ;;  %v3940_v12 = vmul.f32 %v3891_v46, %v7770_v44  ;;  %v3941_v6 = vmul.f32 %v3895_v52, %v7770_v44  ;;  %v3942_v63 = vmul.f32 %v3899_v14, %v7770_v44 }
 0x497   :  { %v3943_v49 = vmul.f32 %v3903_v57, %v7770_v44  ;;  %v3944_v31 = vmul.f32 %v3907_v47, %v7770_v44  ;;  %v3945_v9 = vmul.f32 %v3911_v13, %v7770_v44  ;;  %v3946_v1 = vmul.f32 %v3915_v50, %v7770_v44 }
 0x498   :  { %v3947_v54 = vmul.f32 %v3919_v48, %v7770_v44  ;;  %v3948_v24 = vmul.f32 %v3923_v40, %v7770_v44  ;;  %v3949_v16 = vmul.f32 %v3927_v27, %v7770_v44  ;;  %v3950_v8 = vmul.f32 %v3931_v34, %v7770_v44 }
 0x499   :  { %v3951_v56 = vmul.f32 %v3935_v42, %v7770_v44  ;;  %v3952_v26 = vmul.f32 %v3939_v41, %v7770_v44  ;;  %v3953_v5 = vadd.f32 %v3940_v12, %v3871_v25  ;;  %v3954_v51 = vadd.f32 %v3941_v6, %v3872_v29 }
 0x49a   :  { %v3955_v15 = vadd.f32 %v3942_v63, %v3873_v60  ;;  %v3956_v61 = vadd.f32 %v3943_v49, %v3874_v28  ;;  %v3957_v38 = vadd.f32 %v3944_v31, %v3875_v23  ;;  %v3958_v53 = vadd.f32 %v3945_v9, %v3876_v59 }
 0x49b   :  { %v3959_v55 = vadd.f32 %v3946_v1, %v3877_v7  ;;  %v3960_v36 = vadd.f32 %v3947_v54, %v3878_v32  ;;  %v3961_v46 = vadd.f32 %v3948_v24, %v3879_v3  ;;  %v3962_v52 = vadd.f32 %v3949_v16, %v3880_v10 }
 0x49c   :  { %v3963_v14 = vadd.f32 %v3950_v8, %v3881_v17  ;;  %v3973_v57 = vrot.slane %v7780_v39, %v9011_v21  ;;  %v3977_v47 = vrot.slane %v7784_v33, %v9011_v21  ;;  %v3981_v44 = vrot.slane %v7788_v22, %v9011_v21 }
 0x49d   :  { %v3985_v25 = vrot.slane %v7792_v19, %v9011_v21  ;;  %v3989_v59 = vrot.slane %v7798_v58, %v9011_v21  ;;  %v3993_v32 = vrot.slane %v7806_v30, %v9011_v21  ;;  %v3997_v10 = vrot.slane %v7810_v2, %v9011_v21 }
 0x49e   :  { %v4001_v29 = vrot.slane %v7814_v45, %v9011_v21  ;;  %v4005_v60 = vrot.slane %v7817_v4, %v9011_v21  ;;  %v4009_v28 = vrot.slane %v7821_v43, %v9011_v21  ;;  %v4013_v23 = vrot.slane %v7824_v11, %v9011_v21 }
 0x49f   :  { %v4017_v7 = vrot.slane %v7827_v20, %v9011_v21  ;;  %v4021_v3 = vrot.slane %v7838_v0, %v9011_v21  ;;  %v4022_v13 = vmul.f32 %v3973_v57, %v7759_v37  ;;  %v4023_v50 = vmul.f32 %v3977_v47, %v7759_v37 }
 0x4a0   :  { %v4024_v48 = vmul.f32 %v3981_v44, %v7759_v37  ;;  %v4025_v40 = vmul.f32 %v3985_v25, %v7759_v37  ;;  %v4026_v27 = vmul.f32 %v3989_v59, %v7759_v37  ;;  %v4027_v34 = vmul.f32 %v3993_v32, %v7759_v37 }
 0x4a1   :  { %v4028_v42 = vmul.f32 %v3997_v10, %v7759_v37  ;;  %v4029_v17 = vmul.f32 %v4001_v29, %v7759_v37  ;;  %v4030_v41 = vmul.f32 %v4005_v60, %v7759_v37  ;;  %v4031_v12 = vmul.f32 %v4009_v28, %v7759_v37  ;;  %v9128_v10 = vld [vmem:[#allocation5_spill] sm:$0xff] }
 0x4a2   :  { %v4032_v6 = vmul.f32 %v4013_v23, %v7759_v37  ;;  %v3964_v63 = vadd.f32 %v3951_v56, %v3882_v62  ;;  %v3965_v49 = vadd.f32 %v3952_v26, %v3883_v35  ;;  %v4033_v31 = vmul.f32 %v4017_v7, %v7759_v37 }
 0x4a3   :  { %v4034_v9 = vmul.f32 %v4021_v3, %v7759_v37  ;;  %v4035_v1 = vadd.f32 %v4022_v13, %v3953_v5  ;;  %v4036_v54 = vadd.f32 %v4023_v50, %v3954_v51  ;;  %v4037_v24 = vadd.f32 %v4024_v48, %v3955_v15 }
 0x4a4   :  { %v4038_v16 = vadd.f32 %v4025_v40, %v3956_v61  ;;  %v4039_v8 = vadd.f32 %v4026_v27, %v3957_v38  ;;  %v4040_v57 = vadd.f32 %v4027_v34, %v3958_v53  ;;  %v4041_v47 = vadd.f32 %v4028_v42, %v3959_v55  ;;  %v9129_v55 = vld [vmem:[#allocation27_spill] sm:$0xff] }
 0x4a5   :  { %v4042_v44 = vadd.f32 %v4029_v17, %v3960_v36  ;;  %v4043_v25 = vadd.f32 %v4030_v41, %v3961_v46  ;;  %v4044_v59 = vadd.f32 %v4031_v12, %v3962_v52  ;;  %v4045_v32 = vadd.f32 %v4032_v6, %v3963_v14 }
 0x4a6   :  { %v4055_v29 = vrot.slane %v7780_v39, %v9128_v10  ;;  %v4059_v62 = vrot.slane %v7784_v33, %v9128_v10  ;;  %v4063_v37 = vrot.slane %v7788_v22, %v9128_v10  ;;  %v4067_v35 = vrot.slane %v7792_v19, %v9128_v10 }
 0x4a7   :  { %v4071_v56 = vrot.slane %v7798_v58, %v9128_v10  ;;  %v4075_v26 = vrot.slane %v7806_v30, %v9128_v10  ;;  %v4079_v5 = vrot.slane %v7810_v2, %v9128_v10  ;;  %v4083_v51 = vrot.slane %v7814_v45, %v9128_v10 }
 0x4a8   :  { %v4087_v15 = vrot.slane %v7817_v4, %v9128_v10  ;;  %v4091_v61 = vrot.slane %v7821_v43, %v9128_v10  ;;  %v4095_v38 = vrot.slane %v7824_v11, %v9128_v10  ;;  %v4099_v53 = vrot.slane %v7827_v20, %v9128_v10 }
 0x4a9   :  { %v4104_v36 = vmul.f32 %v4055_v29, %v9129_v55  ;;  %v4105_v46 = vmul.f32 %v4059_v62, %v9129_v55  ;;  %v4106_v52 = vmul.f32 %v4063_v37, %v9129_v55  ;;  %v4107_v14 = vmul.f32 %v4067_v35, %v9129_v55 }
 0x4aa   :  { %v4103_v60 = vrot.slane %v7838_v0, %v9128_v10  ;;  %v4108_v28 = vmul.f32 %v4071_v56, %v9129_v55  ;;  %v4109_v23 = vmul.f32 %v4075_v26, %v9129_v55  ;;  %v4110_v7 = vmul.f32 %v4079_v5, %v9129_v55 }
 0x4ab   :  { %v4046_v3 = vadd.f32 %v4033_v31, %v3964_v63  ;;  %v4111_v13 = vmul.f32 %v4083_v51, %v9129_v55  ;;  %v4112_v50 = vmul.f32 %v4087_v15, %v9129_v55  ;;  %v4113_v48 = vmul.f32 %v4091_v61, %v9129_v55  ;;  %v9130_v31 = vld [vmem:[#allocation7_spill] sm:$0xff]  ;;  %v9132_v61 = vld [vmem:[#allocation10_spill] sm:$0xff] }
 0x4ac   :  { %v4047_v40 = vadd.f32 %v4034_v9, %v3965_v49  ;;  %v4114_v27 = vmul.f32 %v4095_v38, %v9129_v55  ;;  %v4115_v34 = vmul.f32 %v4099_v53, %v9129_v55  ;;  %v4116_v42 = vmul.f32 %v4103_v60, %v9129_v55 }
 0x4ad   :  { %v4117_v17 = vadd.f32 %v4104_v36, %v4035_v1  ;;  %v4118_v41 = vadd.f32 %v4105_v46, %v4036_v54  ;;  %v4119_v12 = vadd.f32 %v4106_v52, %v4037_v24  ;;  %v4120_v6 = vadd.f32 %v4107_v14, %v4038_v16 }
 0x4ae   :  { %v4121_v29 = vadd.f32 %v4108_v28, %v4039_v8  ;;  %v4122_v62 = vadd.f32 %v4109_v23, %v4040_v57  ;;  %v4123_v63 = vadd.f32 %v4110_v7, %v4041_v47  ;;  %v4137_v37 = vrot.slane %v7780_v39, %v9130_v31  ;;  %v9133_v28 = vld [vmem:[#allocation29_spill] sm:$0xff] }
 0x4af   :  { %v4124_v35 = vadd.f32 %v4111_v13, %v4042_v44  ;;  %v4125_v56 = vadd.f32 %v4112_v50, %v4043_v25  ;;  %v4126_v26 = vadd.f32 %v4113_v48, %v4044_v59  ;;  %v4141_v49 = vrot.slane %v7784_v33, %v9130_v31  ;;  %v9131_v59 = vld [vmem:[#allocation24_spill] sm:$0xff] }
 0x4b0   :  { %v8088_v9 = vadd.f32 %v4114_v27, %v4045_v32  ;;  %v8090_v5 = vadd.f32 %v4115_v34, %v4046_v3  ;;  %v8092_v1 = vadd.f32 %v4116_v42, %v4047_v40  ;;  %v4145_v54 = vrot.slane %v7788_v22, %v9130_v31 }
 0x4b1   :  { %v4149_v24 = vrot.slane %v7792_v19, %v9130_v31  ;;  %v4153_v16 = vrot.slane %v7798_v58, %v9130_v31  ;;  %v4157_v8 = vrot.slane %v7806_v30, %v9130_v31  ;;  %v4161_v57 = vrot.slane %v7810_v2, %v9130_v31 }
 0x4b2   :  { %v4165_v47 = vrot.slane %v7814_v45, %v9130_v31  ;;  %v4169_v44 = vrot.slane %v7817_v4, %v9130_v31  ;;  %v4173_v25 = vrot.slane %v7821_v43, %v9130_v31  ;;  %v4186_v32 = vmul.f32 %v4137_v37, %v9131_v59 }
 0x4b3   :  { %v4177_v51 = vrot.slane %v7824_v11, %v9130_v31  ;;  %v4187_v15 = vmul.f32 %v4141_v49, %v9131_v59  ;;  %v4219_v38 = vrot.slane %v7780_v39, %v9132_v61  ;;  %v4223_v53 = vrot.slane %v7784_v33, %v9132_v61 }
 0x4b4   :  { %v4181_v55 = vrot.slane %v7827_v20, %v9130_v31  ;;  %v4188_v36 = vmul.f32 %v4145_v54, %v9131_v59  ;;  %v4199_v46 = vadd.f32 %v4186_v32, %v4117_v17  ;;  %v4227_v52 = vrot.slane %v7788_v22, %v9132_v61 }
 0x4b5   :  { %v4185_v14 = vrot.slane %v7838_v0, %v9130_v31  ;;  %v4200_v60 = vadd.f32 %v4187_v15, %v4118_v41  ;;  %v4268_v23 = vmul.f32 %v4219_v38, %v9133_v28  ;;  %v4269_v39 = vmul.f32 %v4223_v53, %v9133_v28 }
 0x4b6   :  { %v4189_v7 = vmul.f32 %v4149_v24, %v9131_v59  ;;  %v4201_v33 = vadd.f32 %v4188_v36, %v4119_v12  ;;  %v4231_v3 = vrot.slane %v7792_v19, %v9132_v61  ;;  %v4270_v13 = vmul.f32 %v4227_v52, %v9133_v28 }
 0x4b7   :  { %v4190_v50 = vmul.f32 %v4153_v16, %v9131_v59  ;;  %v4191_v22 = vmul.f32 %v4157_v8, %v9131_v59  ;;  %v4192_v48 = vmul.f32 %v4161_v57, %v9131_v59  ;;  %v4193_v40 = vmul.f32 %v4165_v47, %v9131_v59 }
 0x4b8   :  { %v4202_v27 = vadd.f32 %v4189_v7, %v4120_v6  ;;  %v4235_v34 = vrot.slane %v7798_v58, %v9132_v61  ;;  %v4271_v42 = vmul.f32 %v4231_v3, %v9133_v28  ;;  %v4281_v17 = vadd.f32 %v4268_v23, %v4199_v46  ;;  %v9135_v46 = vld [vmem:[#allocation12_spill] sm:$0xff] }
 0x4b9   :  { %v4194_v41 = vmul.f32 %v4169_v44, %v9131_v59  ;;  %v4195_v19 = vmul.f32 %v4173_v25, %v9131_v59  ;;  %v4196_v12 = vmul.f32 %v4177_v51, %v9131_v59  ;;  %v4282_v37 = vadd.f32 %v4269_v39, %v4200_v60  ;;  %v9134_v25 = vld [vmem:[#allocation26_spill] sm:$0xff] }
 0x4ba   :  { %v4203_v49 = vadd.f32 %v4190_v50, %v4121_v29  ;;  %v4239_v54 = vrot.slane %v7806_v30, %v9132_v61  ;;  %v4272_v24 = vmul.f32 %v4235_v34, %v9133_v28  ;;  %v4283_v6 = vadd.f32 %v4270_v13, %v4201_v33  ;;  %v9137_v33 = vld [vmem:[#allocation3_spill] sm:$0xff] }
 0x4bb   :  { %v4197_v16 = vmul.f32 %v4181_v55, %v9131_v59  ;;  %v4198_v58 = vmul.f32 %v4185_v14, %v9131_v59  ;;  %v4204_v8 = vadd.f32 %v4191_v22, %v4122_v62  ;;  %v4243_v57 = vrot.slane %v7810_v2, %v9132_v61 }
 0x4bc   :  { %v4273_v47 = vmul.f32 %v4239_v54, %v9133_v28  ;;  %v4284_v44 = vadd.f32 %v4271_v42, %v4202_v27  ;;  %v8150_v32 = vadd.f32 %v9134_v25, %v4281_v17  ;;  %v8153_v29 = vadd.f32 %v9134_v25, %v4282_v37 }
 0x4bd   :  { %v4205_v30 = vadd.f32 %v4192_v48, %v4123_v63  ;;  %v4206_v51 = vadd.f32 %v4193_v40, %v4124_v35  ;;  %v4247_v15 = vrot.slane %v7814_v45, %v9132_v61  ;;  %v4274_v59 = vmul.f32 %v4243_v57, %v9133_v28  ;;  %v9136_v35 = vld [vmem:[#allocation13_spill] sm:$0xff]  ;;  %v9138_v40 = vld [vmem:[#allocation15_spill] sm:$0xff] }
 0x4be   :  { %v4207_v62 = vadd.f32 %v4194_v41, %v4125_v56  ;;  %v4208_v38 = vadd.f32 %v4195_v19, %v4126_v26  ;;  %v4285_v53 = vadd.f32 %v4272_v24, %v4203_v49  ;;  %v8159_v2 = vadd.f32 %v9134_v25, %v4283_v6  ;;  %v9139_v19 = vld [vmem:[#allocation14_spill] sm:$0xff] }
 0x4bf   :  { %v4251_v55 = vrot.slane %v7817_v4, %v9132_v61  ;;  %v4275_v36 = vmul.f32 %v4247_v15, %v9133_v28  ;;  %v4362_v63 = vmul.f32 %v8150_v32, %v9135_v46  ;;  %v4363_v52 = vmul.f32 %v8153_v29, %v9136_v35 }
 0x4c0   :  { %v4209_v45 = vadd.f32 %v4196_v12, %v8088_v9  ;;  %v4210_v56 = vadd.f32 %v4197_v16, %v8090_v5  ;;  %v4286_v26 = vadd.f32 %v4273_v47, %v4204_v8  ;;  %v8171_v14 = vadd.f32 %v9134_v25, %v4284_v44  ;;  %v9140_v16 = vld [vmem:[#allocation11_spill] sm:$0xff] }
 0x4c1   :  { %v4211_v60 = vadd.f32 %v4198_v58, %v8092_v1  ;;  %v4255_v4 = vrot.slane %v7821_v43, %v9132_v61  ;;  %v4276_v23 = vmul.f32 %v4251_v55, %v9133_v28  ;;  %v4287_v39 = vadd.f32 %v4274_v59, %v4205_v30 }
 0x4c2   :  { %v8178_v7 = vadd.f32 %v9134_v25, %v4285_v53  ;;  %v4364_v9 = vmul.f32 %v8159_v2, %v9137_v33  ;;  %v4375_v3 = vadd.f32 %v4363_v52, %v4362_v63  ;;  %v4398_v5 = vmul.f32 %v4362_v63, %v8150_v32 }
 0x4c3   :  { %v4259_v13 = vrot.slane %v7824_v11, %v9132_v61  ;;  %v4277_v1 = vmul.f32 %v4255_v4, %v9133_v28  ;;  %v4288_v50 = vadd.f32 %v4275_v36, %v4206_v51  ;;  %v4399_v43 = vmul.f32 %v4363_v52, %v8153_v29  ;;  %v9141_v51 = vld [vmem:[#allocation17_spill] sm:$0xff]  ;;  %v9142_v36 = vld [vmem:[#allocation18_spill] sm:$0xff] }
 0x4c4   :  { %v4263_v22 = vrot.slane %v7827_v20, %v9132_v61  ;;  %v8190_v48 = vadd.f32 %v9134_v25, %v4286_v26  ;;  %v4365_v27 = vmul.f32 %v8171_v14, %v9138_v40  ;;  %v4376_v34 = vadd.f32 %v4375_v3, %v4364_v9 }
 0x4c5   :  { %v4267_v42 = vrot.slane %v7838_v0, %v9132_v61  ;;  %v4278_v11 = vmul.f32 %v4259_v13, %v9133_v28  ;;  %v4289_v17 = vadd.f32 %v4276_v23, %v4207_v62  ;;  %v8198_v41 = vadd.f32 %v9134_v25, %v4287_v39  ;;  %v9143_v23 = vld [vmem:[#allocation19_spill] sm:$0xff]  ;;  %v9144_v13 = vld [vmem:[#allocation20_spill] sm:$0xff] }
 0x4c6   :  { %v4366_v12 = vmul.f32 %v8178_v7, %v9139_v19  ;;  %v4377_v20 = vadd.f32 %v4376_v34, %v4365_v27  ;;  %v4400_v37 = vmul.f32 %v4364_v9, %v8159_v2  ;;  %v4411_v49 = vadd.f32 %v4399_v43, %v4398_v5 }
 0x4c7   :  { %v4279_v54 = vmul.f32 %v4263_v22, %v9133_v28  ;;  %v4280_v24 = vmul.f32 %v4267_v42, %v9133_v28  ;;  %v4290_v6 = vadd.f32 %v4277_v1, %v4208_v38  ;;  %v8206_v0 = vadd.f32 %v9134_v25, %v4288_v50 }
 0x4c8   :  { %v4367_v58 = vmul.f32 %v8190_v48, %v9140_v16  ;;  %v4378_v8 = vadd.f32 %v4377_v20, %v4366_v12  ;;  %v4401_v57 = vmul.f32 %v4365_v27, %v8171_v14  ;;  %v4412_v47 = vadd.f32 %v4411_v49, %v4400_v37  ;;  %v9145_v27 = vld [vmem:[#allocation21_spill] sm:$0xff]  ;;  %v9147_v37 = vld [vmem:[#allocation22_spill] sm:$0xff] }
 0x4c9   :  { %v4291_v44 = vadd.f32 %v4278_v11, %v4209_v45  ;;  %v8212_v30 = vadd.f32 %v9134_v25, %v4289_v17  ;;  %v4368_v15 = vmul.f32 %v8198_v41, %v9141_v51  ;;  %v4402_v28 = vmul.f32 %v4366_v12, %v8178_v7  ;;  %v9146_v12 = vld [vmem:[#allocation23_spill] sm:$0xff] }
 0x4ca   :  { %v4379_v59 = vadd.f32 %v4378_v8, %v4367_v58  ;;  %v4413_v62 = vadd.f32 %v4412_v47, %v4401_v57  ;;  %v4292_v38 = vadd.f32 %v4279_v54, %v4210_v56  ;;  %v4293_v53 = vadd.f32 %v4280_v24, %v4211_v60 }
 0x4cb   :  { %v8218_v55 = vadd.f32 %v9134_v25, %v4290_v6  ;;  %v4369_v63 = vmul.f32 %v8206_v0, %v9142_v36  ;;  %v4403_v45 = vmul.f32 %v4367_v58, %v8190_v48  ;;  %v8224_v4 = vadd.f32 %v9134_v25, %v4291_v44 }
 0x4cc   :  { %v4380_v52 = vadd.f32 %v4379_v59, %v4368_v15  ;;  %v4414_v26 = vadd.f32 %v4413_v62, %v4402_v28  ;;  %v4370_v39 = vmul.f32 %v8212_v30, %v9143_v23  ;;  %v4404_v56 = vmul.f32 %v4368_v15, %v8198_v41 }
 0x4cd   :  { %v8230_v3 = vadd.f32 %v9134_v25, %v4292_v38  ;;  %v8233_v5 = vadd.f32 %v9134_v25, %v4293_v53  ;;  %v4371_v1 = vmul.f32 %v8218_v55, %v9144_v13  ;;  %v4405_v43 = vmul.f32 %v4369_v63, %v8206_v0  ;;  %v9148_v53 = vld [vmem:[#allocation30_spill] sm:$0xff] }
 0x4ce   :  { %v4381_v9 = vadd.f32 %v4380_v52, %v4369_v63  ;;  %v4415_v60 = vadd.f32 %v4414_v26, %v4403_v45  ;;  %v4372_v34 = vmul.f32 %v8224_v4, %v9145_v27  ;;  %v4406_v11 = vmul.f32 %v4370_v39, %v8212_v30  ;;  %v9149_v52 = vld [vmem:[#allocation25_spill] sm:$0xff] }
 0x4cf   :  { %v4374_v20 = vmul.f32 %v8233_v5, %v9146_v12  ;;  %v4373_v25 = vmul.f32 %v8230_v3, %v9147_v37  ;;  %v4407_v54 = vmul.f32 %v4371_v1, %v8218_v55  ;;  %v4426_v63 = vmul.f32 %v9148_v53, %v9148_v53 }
 0x4d0   :  { %v4382_v50 = vadd.f32 %v4381_v9, %v4370_v39  ;;  %v4416_v22 = vadd.f32 %v4415_v60, %v4404_v56  ;;  %v4408_v58 = vmul.f32 %v4372_v34, %v8224_v4 }
 0x4d1   :  { %v4386_v57 = vsel %vm1309_vm2, %v4374_v20, 0.0  ;;  %v4410_v47 = vmul.f32 %v4374_v20, %v8233_v5  ;;  %v4409_v15 = vmul.f32 %v4373_v25, %v8230_v3  ;;  %v4427_v45 = vmul.f32 %v9149_v52, %v4426_v63  ;;  %v5146_v63 = vld [vmem:[%s8862_s6 + $0x40] ss:$8 sm:$0x10] }
 0x4d2   :  { %v4383_v42 = vadd.f32 %v4382_v50, %v4371_v1  ;;  %v4417_v17 = vadd.f32 %v4416_v22, %v4405_v43 }
 0x4d3   :  { %v4422_v62 = vsel %vm1309_vm2, %v4410_v47, 0.0 }
 0x4d4   :  { %v4384_v49 = vadd.f32 %v4383_v42, %v4372_v34  ;;  %v4418_v24 = vadd.f32 %v4417_v17, %v4406_v11  ;;  %v5287_v17 = vld [vmem:[%s8864_s3] sm:$0xff] }
 0x4d6   :  { %v4385_v6 = vadd.f32 %v4384_v49, %v4373_v25  ;;  %v4419_v8 = vadd.f32 %v4418_v24, %v4407_v54  ;;  %v5288_v49 = vld [vmem:[%s8865_s4] sm:$0xff]  ;;  %v9150_v24 = vmov 0  }
 0x4d8   :  { %v4387_v44 = vadd.f32 %v4386_v57, %v4385_v6  ;;  %v4420_v59 = vadd.f32 %v4419_v8, %v4408_v58  ;;  %v9151_v6 = vmov 5  }
 0x4da   :  { %4388 = vadd.xlane.f32.xlu0 %v4387_v44  ;;  %v4421_v28 = vadd.f32 %v4420_v59, %v4409_v15  ;;  %v9152_v44 = vmov 1   ;;  %v9153_v15 = vmov 2   ;;  %v9154_v59 = vmov 3  }
 0x4dc   :  { %v4423_v38 = vadd.f32 %v4422_v62, %v4421_v28  ;;  %v9155_v28 = vmov 4   ;;  %v4491_v62 = vld [vmem:[%s8862_s6] ss:$8 sm:$0xf] }
 0x4de   :  { %4424 = vadd.xlane.f32.xlu0 %v4423_v38  ;;  %v4492_v38 = vld [vmem:[%s8862_s6] ss:$8 sm:$0xf0] }
 0x4df   :  { %v8280_v52 = vor.u32 %v4492_v38, %v4491_v62 }
 0x4e2   :  { %4428 = vadd.xlane.f32.xlu0 %v4427_v45 }
 0x514   :  { %v4396_v39 = vpop.xlane.xlu1 %4395 }
 0x567   :  { %v4389_v26 = vpop.xlane.xlu0 %4388 }
 0x568   :  { %v4397_v9 = vadd.f32 %v4396_v39, %v4389_v26  ;;  %v9156_v26 = vld [vmem:[#allocation2_spill] sm:$0xff] }
 0x569   :  { %v4508_v39 = vrot.slane %v8280_v52, %v9156_v26 }
 0x56a   :  { %v4431_v60 = vmul.f32 0.0006377551, %v4397_v9  ;;  %v9157_v9 = vld [vmem:[#allocation4_spill] sm:$0xff] }
 0x56b   :  { %v4425_v56 = vpop.xlane.xlu0 %4424 }
 0x56c   :  { %v4433_v43 = vmul.f32 %v4431_v60, %v4431_v60 }
 0x56f   :  { %v4429_v1 = vpop.xlane.xlu0 %4428 }
 0x570   :  { %v4430_v50 = vadd.f32 %v4429_v1, %v4425_v56  ;;  %v4512_v56 = vrot.slane %v8280_v52, %v9157_v9 }
 0x572   :  { %v4432_v22 = vmul.f32 0.0006377551, %v4430_v50  ;;  %v4520_v50 = vrot.slane %v8280_v52, %v9010_v18 }
 0x574   :  { %v4434_v34 = vsub.f32 %v4432_v22, %v4433_v43  ;;  %v4524_v43 = vrot.slane %v8280_v52, %v9011_v21  ;;  %v4528_v22 = vrot.slane %v8280_v52, %v9128_v10 }
 0x576   :  { %v4435_v42 = vadd.f32 1e-05, %v4434_v34  ;;  %v4532_v34 = vrot.slane %v8280_v52, %v9130_v31 }
 0x578   :  { %5279 = vrsqrt.f32 %v4435_v42  ;;  %v4536_v42 = vrot.slane %v8280_v52, %v9132_v61 }
 0x582   :  { %v5280_v11 = vpop.eup %5279 }
 0x583   :  { %v4437_v20 = vmul.f32 %v5287_v17, %v5280_v11 }
 0x585   :  { %4442 = vperm.xlu1 %5266, %v4437_v20   ;;  %v4438_v25 = vmul.f32 %v4437_v20, %v4431_v60  ;;  %v9158_v60 = vld [vmem:[#allocation6_spill] sm:$0xff] }
 0x586   :  { %v4516_v1 = vrot.slane %v8280_v52, %v9158_v60 }
 0x587   :  { %v4439_v54 = vsub.f32 %v5288_v49, %v4438_v25 }
 0x589   :  { %4460 = vperm.xlu0 %5267, %v4439_v54   ;;  %5268 = vset.pattern.permute.xlu1 %v9150_v24 }
 0x58d   :  { %5274 = vset.pattern.permute.xlu0 %v9151_v6 }
 0x604   :  { %v4443_v58 = vpop.permute.xlu1 %4442 }
 0x605   :  { %v4476_v57 = vmul.f32 %v4443_v58, %v9148_v53  ;;  %v5145_v53 = vld [vmem:[%s8862_s6 + $0x40] ss:$8 sm:$0xf]  ;;  %v4445_v25 = vmul.f32 %v4443_v58, %v8150_v32  ;;  %v4446_v49 = vmul.f32 %v4443_v58, %v8153_v29  ;;  %v4447_v54 = vmul.f32 %v4443_v58, %v8159_v2 }
 0x606   :  { %v8282_v45 = vor.u32 %v5146_v63, %v5145_v53  ;;  %v4448_v24 = vmul.f32 %v4443_v58, %v8171_v14  ;;  %v4455_v32 = vmul.f32 %v4443_v58, %v8224_v4  ;;  %v4456_v29 = vmul.f32 %v4443_v58, %v8230_v3 }
 0x607   :  { %v4457_v2 = vmul.f32 %v4443_v58, %v8233_v5 }
 0x608   :  { %v4461_v8 = vpop.permute.xlu0 %4460  ;;  %v4540_v11 = vrot.slane %v8282_v45, %v9156_v26  ;;  %v4544_v17 = vrot.slane %v8282_v45, %v9157_v9  ;;  %v4548_v20 = vrot.slane %v8282_v45, %v9158_v60  ;;  %v4552_v3 = vrot.slane %v8282_v45, %v9010_v18 }
 0x609   :  { %v4477_v47 = vadd.f32 %v4476_v57, %v4461_v8  ;;  %v4450_v57 = vmul.f32 %v4443_v58, %v8190_v48  ;;  %v4464_v14 = vadd.f32 %v4461_v8, %v4446_v49  ;;  %v4465_v62 = vadd.f32 %v4461_v8, %v4447_v54  ;;  %v5149_v49 = vld [vmem:[%s8862_s6 + $0x41] ss:$8 sm:$0xf] }
 0x60a   :  { %v4473_v5 = vadd.f32 %v4461_v8, %v4455_v32  ;;  %v4475_v63 = vadd.f32 %v4461_v8, %v4457_v2  ;;  %v5150_v54 = vld [vmem:[%s8862_s6 + $0x41] ss:$8 sm:$0x10] }
 0x60b   :  { %4500 = vperm.xlu1 %5268, %v4477_v47   ;;  %v4468_v48 = vadd.f32 %v4461_v8, %v4450_v57  ;;  %v8342_v57 = vmul.f32 %v4465_v62, %v9137_v33 }
 0x60f   :  { %5269 = vset.pattern.permute.xlu1 %v9152_v44  ;;  %v4452_v44 = vmul.f32 %v4443_v58, %v8206_v0  ;;  %v5148_v0 = vld [vmem:[%s8862_s6 + $0x1] ss:$8 sm:$0xf0] }
 0x610   :  { %4605 = vperm.xlu1 %5269, %v4477_v47  }
 0x614   :  { %5270 = vset.pattern.permute.xlu1 %v9153_v15  ;;  %v4453_v15 = vmul.f32 %v4443_v58, %v8212_v30  ;;  %v4470_v30 = vadd.f32 %v4461_v8, %v4452_v44  ;;  %v5152_v44 = vld [vmem:[%s8862_s6 + $0x2] ss:$8 sm:$0xf0] }
 0x615   :  { %4710 = vperm.xlu1 %5270, %v4477_v47  }
 0x619   :  { %5271 = vset.pattern.permute.xlu1 %v9154_v59  ;;  %v4454_v59 = vmul.f32 %v4443_v58, %v8218_v55  ;;  %v4471_v55 = vadd.f32 %v4461_v8, %v4453_v15 }
 0x61a   :  { %4815 = vperm.xlu1 %5271, %v4477_v47  }
 0x61b   :  { %v4472_v4 = vadd.f32 %v4461_v8, %v4454_v59  ;;  %v8365_v59 = vmul.f32 %v4470_v30, %v9142_v36  ;;  %v8368_v32 = vmul.f32 %v4471_v55, %v9143_v23  ;;  %v5153_v36 = vld [vmem:[%s8862_s6 + $0x42] ss:$8 sm:$0xf]  ;;  %v5157_v55 = vld [vmem:[%s8862_s6 + $0x43] ss:$8 sm:$0xf] }
 0x61c   :  { %v5154_v23 = vld [vmem:[%s8862_s6 + $0x42] ss:$8 sm:$0x10] }
 0x61d   :  { %v8420_v30 = vor.u32 %v5154_v23, %v5153_v36  ;;  %v5159_v23 = vld [vmem:[%s8862_s6 + $0x4] ss:$8 sm:$0xf] }
 0x61e   :  { %5272 = vset.pattern.permute.xlu1 %v9155_v28  ;;  %v4463_v28 = vadd.f32 %v4461_v8, %v4445_v25  ;;  %v4556_v25 = vrot.slane %v8282_v45, %v9011_v21 }
 0x61f   :  { %4920 = vperm.xlu1 %5272, %v4477_v47  }
 0x623   :  { %5273 = vset.pattern.permute.xlu1 %v9151_v6  ;;  %v4449_v6 = vmul.f32 %v4443_v58, %v8178_v7  ;;  %v4466_v7 = vadd.f32 %v4461_v8, %v4448_v24  ;;  %v8336_v24 = vmul.f32 %v4463_v28, %v9135_v46  ;;  %v5155_v28 = vld [vmem:[%s8862_s6 + $0x3] ss:$8 sm:$0xf] }
 0x624   :  { %5025 = vperm.xlu1 %5273, %v4477_v47   ;;  %v4451_v47 = vmul.f32 %v4443_v58, %v8198_v41  ;;  %v5147_v41 = vld [vmem:[%s8862_s6 + $0x1] ss:$8 sm:$0xf]  ;;  %v4474_v58 = vadd.f32 %v4461_v8, %v4456_v29  ;;  %v8371_v29 = vmul.f32 %v4472_v4, %v9144_v13  ;;  %v5158_v4 = vld [vmem:[%s8862_s6 + $0x43] ss:$8 sm:$0x10] }
 0x625   :  { %v4467_v38 = vadd.f32 %v4461_v8, %v4449_v6  ;;  %v8339_v6 = vmul.f32 %v4464_v14, %v9136_v35  ;;  %v8353_v15 = vmul.f32 %v4466_v7, %v9138_v40  ;;  %v8359_v35 = vmul.f32 %v4468_v48, %v9140_v16  ;;  %v5156_v14 = vld [vmem:[%s8862_s6 + $0x3] ss:$8 sm:$0xf0] }
 0x626   :  { %v4469_v53 = vadd.f32 %v4461_v8, %v4451_v47  ;;  %v8344_v8 = vor.u32 %v5148_v0, %v5147_v41  ;;  %v5151_v47 = vld [vmem:[%s8862_s6 + $0x2] ss:$8 sm:$0xf]  ;;  %v8373_v40 = vor.u32 %v5150_v54, %v5149_v49  ;;  %v8379_v16 = vmul.f32 %v4474_v58, %v9147_v37 }
 0x627   :  { %v8356_v46 = vmul.f32 %v4467_v38, %v9139_v19  ;;  %v8376_v19 = vmul.f32 %v4473_v5, %v9145_v27  ;;  %v8384_v2 = vor.u32 %v5152_v44, %v5151_v47  ;;  %v8434_v49 = vor.u32 %v5156_v14, %v5155_v28  ;;  %v5160_v28 = vld [vmem:[%s8862_s6 + $0x4] ss:$8 sm:$0xf0]  ;;  %v5163_v14 = vld [vmem:[%s8862_s6 + $0x5] ss:$8 sm:$0xf] }
 0x628   :  { %v8362_v33 = vmul.f32 %v4469_v53, %v9141_v51  ;;  %v8382_v51 = vmul.f32 %v4475_v63, %v9146_v12  ;;  %v4613_v13 = vrot.slane %v8344_v8, %v9156_v26  ;;  %v4617_v27 = vrot.slane %v8344_v8, %v9157_v9  ;;  %v5161_v47 = vld [vmem:[%s8862_s6 + $0x44] ss:$8 sm:$0xf]  ;;  %v5164_v44 = vld [vmem:[%s8862_s6 + $0x5] ss:$8 sm:$0xf0] }
 0x629   :  { %v4621_v12 = vrot.slane %v8344_v8, %v9158_v60  ;;  %v4625_v37 = vrot.slane %v8344_v8, %v9010_v18  ;;  %v4629_v62 = vrot.slane %v8344_v8, %v9011_v21  ;;  %v4633_v7 = vrot.slane %v8344_v8, %v9128_v10  ;;  %v5166_v63 = vld [vmem:[%s8862_s6 + $0x45] ss:$8 sm:$0x10] }
 0x62a   :  { %v4637_v38 = vrot.slane %v8344_v8, %v9130_v31  ;;  %v4641_v48 = vrot.slane %v8344_v8, %v9132_v61  ;;  %v8456_v54 = vor.u32 %v5158_v4, %v5157_v55  ;;  %v5162_v55 = vld [vmem:[%s8862_s6 + $0x44] ss:$8 sm:$0x10]  ;;  %v8478_v36 = vor.u32 %v5160_v28, %v5159_v23  ;;  %v5165_v4 = vld [vmem:[%s8862_s6 + $0x45] ss:$8 sm:$0xf] }
 0x62b   :  { %v8500_v41 = vor.u32 %v5162_v55, %v5161_v47  ;;  %v8514_v0 = vor.u32 %v5164_v44, %v5163_v14  ;;  %v8530_v14 = vor.u32 %v5166_v63, %v5165_v4  ;;  %v9166_v8 = vrot.slane %v8373_v40, %v9011_v21 }
 0x62d   :  { %9159 = vst [vmem:[#allocation28_spill] sm:$0xff] %v8500_v41  ;;  %9160 = vst [vmem:[#allocation16_spill] sm:$0xff] %v8514_v0 }
 0x62e   :  { %9161 = vst [vmem:[#allocation8_spill] sm:$0xff] %v8530_v14 }
 0x68a   :  { %v4501_v55 = vpop.permute.xlu1 %4500 }
 0x68b   :  { %v4570_v4 = vmul.f32 %v4508_v39, %v4501_v55  ;;  %v4571_v5 = vmul.f32 %v4512_v56, %v4501_v55  ;;  %v4572_v23 = vmul.f32 %v4516_v1, %v4501_v55  ;;  %v4573_v28 = vmul.f32 %v4520_v50, %v4501_v55 }
 0x68c   :  { %v4574_v44 = vmul.f32 %v4524_v43, %v4501_v55  ;;  %v4575_v39 = vmul.f32 %v4528_v22, %v4501_v55  ;;  %v4576_v56 = vmul.f32 %v4532_v34, %v4501_v55  ;;  %v4577_v1 = vmul.f32 %v4536_v42, %v4501_v55 }
 0x68d   :  { %v4578_v50 = vmul.f32 %v4540_v11, %v4501_v55  ;;  %v4579_v43 = vmul.f32 %v4544_v17, %v4501_v55  ;;  %v4580_v22 = vmul.f32 %v4548_v20, %v4501_v55  ;;  %v4581_v34 = vmul.f32 %v4552_v3, %v4501_v55 }
 0x68e   :  { %v4582_v52 = vmul.f32 %v4556_v25, %v4501_v55  ;;  %v4583_v42 = vadd.f32 %v4570_v4, %v8336_v24  ;;  %v4584_v11 = vadd.f32 %v4571_v5, %v8339_v6  ;;  %v4585_v58 = vadd.f32 %v4572_v23, %v8342_v57 }
 0x68f   :  { %v4586_v17 = vadd.f32 %v4573_v28, %v8353_v15  ;;  %v4587_v63 = vadd.f32 %v4574_v44, %v8356_v46  ;;  %v4588_v20 = vadd.f32 %v4575_v39, %v8359_v35  ;;  %v4589_v47 = vadd.f32 %v4576_v56, %v8362_v33  ;;  %v4606_v53 = vpop.permute.xlu1 %4605 }
 0x690   :  { %v4590_v3 = vadd.f32 %v4577_v1, %v8365_v59  ;;  %v4591_v45 = vadd.f32 %v4578_v50, %v8368_v32  ;;  %v4592_v25 = vadd.f32 %v4579_v43, %v8371_v29  ;;  %v4593_v24 = vadd.f32 %v4580_v22, %v8376_v19 }
 0x691   :  { %v4594_v6 = vadd.f32 %v4581_v34, %v8379_v16  ;;  %v4595_v57 = vadd.f32 %v4582_v52, %v8382_v51  ;;  %v4675_v15 = vmul.f32 %v4613_v13, %v4606_v53  ;;  %v4676_v46 = vmul.f32 %v4617_v27, %v4606_v53 }
 0x692   :  { %v4677_v35 = vmul.f32 %v4621_v12, %v4606_v53  ;;  %v4678_v33 = vmul.f32 %v4625_v37, %v4606_v53  ;;  %v4679_v59 = vmul.f32 %v4629_v62, %v4606_v53  ;;  %v4680_v32 = vmul.f32 %v4633_v7, %v4606_v53 }
 0x693   :  { %v4681_v29 = vmul.f32 %v4637_v38, %v4606_v53  ;;  %v4682_v19 = vmul.f32 %v4641_v48, %v4606_v53  ;;  %v9162_v16 = vrot.slane %v8373_v40, %v9156_v26  ;;  %v9163_v13 = vrot.slane %v8373_v40, %v9157_v9 }
 0x694   :  { %v9164_v12 = vrot.slane %v8373_v40, %v9158_v60  ;;  %v9165_v62 = vrot.slane %v8373_v40, %v9010_v18  ;;  %v4687_v38 = vmul.f32 %v9166_v8, %v4606_v53  ;;  %v4688_v48 = vadd.f32 %v4675_v15, %v4583_v42  ;;  %v4711_v5 = vpop.permute.xlu1 %4710 }
 0x695   :  { %v4683_v51 = vmul.f32 %v9162_v16, %v4606_v53  ;;  %v4684_v27 = vmul.f32 %v9163_v13, %v4606_v53  ;;  %v4689_v23 = vadd.f32 %v4676_v46, %v4584_v11  ;;  %v4690_v28 = vadd.f32 %v4677_v35, %v4585_v58 }
 0x696   :  { %v4685_v37 = vmul.f32 %v9164_v12, %v4606_v53  ;;  %v4686_v7 = vmul.f32 %v9165_v62, %v4606_v53  ;;  %v4691_v55 = vadd.f32 %v4678_v33, %v4586_v17  ;;  %v4692_v44 = vadd.f32 %v4679_v59, %v4587_v63 }
 0x697   :  { %v4693_v4 = vadd.f32 %v4680_v32, %v4588_v20  ;;  %v4694_v39 = vadd.f32 %v4681_v29, %v4589_v47  ;;  %v4695_v56 = vadd.f32 %v4682_v19, %v4590_v3  ;;  %v4696_v1 = vadd.f32 %v4683_v51, %v4591_v45 }
 0x698   :  { %v4697_v50 = vadd.f32 %v4684_v27, %v4592_v25  ;;  %v4698_v43 = vadd.f32 %v4685_v37, %v4593_v24  ;;  %v4699_v22 = vadd.f32 %v4686_v7, %v4594_v6  ;;  %v4700_v34 = vadd.f32 %v4687_v38, %v4595_v57 }
 0x699   :  { %v9167_v52 = vrot.slane %v8384_v2, %v9156_v26  ;;  %v9168_v40 = vrot.slane %v8384_v2, %v9157_v9  ;;  %v9169_v58 = vrot.slane %v8384_v2, %v9158_v60  ;;  %v9170_v47 = vrot.slane %v8384_v2, %v9010_v18  ;;  %v4816_v57 = vpop.permute.xlu1 %4815 }
 0x69a   :  { %v9171_v11 = vrot.slane %v8384_v2, %v9011_v21  ;;  %v9172_v20 = vrot.slane %v8384_v2, %v9128_v10  ;;  %v9173_v45 = vrot.slane %v8384_v2, %v9130_v31  ;;  %v9174_v24 = vrot.slane %v8384_v2, %v9132_v61 }
 0x69b   :  { %v4780_v16 = vmul.f32 %v9167_v52, %v4711_v5  ;;  %v4781_v53 = vmul.f32 %v9168_v40, %v4711_v5  ;;  %v4782_v63 = vmul.f32 %v9169_v58, %v4711_v5  ;;  %v4783_v42 = vmul.f32 %v9170_v47, %v4711_v5 }
 0x69c   :  { %v4784_v17 = vmul.f32 %v9171_v11, %v4711_v5  ;;  %v4785_v3 = vmul.f32 %v9172_v20, %v4711_v5  ;;  %v4786_v25 = vmul.f32 %v9173_v45, %v4711_v5  ;;  %v4787_v6 = vmul.f32 %v9174_v24, %v4711_v5 }
 0x69d   :  { %v9175_v15 = vrot.slane %v8420_v30, %v9156_v26  ;;  %v9176_v35 = vrot.slane %v8420_v30, %v9157_v9  ;;  %v9177_v59 = vrot.slane %v8420_v30, %v9158_v60  ;;  %v9178_v29 = vrot.slane %v8420_v30, %v9010_v18 }
 0x69e   :  { %v9179_v2 = vrot.slane %v8420_v30, %v9011_v21  ;;  %v9180_v13 = vrot.slane %v8434_v49, %v9156_v26  ;;  %v9181_v12 = vrot.slane %v8434_v49, %v9157_v9  ;;  %v9182_v62 = vrot.slane %v8434_v49, %v9158_v60 }
 0x69f   :  { %v4788_v46 = vmul.f32 %v9175_v15, %v4711_v5  ;;  %v4789_v33 = vmul.f32 %v9176_v35, %v4711_v5  ;;  %v4790_v32 = vmul.f32 %v9177_v59, %v4711_v5  ;;  %v4791_v19 = vmul.f32 %v9178_v29, %v4711_v5 }
 0x6a0   :  { %v4792_v51 = vmul.f32 %v9179_v2, %v4711_v5  ;;  %v4885_v27 = vmul.f32 %v9180_v13, %v4816_v57  ;;  %v4886_v37 = vmul.f32 %v9181_v12, %v4816_v57  ;;  %v4887_v7 = vmul.f32 %v9182_v62, %v4816_v57 }
 0x6a1   :  { %v9183_v8 = vrot.slane %v8434_v49, %v9010_v18  ;;  %v9184_v30 = vrot.slane %v8434_v49, %v9011_v21  ;;  %v9185_v52 = vrot.slane %v8434_v49, %v9128_v10  ;;  %v9186_v58 = vrot.slane %v8434_v49, %v9130_v31  ;;  %v4921_v10 = vpop.permute.xlu1 %4920 }
 0x6a2   :  { %v9187_v11 = vrot.slane %v8434_v49, %v9132_v61  ;;  %v9188_v45 = vrot.slane %v8456_v54, %v9156_v26  ;;  %v9189_v15 = vrot.slane %v8456_v54, %v9157_v9  ;;  %v9190_v59 = vrot.slane %v8456_v54, %v9158_v60 }
 0x6a3   :  { %v4888_v38 = vmul.f32 %v9183_v8, %v4816_v57  ;;  %v4889_v5 = vmul.f32 %v9184_v30, %v4816_v57  ;;  %v4890_v40 = vmul.f32 %v9185_v52, %v4816_v57  ;;  %v4891_v47 = vmul.f32 %v9186_v58, %v4816_v57 }
 0x6a4   :  { %v4892_v20 = vmul.f32 %v9187_v11, %v4816_v57  ;;  %v4893_v24 = vmul.f32 %v9188_v45, %v4816_v57  ;;  %v4894_v35 = vmul.f32 %v9189_v15, %v4816_v57  ;;  %v4895_v29 = vmul.f32 %v9190_v59, %v4816_v57 }
 0x6a5   :  { %v9191_v2 = vrot.slane %v8456_v54, %v9010_v18  ;;  %v9192_v49 = vrot.slane %v8456_v54, %v9011_v21  ;;  %v4793_v62 = vadd.f32 %v4780_v16, %v4688_v48  ;;  %v4794_v8 = vadd.f32 %v4781_v53, %v4689_v23  ;;  %v9197_v53 = vld [vmem:[#allocation9_spill] sm:$0xff] }
 0x6a6   :  { %v4795_v30 = vadd.f32 %v4782_v63, %v4690_v28  ;;  %v4796_v52 = vadd.f32 %v4783_v42, %v4691_v55  ;;  %v4797_v58 = vadd.f32 %v4784_v17, %v4692_v44  ;;  %v4798_v11 = vadd.f32 %v4785_v3, %v4693_v4  ;;  %v9202_v3 = vld [vmem:[#allocation7_spill] sm:$0xff] }
 0x6a7   :  { %v4896_v13 = vmul.f32 %v9191_v2, %v4816_v57  ;;  %v4897_v12 = vmul.f32 %v9192_v49, %v4816_v57  ;;  %v4799_v45 = vadd.f32 %v4786_v25, %v4694_v39  ;;  %v4800_v15 = vadd.f32 %v4787_v6, %v4695_v56 }
 0x6a8   :  { %v4801_v14 = vadd.f32 %v4788_v46, %v4696_v1  ;;  %v4802_v0 = vadd.f32 %v4789_v33, %v4697_v50  ;;  %v4803_v41 = vadd.f32 %v4790_v32, %v4698_v43  ;;  %v4804_v59 = vadd.f32 %v4791_v19, %v4699_v22  ;;  %v9195_v22 = vld [vmem:[#allocation6_spill] sm:$0xff]  ;;  %v9206_v19 = vld [vmem:[#allocation28_spill] sm:$0xff] }
 0x6a9   :  { %v4805_v61 = vadd.f32 %v4792_v51, %v4700_v34  ;;  %v4898_v31 = vadd.f32 %v4885_v27, %v4793_v62  ;;  %v4899_v2 = vadd.f32 %v4886_v37, %v4794_v8  ;;  %v4900_v18 = vadd.f32 %v4887_v7, %v4795_v30  ;;  %v9204_v46 = vld [vmem:[#allocation10_spill] sm:$0xff] }
 0x6aa   :  { %v4901_v60 = vadd.f32 %v4888_v38, %v4796_v52  ;;  %v4902_v54 = vadd.f32 %v4889_v5, %v4797_v58  ;;  %v4903_v57 = vadd.f32 %v4890_v40, %v4798_v11  ;;  %v4904_v48 = vadd.f32 %v4891_v47, %v4799_v45 }
 0x6ab   :  { %v4905_v23 = vadd.f32 %v4892_v20, %v4800_v15  ;;  %v4906_v28 = vadd.f32 %v4893_v24, %v4801_v14  ;;  %v4907_v55 = vadd.f32 %v4894_v35, %v4802_v0  ;;  %v4908_v44 = vadd.f32 %v4895_v29, %v4803_v41  ;;  %v9200_v0 = vld [vmem:[#allocation5_spill] sm:$0xff] }
 0x6ac   :  { %v4909_v4 = vadd.f32 %v4896_v13, %v4804_v59  ;;  %v4910_v39 = vadd.f32 %v4897_v12, %v4805_v61  ;;  %v9193_v56 = vrot.slane %v8478_v36, %v9156_v26  ;;  %v9194_v50 = vrot.slane %v8478_v36, %v9157_v9  ;;  %v5026_v13 = vpop.permute.xlu1 %5025  ;;  %v9212_v59 = vld [vmem:[#allocation16_spill] sm:$0xff] }
 0x6ad   :  { %v9196_v34 = vrot.slane %v8478_v36, %v9195_v22  ;;  %v9198_v63 = vrot.slane %v8478_v36, %v9197_v53  ;;  %v9199_v41 = vrot.slane %v8478_v36, %v9011_v21  ;;  %v9201_v42 = vrot.slane %v8478_v36, %v9200_v0 }
 0x6ae   :  { %v4990_v1 = vmul.f32 %v9193_v56, %v4921_v10  ;;  %v4991_v43 = vmul.f32 %v9194_v50, %v4921_v10  ;;  %v9203_v25 = vrot.slane %v8478_v36, %v9202_v3  ;;  %v9205_v33 = vrot.slane %v8478_v36, %v9204_v46 }
 0x6af   :  { %v4992_v16 = vmul.f32 %v9196_v34, %v4921_v10  ;;  %v4993_v14 = vmul.f32 %v9198_v63, %v4921_v10  ;;  %v4994_v61 = vmul.f32 %v9199_v41, %v4921_v10  ;;  %v4995_v17 = vmul.f32 %v9201_v42, %v4921_v10 }
 0x6b0   :  { %v4996_v6 = vmul.f32 %v9203_v25, %v4921_v10  ;;  %v4997_v32 = vmul.f32 %v9205_v33, %v4921_v10  ;;  %v9207_v51 = vrot.slane %v9206_v19, %v9156_v26  ;;  %v9208_v37 = vrot.slane %v9206_v19, %v9157_v9 }
 0x6b1   :  { %v9209_v38 = vrot.slane %v9206_v19, %v9195_v22  ;;  %v9210_v40 = vrot.slane %v9206_v19, %v9197_v53  ;;  %v9211_v36 = vrot.slane %v9206_v19, %v9011_v21  ;;  %v5003_v24 = vadd.f32 %v4990_v1, %v4898_v31  ;;  %v9221_v1 = vld [vmem:[#allocation8_spill] sm:$0xff] }
 0x6b2   :  { %v4998_v27 = vmul.f32 %v9207_v51, %v4921_v10  ;;  %v4999_v7 = vmul.f32 %v9208_v37, %v4921_v10  ;;  %v5004_v35 = vadd.f32 %v4991_v43, %v4899_v2  ;;  %v5005_v29 = vadd.f32 %v4992_v16, %v4900_v18 }
 0x6b3   :  { %v5000_v5 = vmul.f32 %v9209_v38, %v4921_v10  ;;  %v5001_v47 = vmul.f32 %v9210_v40, %v4921_v10  ;;  %v5002_v20 = vmul.f32 %v9211_v36, %v4921_v10  ;;  %v5006_v49 = vadd.f32 %v4993_v14, %v4901_v60 }
 0x6b4   :  { %v5007_v12 = vadd.f32 %v4994_v61, %v4902_v54  ;;  %v5008_v62 = vadd.f32 %v4995_v17, %v4903_v57  ;;  %v5009_v8 = vadd.f32 %v4996_v6, %v4904_v48  ;;  %v5010_v30 = vadd.f32 %v4997_v32, %v4905_v23 }
 0x6b5   :  { %v5011_v52 = vadd.f32 %v4998_v27, %v4906_v28  ;;  %v5012_v58 = vadd.f32 %v4999_v7, %v4907_v55  ;;  %v5013_v11 = vadd.f32 %v5000_v5, %v4908_v44  ;;  %v5014_v45 = vadd.f32 %v5001_v47, %v4909_v4 }
 0x6b6   :  { %v5015_v15 = vadd.f32 %v5002_v20, %v4910_v39  ;;  %v9213_v56 = vrot.slane %v9212_v59, %v9156_v26  ;;  %v9214_v10 = vrot.slane %v9212_v59, %v9157_v9  ;;  %v9215_v18 = vrot.slane %v9212_v59, %v9195_v22 }
 0x6b7   :  { %v9216_v2 = vrot.slane %v9212_v59, %v9197_v53  ;;  %v9217_v57 = vrot.slane %v9212_v59, %v9011_v21  ;;  %v9218_v23 = vrot.slane %v9212_v59, %v9200_v0  ;;  %v9219_v55 = vrot.slane %v9212_v59, %v9202_v3 }
 0x6b8   :  { %v5095_v50 = vmul.f32 %v9213_v56, %v5026_v13  ;;  %v5096_v31 = vmul.f32 %v9214_v10, %v5026_v13  ;;  %v5097_v60 = vmul.f32 %v9215_v18, %v5026_v13  ;;  %v9220_v4 = vrot.slane %v9212_v59, %v9204_v46 }
 0x6b9   :  { %v5098_v54 = vmul.f32 %v9216_v2, %v5026_v13  ;;  %v5099_v48 = vmul.f32 %v9217_v57, %v5026_v13  ;;  %v5100_v28 = vmul.f32 %v9218_v23, %v5026_v13  ;;  %v5101_v44 = vmul.f32 %v9219_v55, %v5026_v13 }
 0x6ba   :  { %v5102_v39 = vmul.f32 %v9220_v4, %v5026_v13  ;;  %v9222_v43 = vrot.slane %v9221_v1, %v9156_v26  ;;  %v9223_v16 = vrot.slane %v9221_v1, %v9157_v9  ;;  %v9224_v14 = vrot.slane %v9221_v1, %v9195_v22 }
 0x6bb   :  { %v9225_v61 = vrot.slane %v9221_v1, %v9197_v53  ;;  %v9226_v42 = vrot.slane %v9221_v1, %v9011_v21  ;;  %v5108_v3 = vadd.f32 %v5095_v50, %v5003_v24  ;;  %v5109_v25 = vadd.f32 %v5096_v31, %v5004_v35 }
 0x6bc   :  { %v5103_v34 = vmul.f32 %v9222_v43, %v5026_v13  ;;  %v5104_v63 = vmul.f32 %v9223_v16, %v5026_v13  ;;  %v5105_v41 = vmul.f32 %v9224_v14, %v5026_v13  ;;  %v5110_v26 = vadd.f32 %v5097_v60, %v5005_v29 }
 0x6bd   :  { %v5106_v0 = vmul.f32 %v9225_v61, %v5026_v13  ;;  %v5107_v17 = vmul.f32 %v9226_v42, %v5026_v13  ;;  %v5111_v6 = vadd.f32 %v5098_v54, %v5006_v49  ;;  %v5112_v46 = vadd.f32 %v5099_v48, %v5007_v12  ;;  %5121 = vst [vmem:[%s8866_s7] sm:$0xff] %v5108_v3 }
 0x6be   :  { %v5113_v33 = vadd.f32 %v5100_v28, %v5008_v62  ;;  %v5114_v9 = vadd.f32 %v5101_v44, %v5009_v8  ;;  %v5115_v32 = vadd.f32 %v5102_v39, %v5010_v30  ;;  %v5116_v19 = vadd.f32 %v5103_v34, %v5011_v52  ;;  %5122 = vst [vmem:[%s8866_s7 + $0x8] sm:$0xff] %v5109_v25 }
 0x6bf   :  { %v5117_v22 = vadd.f32 %v5104_v63, %v5012_v58  ;;  %v5118_v53 = vadd.f32 %v5105_v41, %v5013_v11  ;;  %v5119_v51 = vadd.f32 %v5106_v0, %v5014_v45  ;;  %v5120_v27 = vadd.f32 %v5107_v17, %v5015_v15  ;;  %5123 = vst [vmem:[%s8866_s7 + $0x10] sm:$0xff] %v5110_v26 }
 0x6c0   :  { %5124 = vst [vmem:[%s8866_s7 + $0x18] sm:$0xff] %v5111_v6  ;;  %5125 = vst [vmem:[%s8866_s7 + $0x20] sm:$0xff] %v5112_v46 }
 0x6c1   :  { %5126 = vst [vmem:[%s8866_s7 + $0x28] sm:$0xff] %v5113_v33  ;;  %5127 = vst [vmem:[%s8866_s7 + $0x30] sm:$0xff] %v5114_v9 }
 0x6c2   :  { %5128 = vst [vmem:[%s8866_s7 + $0x38] sm:$0xff] %v5115_v32  ;;  %5129 = vst [vmem:[%s8866_s7 + $0x40] sm:$0xff] %v5116_v19 }
 0x6c3   :  { %5130 = vst [vmem:[%s8866_s7 + $0x48] sm:$0xff] %v5117_v22  ;;  %5131 = vst [vmem:[%s8866_s7 + $0x50] sm:$0xff] %v5118_v53 }
 0x6c4   :  { %5132 = vst [vmem:[%s8866_s7 + $0x58] sm:$0xff] %v5119_v51  ;;  %5133 = vst.msk [vmem:[%s8866_s7 + $0x60] sm:$0xff] %vm1309_vm2, %v5120_v27 }

</bundles_post_ra>
